<compile_context>
chip_gen: v5e
topology: v5e:2x2
jax: 0.10.0
libtpu: 0.0.40
codegen_flags: <defaults>
</compile_context>

<pallas_src>
import jax
import jax.numpy as jnp
from jax.experimental import pallas as pl
from jax.experimental.pallas import tpu as pltpu

KSIZE = 7
PAD = 3            # padding = 3 for kernel_size = 7
KK = KSIZE * KSIZE


def _spatial_attention_kernel(w_ref, x_ref, o_ref, avg_pad_ref, mx_pad_ref):
    # w_ref       : (2*49,) f32, SMEM  (flattened OIHW conv weight, O=1)
    # x_ref       : (NB, C, H, W) VMEM (unpadded input batch tile)
    # o_ref       : (NB, 1, H, W) VMEM
    # avg_pad_ref : (NB, H+6, W+6) f32 VMEM scratch (zero halo)
    # mx_pad_ref  : (NB, H+6, W+6) f32 VMEM scratch (zero halo)
    nb, C, H, W = x_ref.shape

    # Zero the halo scratch.  A few KiB per step; done every step so the
    # kernel stays correct when grid steps are split across TensorCores
    # (scratch is per-core, not shared).
    avg_pad_ref[...] = jnp.zeros_like(avg_pad_ref)
    mx_pad_ref[...] = jnp.zeros_like(mx_pad_ref)

    # --- single-pass channel reduction: running sum + running max ----------
    x0 = x_ref[:, 0].astype(jnp.float32)            # (NB, H, W)
    s = x0
    m = x0
    for c in range(1, C):                           # C is small & static here;
        xc = x_ref[:, c].astype(jnp.float32)        # chunk this loop for big C.
        s = s + xc
        m = jnp.maximum(m, xc)
    avg = s * jnp.float32(1.0 / C)

    # --- write the two maps into the zero-padded scratch (3-px halo) -------
    avg_pad_ref[:, PAD:PAD + H, PAD:PAD + W] = avg
    mx_pad_ref[:, PAD:PAD + H, PAD:PAD + W] = m

    # --- 7x7 conv over the 2 "channels" as shifted FMAs --------------------
    # Hoisted kx (lane-direction) shift: 14 lane-offset loads total; inner
    # ky loop only slices along the sublane direction.  Four accumulators
    # break the single serial add chain.
    acc = [jnp.zeros((nb, H, W), jnp.float32) for _ in range(4)]
    for kx in range(KSIZE):
        a_cols = avg_pad_ref[:, :, kx:kx + W]       # (NB, H+6, W)
        m_cols = mx_pad_ref[:, :, kx:kx + W]        # (NB, H+6, W)
        for ky in range(KSIZE):
            w_a = w_ref[0 * KK + ky * KSIZE + kx]   # scalar from SMEM
            w_m = w_ref[1 * KK + ky * KSIZE + kx]
            slot = (ky & 1) * 2
            acc[slot + 0] = acc[slot + 0] + w_a * a_cols[:, ky:ky + H, :]
            acc[slot + 1] = acc[slot + 1] + w_m * m_cols[:, ky:ky + H, :]
    total = (acc[0] + acc[1]) + (acc[2] + acc[3])

    o_ref[...] = jax.nn.sigmoid(total)[:, None, :, :].astype(o_ref.dtype)


def spatial_attention(x, weight, *, vmem_block_budget_bytes=8 * 1024 * 1024):
    """x: (N, C, H, W); weight: (1, 2, 7, 7) OIHW (bias-free). Returns (N,1,H,W)."""
    N, C, H, W = x.shape
    assert weight.shape == (1, 2, KSIZE, KSIZE)
    w_flat = weight.reshape(-1).astype(jnp.float32)          # (2*49,)

    # Batch tile: largest divisor of N whose input block fits the VMEM budget.
    # Small problems run in one grid step (amortizes per-step overhead);
    # large C*H*W naturally falls back to smaller tiles / more parallel steps.
    per_n_bytes = C * H * W * x.dtype.itemsize
    nb = 1
    for d in range(N, 0, -1):
        if N % d == 0 and d * per_n_bytes <= vmem_block_budget_bytes:
            nb = d
            break
    grid = (N // nb,)

    hp, wp = H + 2 * PAD, W + 2 * PAD
    cost = pl.CostEstimate(
        flops=2 * N * C * H * W + 2 * N * H * W * 2 * KK,
        transcendentals=N * H * W,
        bytes_accessed=(x.size * x.dtype.itemsize            # read x once
                        + N * H * W * x.dtype.itemsize       # write output
                        + w_flat.size * 4),
    )

    return pl.pallas_call(
        _spatial_attention_kernel,
        out_shape=jax.ShapeDtypeStruct((N, 1, H, W), x.dtype),
        grid=grid,
        in_specs=[
            pl.BlockSpec(memory_space=pltpu.MemorySpace.SMEM),     # conv weight
            pl.BlockSpec((nb, C, H, W), lambda n: (n, 0, 0, 0)),   # x batch tile
        ],
        out_specs=pl.BlockSpec((nb, 1, H, W), lambda n: (n, 0, 0, 0)),
        scratch_shapes=[
            pltpu.VMEM((nb, hp, wp), jnp.float32),    # padded avg map
            pltpu.VMEM((nb, hp, wp), jnp.float32),    # padded max map
        ],
        compiler_params=pltpu.CompilerParams(
            dimension_semantics=("parallel",),
            vmem_limit_bytes=32 * 1024 * 1024,        # covers v5e's 16 MiB default
        ),
        cost_estimate=cost,
    )(w_flat, x)


def spatial_attention_reference(x, weight):
    avg = jnp.mean(x, axis=1, keepdims=True)
    mx = jnp.max(x, axis=1, keepdims=True)
    cat = jnp.concatenate([avg, mx], axis=1)
    y = jax.lax.conv_general_dilated(
        cat, weight, window_strides=(1, 1),
        padding=((PAD, PAD), (PAD, PAD)),
        dimension_numbers=("NCHW", "OIHW", "NCHW"))
    return jax.nn.sigmoid(y)


if __name__ == "__main__":
    key = jax.random.PRNGKey(0)
    k_x, k_w = jax.random.split(key)

    # Input: batch=2, channels=4, spatial=16x16 (NCHW, like PyTorch).
    x = jax.random.normal(k_x, (2, 4, 16, 16), dtype=jnp.float32)

    # Deterministic Conv2d(2, 1, 7, bias=False) weight init
    # (kaiming-uniform-style bound = 1/sqrt(fan_in)).
    fan_in = 2 * KK
    bound = 1.0 / jnp.sqrt(jnp.float32(fan_in))
    weight = jax.random.uniform(
        k_w, (1, 2, KSIZE, KSIZE), dtype=jnp.float32,
        minval=-bound, maxval=bound)

    out = jax.block_until_ready(spatial_attention(x, weight))
    ref = spatial_attention_reference(x, weight)

    assert out.shape == (2, 1, 16, 16), out.shape
    assert jnp.allclose(out, ref, atol=1e-5, rtol=1e-5), (
        float(jnp.max(jnp.abs(out - ref))))

    print("KERNEL_OK")
</pallas_src>

<mosaic_0001>
module attributes {stable_mosaic.version = 11 : i64} {
  func.func @_spatial_attention_kernel(%arg0: i32, %arg1: memref<98xf32, #tpu.memory_space<smem>>, %arg2: memref<2x4x16x16xf32, #tpu.memory_space<vmem>>, %arg3: memref<2x1x16x16xf32, #tpu.memory_space<vmem>>, %arg4: memref<2x22x22xf32, #tpu.memory_space<vmem>>, %arg5: memref<2x22x22xf32, #tpu.memory_space<vmem>>) attributes {dimension_semantics = [#tpu.dimension_semantics<parallel>], iteration_bounds = array<i64: 1>, scalar_prefetch = 0 : i64, scratch_operands = 2 : i64, tpu.core_type = #tpu.core_type<tc>, window_params = [{transform_indices = @transform_0, window_bounds = array<i64: 98>}, {transform_indices = @transform_1, window_bounds = array<i64: 2, 4, 16, 16>}, {transform_indices = @transform_2, window_bounds = array<i64: 2, 1, 16, 16>}]} {
    %cst = arith.constant 0.000000e+00 : f32
    %0 = vector.broadcast %cst : f32 to vector<2x22x22xf32>
    %c0 = arith.constant 0 : index
    %c0_0 = arith.constant 0 : index
    %c0_1 = arith.constant 0 : index
    %1 = vector.load %arg4[%c0, %c0_0, %c0_1] : memref<2x22x22xf32, #tpu.memory_space<vmem>>, vector<2x22x22xf32>
    tpu.vector_store %arg4[%c0, %c0_0, %c0_1], %0 {strides = array<i32>} : memref<2x22x22xf32, #tpu.memory_space<vmem>>, vector<2x22x22xf32>,
    %cst_2 = arith.constant 0.000000e+00 : f32
    %2 = vector.broadcast %cst_2 : f32 to vector<2x22x22xf32>
    %c0_3 = arith.constant 0 : index
    %c0_4 = arith.constant 0 : index
    %c0_5 = arith.constant 0 : index
    %3 = vector.load %arg5[%c0_3, %c0_4, %c0_5] : memref<2x22x22xf32, #tpu.memory_space<vmem>>, vector<2x22x22xf32>
    tpu.vector_store %arg5[%c0_3, %c0_4, %c0_5], %2 {strides = array<i32>} : memref<2x22x22xf32, #tpu.memory_space<vmem>>, vector<2x22x22xf32>,
    %c0_6 = arith.constant 0 : index
    %c0_7 = arith.constant 0 : index
    %c0_8 = arith.constant 0 : index
    %c0_9 = arith.constant 0 : index
    %4 = vector.load %arg2[%c0_6, %c0_7, %c0_8, %c0_9] : memref<2x4x16x16xf32, #tpu.memory_space<vmem>>, vector<2x1x16x16xf32>
    %5 = vector.shape_cast %4 : vector<2x1x16x16xf32> to vector<2x16x16xf32>
    %c0_10 = arith.constant 0 : index
    %c1 = arith.constant 1 : index
    %c0_11 = arith.constant 0 : index
    %c0_12 = arith.constant 0 : index
    %6 = vector.load %arg2[%c0_10, %c1, %c0_11, %c0_12] : memref<2x4x16x16xf32, #tpu.memory_space<vmem>>, vector<2x1x16x16xf32>
    %7 = vector.shape_cast %6 : vector<2x1x16x16xf32> to vector<2x16x16xf32>
    %8 = arith.addf %5, %7 : vector<2x16x16xf32>
    %9 = arith.maximumf %5, %7 : vector<2x16x16xf32>
    %c0_13 = arith.constant 0 : index
    %c2 = arith.constant 2 : index
    %c0_14 = arith.constant 0 : index
    %c0_15 = arith.constant 0 : index
    %10 = vector.load %arg2[%c0_13, %c2, %c0_14, %c0_15] : memref<2x4x16x16xf32, #tpu.memory_space<vmem>>, vector<2x1x16x16xf32>
    %11 = vector.shape_cast %10 : vector<2x1x16x16xf32> to vector<2x16x16xf32>
    %12 = arith.addf %8, %11 : vector<2x16x16xf32>
    %13 = arith.maximumf %9, %11 : vector<2x16x16xf32>
    %c0_16 = arith.constant 0 : index
    %c3 = arith.constant 3 : index
    %c0_17 = arith.constant 0 : index
    %c0_18 = arith.constant 0 : index
    %14 = vector.load %arg2[%c0_16, %c3, %c0_17, %c0_18] : memref<2x4x16x16xf32, #tpu.memory_space<vmem>>, vector<2x1x16x16xf32>
    %15 = vector.shape_cast %14 : vector<2x1x16x16xf32> to vector<2x16x16xf32>
    %16 = arith.addf %12, %15 : vector<2x16x16xf32>
    %17 = arith.maximumf %13, %15 : vector<2x16x16xf32>
    %cst_19 = arith.constant 2.500000e-01 : f32
    %18 = vector.broadcast %cst_19 : f32 to vector<2x16x16xf32>
    %19 = arith.mulf %16, %18 : vector<2x16x16xf32>
    %c0_20 = arith.constant 0 : index
    %c3_21 = arith.constant 3 : index
    %c3_22 = arith.constant 3 : index
    %20 = vector.load %arg4[%c0_20, %c3_21, %c3_22] : memref<2x22x22xf32, #tpu.memory_space<vmem>>, vector<2x16x16xf32>
    tpu.vector_store %arg4[%c0_20, %c3_21, %c3_22], %19 {strides = array<i32>} : memref<2x22x22xf32, #tpu.memory_space<vmem>>, vector<2x16x16xf32>,
    %c0_23 = arith.constant 0 : index
    %c3_24 = arith.constant 3 : index
    %c3_25 = arith.constant 3 : index
    %21 = vector.load %arg5[%c0_23, %c3_24, %c3_25] : memref<2x22x22xf32, #tpu.memory_space<vmem>>, vector<2x16x16xf32>
    tpu.vector_store %arg5[%c0_23, %c3_24, %c3_25], %17 {strides = array<i32>} : memref<2x22x22xf32, #tpu.memory_space<vmem>>, vector<2x16x16xf32>,
    %cst_26 = arith.constant 0.000000e+00 : f32
    %22 = vector.broadcast %cst_26 : f32 to vector<2x16x16xf32>
    %cst_27 = arith.constant 0.000000e+00 : f32
    %23 = vector.broadcast %cst_27 : f32 to vector<2x16x16xf32>
    %cst_28 = arith.constant 0.000000e+00 : f32
    %24 = vector.broadcast %cst_28 : f32 to vector<2x16x16xf32>
    %cst_29 = arith.constant 0.000000e+00 : f32
    %25 = vector.broadcast %cst_29 : f32 to vector<2x16x16xf32>
    %c0_30 = arith.constant 0 : index
    %c0_31 = arith.constant 0 : index
    %c0_32 = arith.constant 0 : index
    %26 = vector.load %arg4[%c0_30, %c0_31, %c0_32] : memref<2x22x22xf32, #tpu.memory_space<vmem>>, vector<2x22x16xf32>
    %c0_33 = arith.constant 0 : index
    %c0_34 = arith.constant 0 : index
    %c0_35 = arith.constant 0 : index
    %27 = vector.load %arg5[%c0_33, %c0_34, %c0_35] : memref<2x22x22xf32, #tpu.memory_space<vmem>>, vector<2x22x16xf32>
    %c0_36 = arith.constant 0 : index
    %28 = memref.load %arg1[%c0_36] : memref<98xf32, #tpu.memory_space<smem>>
    %c49 = arith.constant 49 : index
    %29 = memref.load %arg1[%c49] : memref<98xf32, #tpu.memory_space<smem>>
    %30 = vector.extract_strided_slice %26 {offsets = [0, 0, 0], sizes = [2, 16, 16], strides = [1, 1, 1]} : vector<2x22x16xf32> to vector<2x16x16xf32>
    %31 = vector.broadcast %28 : f32 to vector<2x16x16xf32>
    %32 = arith.mulf %31, %30 : vector<2x16x16xf32>
    %33 = arith.addf %22, %32 : vector<2x16x16xf32>
    %34 = vector.extract_strided_slice %27 {offsets = [0, 0, 0], sizes = [2, 16, 16], strides = [1, 1, 1]} : vector<2x22x16xf32> to vector<2x16x16xf32>
    %35 = vector.broadcast %29 : f32 to vector<2x16x16xf32>
    %36 = arith.mulf %35, %34 : vector<2x16x16xf32>
    %37 = arith.addf %23, %36 : vector<2x16x16xf32>
    %c7 = arith.constant 7 : index
    %38 = memref.load %arg1[%c7] : memref<98xf32, #tpu.memory_space<smem>>
    %c56 = arith.constant 56 : index
    %39 = memref.load %arg1[%c56] : memref<98xf32, #tpu.memory_space<smem>>
    %40 = vector.extract_strided_slice %26 {offsets = [0, 1, 0], sizes = [2, 16, 16], strides = [1, 1, 1]} : vector<2x22x16xf32> to vector<2x16x16xf32>
    %41 = vector.broadcast %38 : f32 to vector<2x16x16xf32>
    %42 = arith.mulf %41, %40 : vector<2x16x16xf32>
    %43 = arith.addf %24, %42 : vector<2x16x16xf32>
    %44 = vector.extract_strided_slice %27 {offsets = [0, 1, 0], sizes = [2, 16, 16], strides = [1, 1, 1]} : vector<2x22x16xf32> to vector<2x16x16xf32>
    %45 = vector.broadcast %39 : f32 to vector<2x16x16xf32>
    %46 = arith.mulf %45, %44 : vector<2x16x16xf32>
    %47 = arith.addf %25, %46 : vector<2x16x16xf32>
    %c14 = arith.constant 14 : index
    %48 = memref.load %arg1[%c14] : memref<98xf32, #tpu.memory_space<smem>>
    %c63 = arith.constant 63 : index
    %49 = memref.load %arg1[%c63] : memref<98xf32, #tpu.memory_space<smem>>
    %50 = vector.extract_strided_slice %26 {offsets = [0, 2, 0], sizes = [2, 16, 16], strides = [1, 1, 1]} : vector<2x22x16xf32> to vector<2x16x16xf32>
    %51 = vector.broadcast %48 : f32 to vector<2x16x16xf32>
    %52 = arith.mulf %51, %50 : vector<2x16x16xf32>
    %53 = arith.addf %33, %52 : vector<2x16x16xf32>
    %54 = vector.extract_strided_slice %27 {offsets = [0, 2, 0], sizes = [2, 16, 16], strides = [1, 1, 1]} : vector<2x22x16xf32> to vector<2x16x16xf32>
    %55 = vector.broadcast %49 : f32 to vector<2x16x16xf32>
    %56 = arith.mulf %55, %54 : vector<2x16x16xf32>
    %57 = arith.addf %37, %56 : vector<2x16x16xf32>
    %c21 = arith.constant 21 : index
    %58 = memref.load %arg1[%c21] : memref<98xf32, #tpu.memory_space<smem>>
    %c70 = arith.constant 70 : index
    %59 = memref.load %arg1[%c70] : memref<98xf32, #tpu.memory_space<smem>>
    %60 = vector.extract_strided_slice %26 {offsets = [0, 3, 0], sizes = [2, 16, 16], strides = [1, 1, 1]} : vector<2x22x16xf32> to vector<2x16x16xf32>
    %61 = vector.broadcast %58 : f32 to vector<2x16x16xf32>
    %62 = arith.mulf %61, %60 : vector<2x16x16xf32>
    %63 = arith.addf %43, %62 : vector<2x16x16xf32>
    %64 = vector.extract_strided_slice %27 {offsets = [0, 3, 0], sizes = [2, 16, 16], strides = [1, 1, 1]} : vector<2x22x16xf32> to vector<2x16x16xf32>
    %65 = vector.broadcast %59 : f32 to vector<2x16x16xf32>
    %66 = arith.mulf %65, %64 : vector<2x16x16xf32>
    %67 = arith.addf %47, %66 : vector<2x16x16xf32>
    %c28 = arith.constant 28 : index
    %68 = memref.load %arg1[%c28] : memref<98xf32, #tpu.memory_space<smem>>
    %c77 = arith.constant 77 : index
    %69 = memref.load %arg1[%c77] : memref<98xf32, #tpu.memory_space<smem>>
    %70 = vector.extract_strided_slice %26 {offsets = [0, 4, 0], sizes = [2, 16, 16], strides = [1, 1, 1]} : vector<2x22x16xf32> to vector<2x16x16xf32>
    %71 = vector.broadcast %68 : f32 to vector<2x16x16xf32>
    %72 = arith.mulf %71, %70 : vector<2x16x16xf32>
    %73 = arith.addf %53, %72 : vector<2x16x16xf32>
    %74 = vector.extract_strided_slice %27 {offsets = [0, 4, 0], sizes = [2, 16, 16], strides = [1, 1, 1]} : vector<2x22x16xf32> to vector<2x16x16xf32>
    %75 = vector.broadcast %69 : f32 to vector<2x16x16xf32>
    %76 = arith.mulf %75, %74 : vector<2x16x16xf32>
    %77 = arith.addf %57, %76 : vector<2x16x16xf32>
    %c35 = arith.constant 35 : index
    %78 = memref.load %arg1[%c35] : memref<98xf32, #tpu.memory_space<smem>>
    %c84 = arith.constant 84 : index
    %79 = memref.load %arg1[%c84] : memref<98xf32, #tpu.memory_space<smem>>
    %80 = vector.extract_strided_slice %26 {offsets = [0, 5, 0], sizes = [2, 16, 16], strides = [1, 1, 1]} : vector<2x22x16xf32> to vector<2x16x16xf32>
    %81 = vector.broadcast %78 : f32 to vector<2x16x16xf32>
    %82 = arith.mulf %81, %80 : vector<2x16x16xf32>
    %83 = arith.addf %63, %82 : vector<2x16x16xf32>
    %84 = vector.extract_strided_slice %27 {offsets = [0, 5, 0], sizes = [2, 16, 16], strides = [1, 1, 1]} : vector<2x22x16xf32> to vector<2x16x16xf32>
    %85 = vector.broadcast %79 : f32 to vector<2x16x16xf32>
    %86 = arith.mulf %85, %84 : vector<2x16x16xf32>
    %87 = arith.addf %67, %86 : vector<2x16x16xf32>
    %c42 = arith.constant 42 : index
    %88 = memref.load %arg1[%c42] : memref<98xf32, #tpu.memory_space<smem>>
    %c91 = arith.constant 91 : index
    %89 = memref.load %arg1[%c91] : memref<98xf32, #tpu.memory_space<smem>>
    %90 = vector.extract_strided_slice %26 {offsets = [0, 6, 0], sizes = [2, 16, 16], strides = [1, 1, 1]} : vector<2x22x16xf32> to vector<2x16x16xf32>
    %91 = vector.broadcast %88 : f32 to vector<2x16x16xf32>
    %92 = arith.mulf %91, %90 : vector<2x16x16xf32>
    %93 = arith.addf %73, %92 : vector<2x16x16xf32>
    %94 = vector.extract_strided_slice %27 {offsets = [0, 6, 0], sizes = [2, 16, 16], strides = [1, 1, 1]} : vector<2x22x16xf32> to vector<2x16x16xf32>
    %95 = vector.broadcast %89 : f32 to vector<2x16x16xf32>
    %96 = arith.mulf %95, %94 : vector<2x16x16xf32>
    %97 = arith.addf %77, %96 : vector<2x16x16xf32>
    %c0_37 = arith.constant 0 : index
    %c0_38 = arith.constant 0 : index
    %c1_39 = arith.constant 1 : index
    %98 = vector.load %arg4[%c0_37, %c0_38, %c1_39] : memref<2x22x22xf32, #tpu.memory_space<vmem>>, vector<2x22x16xf32>
    %c0_40 = arith.constant 0 : index
    %c0_41 = arith.constant 0 : index
    %c1_42 = arith.constant 1 : index
    %99 = vector.load %arg5[%c0_40, %c0_41, %c1_42] : memref<2x22x22xf32, #tpu.memory_space<vmem>>, vector<2x22x16xf32>
    %c1_43 = arith.constant 1 : index
    %100 = memref.load %arg1[%c1_43] : memref<98xf32, #tpu.memory_space<smem>>
    %c50 = arith.constant 50 : index
    %101 = memref.load %arg1[%c50] : memref<98xf32, #tpu.memory_space<smem>>
    %102 = vector.extract_strided_slice %98 {offsets = [0, 0, 0], sizes = [2, 16, 16], strides = [1, 1, 1]} : vector<2x22x16xf32> to vector<2x16x16xf32>
    %103 = vector.broadcast %100 : f32 to vector<2x16x16xf32>
    %104 = arith.mulf %103, %102 : vector<2x16x16xf32>
    %105 = arith.addf %93, %104 : vector<2x16x16xf32>
    %106 = vector.extract_strided_slice %99 {offsets = [0, 0, 0], sizes = [2, 16, 16], strides = [1, 1, 1]} : vector<2x22x16xf32> to vector<2x16x16xf32>
    %107 = vector.broadcast %101 : f32 to vector<2x16x16xf32>
    %108 = arith.mulf %107, %106 : vector<2x16x16xf32>
    %109 = arith.addf %97, %108 : vector<2x16x16xf32>
    %c8 = arith.constant 8 : index
    %110 = memref.load %arg1[%c8] : memref<98xf32, #tpu.memory_space<smem>>
    %c57 = arith.constant 57 : index
    %111 = memref.load %arg1[%c57] : memref<98xf32, #tpu.memory_space<smem>>
    %112 = vector.extract_strided_slice %98 {offsets = [0, 1, 0], sizes = [2, 16, 16], strides = [1, 1, 1]} : vector<2x22x16xf32> to vector<2x16x16xf32>
    %113 = vector.broadcast %110 : f32 to vector<2x16x16xf32>
    %114 = arith.mulf %113, %112 : vector<2x16x16xf32>
    %115 = arith.addf %83, %114 : vector<2x16x16xf32>
    %116 = vector.extract_strided_slice %99 {offsets = [0, 1, 0], sizes = [2, 16, 16], strides = [1, 1, 1]} : vector<2x22x16xf32> to vector<2x16x16xf32>
    %117 = vector.broadcast %111 : f32 to vector<2x16x16xf32>
    %118 = arith.mulf %117, %116 : vector<2x16x16xf32>
    %119 = arith.addf %87, %118 : vector<2x16x16xf32>
    %c15 = arith.constant 15 : index
    %120 = memref.load %arg1[%c15] : memref<98xf32, #tpu.memory_space<smem>>
    %c64 = arith.constant 64 : index
    %121 = memref.load %arg1[%c64] : memref<98xf32, #tpu.memory_space<smem>>
    %122 = vector.extract_strided_slice %98 {offsets = [0, 2, 0], sizes = [2, 16, 16], strides = [1, 1, 1]} : vector<2x22x16xf32> to vector<2x16x16xf32>
    %123 = vector.broadcast %120 : f32 to vector<2x16x16xf32>
    %124 = arith.mulf %123, %122 : vector<2x16x16xf32>
    %125 = arith.addf %105, %124 : vector<2x16x16xf32>
    %126 = vector.extract_strided_slice %99 {offsets = [0, 2, 0], sizes = [2, 16, 16], strides = [1, 1, 1]} : vector<2x22x16xf32> to vector<2x16x16xf32>
    %127 = vector.broadcast %121 : f32 to vector<2x16x16xf32>
    %128 = arith.mulf %127, %126 : vector<2x16x16xf32>
    %129 = arith.addf %109, %128 : vector<2x16x16xf32>
    %c22 = arith.constant 22 : index
    %130 = memref.load %arg1[%c22] : memref<98xf32, #tpu.memory_space<smem>>
    %c71 = arith.constant 71 : index
    %131 = memref.load %arg1[%c71] : memref<98xf32, #tpu.memory_space<smem>>
    %132 = vector.extract_strided_slice %98 {offsets = [0, 3, 0], sizes = [2, 16, 16], strides = [1, 1, 1]} : vector<2x22x16xf32> to vector<2x16x16xf32>
    %133 = vector.broadcast %130 : f32 to vector<2x16x16xf32>
    %134 = arith.mulf %133, %132 : vector<2x16x16xf32>
    %135 = arith.addf %115, %134 : vector<2x16x16xf32>
    %136 = vector.extract_strided_slice %99 {offsets = [0, 3, 0], sizes = [2, 16, 16], strides = [1, 1, 1]} : vector<2x22x16xf32> to vector<2x16x16xf32>
    %137 = vector.broadcast %131 : f32 to vector<2x16x16xf32>
    %138 = arith.mulf %137, %136 : vector<2x16x16xf32>
    %139 = arith.addf %119, %138 : vector<2x16x16xf32>
    %c29 = arith.constant 29 : index
    %140 = memref.load %arg1[%c29] : memref<98xf32, #tpu.memory_space<smem>>
    %c78 = arith.constant 78 : index
    %141 = memref.load %arg1[%c78] : memref<98xf32, #tpu.memory_space<smem>>
    %142 = vector.extract_strided_slice %98 {offsets = [0, 4, 0], sizes = [2, 16, 16], strides = [1, 1, 1]} : vector<2x22x16xf32> to vector<2x16x16xf32>
    %143 = vector.broadcast %140 : f32 to vector<2x16x16xf32>
    %144 = arith.mulf %143, %142 : vector<2x16x16xf32>
    %145 = arith.addf %125, %144 : vector<2x16x16xf32>
    %146 = vector.extract_strided_slice %99 {offsets = [0, 4, 0], sizes = [2, 16, 16], strides = [1, 1, 1]} : vector<2x22x16xf32> to vector<2x16x16xf32>
    %147 = vector.broadcast %141 : f32 to vector<2x16x16xf32>
    %148 = arith.mulf %147, %146 : vector<2x16x16xf32>
    %149 = arith.addf %129, %148 : vector<2x16x16xf32>
    %c36 = arith.constant 36 : index
    %150 = memref.load %arg1[%c36] : memref<98xf32, #tpu.memory_space<smem>>
    %c85 = arith.constant 85 : index
    %151 = memref.load %arg1[%c85] : memref<98xf32, #tpu.memory_space<smem>>
    %152 = vector.extract_strided_slice %98 {offsets = [0, 5, 0], sizes = [2, 16, 16], strides = [1, 1, 1]} : vector<2x22x16xf32> to vector<2x16x16xf32>
    %153 = vector.broadcast %150 : f32 to vector<2x16x16xf32>
    %154 = arith.mulf %153, %152 : vector<2x16x16xf32>
    %155 = arith.addf %135, %154 : vector<2x16x16xf32>
    %156 = vector.extract_strided_slice %99 {offsets = [0, 5, 0], sizes = [2, 16, 16], strides = [1, 1, 1]} : vector<2x22x16xf32> to vector<2x16x16xf32>
    %157 = vector.broadcast %151 : f32 to vector<2x16x16xf32>
    %158 = arith.mulf %157, %156 : vector<2x16x16xf32>
    %159 = arith.addf %139, %158 : vector<2x16x16xf32>
    %c43 = arith.constant 43 : index
    %160 = memref.load %arg1[%c43] : memref<98xf32, #tpu.memory_space<smem>>
    %c92 = arith.constant 92 : index
    %161 = memref.load %arg1[%c92] : memref<98xf32, #tpu.memory_space<smem>>
    %162 = vector.extract_strided_slice %98 {offsets = [0, 6, 0], sizes = [2, 16, 16], strides = [1, 1, 1]} : vector<2x22x16xf32> to vector<2x16x16xf32>
    %163 = vector.broadcast %160 : f32 to vector<2x16x16xf32>
    %164 = arith.mulf %163, %162 : vector<2x16x16xf32>
    %165 = arith.addf %145, %164 : vector<2x16x16xf32>
    %166 = vector.extract_strided_slice %99 {offsets = [0, 6, 0], sizes = [2, 16, 16], strides = [1, 1, 1]} : vector<2x22x16xf32> to vector<2x16x16xf32>
    %167 = vector.broadcast %161 : f32 to vector<2x16x16xf32>
    %168 = arith.mulf %167, %166 : vector<2x16x16xf32>
    %169 = arith.addf %149, %168 : vector<2x16x16xf32>
    %c0_44 = arith.constant 0 : index
    %c0_45 = arith.constant 0 : index
    %c2_46 = arith.constant 2 : index
    %170 = vector.load %arg4[%c0_44, %c0_45, %c2_46] : memref<2x22x22xf32, #tpu.memory_space<vmem>>, vector<2x22x16xf32>
    %c0_47 = arith.constant 0 : index
    %c0_48 = arith.constant 0 : index
    %c2_49 = arith.constant 2 : index
    %171 = vector.load %arg5[%c0_47, %c0_48, %c2_49] : memref<2x22x22xf32, #tpu.memory_space<vmem>>, vector<2x22x16xf32>
    %c2_50 = arith.constant 2 : index
    %172 = memref.load %arg1[%c2_50] : memref<98xf32, #tpu.memory_space<smem>>
    %c51 = arith.constant 51 : index
    %173 = memref.load %arg1[%c51] : memref<98xf32, #tpu.memory_space<smem>>
    %174 = vector.extract_strided_slice %170 {offsets = [0, 0, 0], sizes = [2, 16, 16], strides = [1, 1, 1]} : vector<2x22x16xf32> to vector<2x16x16xf32>
    %175 = vector.broadcast %172 : f32 to vector<2x16x16xf32>
    %176 = arith.mulf %175, %174 : vector<2x16x16xf32>
    %177 = arith.addf %165, %176 : vector<2x16x16xf32>
    %178 = vector.extract_strided_slice %171 {offsets = [0, 0, 0], sizes = [2, 16, 16], strides = [1, 1, 1]} : vector<2x22x16xf32> to vector<2x16x16xf32>
    %179 = vector.broadcast %173 : f32 to vector<2x16x16xf32>
    %180 = arith.mulf %179, %178 : vector<2x16x16xf32>
    %181 = arith.addf %169, %180 : vector<2x16x16xf32>
    %c9 = arith.constant 9 : index
    %182 = memref.load %arg1[%c9] : memref<98xf32, #tpu.memory_space<smem>>
    %c58 = arith.constant 58 : index
    %183 = memref.load %arg1[%c58] : memref<98xf32, #tpu.memory_space<smem>>
    %184 = vector.extract_strided_slice %170 {offsets = [0, 1, 0], sizes = [2, 16, 16], strides = [1, 1, 1]} : vector<2x22x16xf32> to vector<2x16x16xf32>
    %185 = vector.broadcast %182 : f32 to vector<2x16x16xf32>
    %186 = arith.mulf %185, %184 : vector<2x16x16xf32>
    %187 = arith.addf %155, %186 : vector<2x16x16xf32>
    %188 = vector.extract_strided_slice %171 {offsets = [0, 1, 0], sizes = [2, 16, 16], strides = [1, 1, 1]} : vector<2x22x16xf32> to vector<2x16x16xf32>
    %189 = vector.broadcast %183 : f32 to vector<2x16x16xf32>
    %190 = arith.mulf %189, %188 : vector<2x16x16xf32>
    %191 = arith.addf %159, %190 : vector<2x16x16xf32>
    %c16 = arith.constant 16 : index
    %192 = memref.load %arg1[%c16] : memref<98xf32, #tpu.memory_space<smem>>
    %c65 = arith.constant 65 : index
    %193 = memref.load %arg1[%c65] : memref<98xf32, #tpu.memory_space<smem>>
    %194 = vector.extract_strided_slice %170 {offsets = [0, 2, 0], sizes = [2, 16, 16], strides = [1, 1, 1]} : vector<2x22x16xf32> to vector<2x16x16xf32>
    %195 = vector.broadcast %192 : f32 to vector<2x16x16xf32>
    %196 = arith.mulf %195, %194 : vector<2x16x16xf32>
    %197 = arith.addf %177, %196 : vector<2x16x16xf32>
    %198 = vector.extract_strided_slice %171 {offsets = [0, 2, 0], sizes = [2, 16, 16], strides = [1, 1, 1]} : vector<2x22x16xf32> to vector<2x16x16xf32>
    %199 = vector.broadcast %193 : f32 to vector<2x16x16xf32>
    %200 = arith.mulf %199, %198 : vector<2x16x16xf32>
    %201 = arith.addf %181, %200 : vector<2x16x16xf32>
    %c23 = arith.constant 23 : index
    %202 = memref.load %arg1[%c23] : memref<98xf32, #tpu.memory_space<smem>>
    %c72 = arith.constant 72 : index
    %203 = memref.load %arg1[%c72] : memref<98xf32, #tpu.memory_space<smem>>
    %204 = vector.extract_strided_slice %170 {offsets = [0, 3, 0], sizes = [2, 16, 16], strides = [1, 1, 1]} : vector<2x22x16xf32> to vector<2x16x16xf32>
    %205 = vector.broadcast %202 : f32 to vector<2x16x16xf32>
    %206 = arith.mulf %205, %204 : vector<2x16x16xf32>
    %207 = arith.addf %187, %206 : vector<2x16x16xf32>
    %208 = vector.extract_strided_slice %171 {offsets = [0, 3, 0], sizes = [2, 16, 16], strides = [1, 1, 1]} : vector<2x22x16xf32> to vector<2x16x16xf32>
    %209 = vector.broadcast %203 : f32 to vector<2x16x16xf32>
    %210 = arith.mulf %209, %208 : vector<2x16x16xf32>
    %211 = arith.addf %191, %210 : vector<2x16x16xf32>
    %c30 = arith.constant 30 : index
    %212 = memref.load %arg1[%c30] : memref<98xf32, #tpu.memory_space<smem>>
    %c79 = arith.constant 79 : index
    %213 = memref.load %arg1[%c79] : memref<98xf32, #tpu.memory_space<smem>>
    %214 = vector.extract_strided_slice %170 {offsets = [0, 4, 0], sizes = [2, 16, 16], strides = [1, 1, 1]} : vector<2x22x16xf32> to vector<2x16x16xf32>
    %215 = vector.broadcast %212 : f32 to vector<2x16x16xf32>
    %216 = arith.mulf %215, %214 : vector<2x16x16xf32>
    %217 = arith.addf %197, %216 : vector<2x16x16xf32>
    %218 = vector.extract_strided_slice %171 {offsets = [0, 4, 0], sizes = [2, 16, 16], strides = [1, 1, 1]} : vector<2x22x16xf32> to vector<2x16x16xf32>
    %219 = vector.broadcast %213 : f32 to vector<2x16x16xf32>
    %220 = arith.mulf %219, %218 : vector<2x16x16xf32>
    %221 = arith.addf %201, %220 : vector<2x16x16xf32>
    %c37 = arith.constant 37 : index
    %222 = memref.load %arg1[%c37] : memref<98xf32, #tpu.memory_space<smem>>
    %c86 = arith.constant 86 : index
    %223 = memref.load %arg1[%c86] : memref<98xf32, #tpu.memory_space<smem>>
    %224 = vector.extract_strided_slice %170 {offsets = [0, 5, 0], sizes = [2, 16, 16], strides = [1, 1, 1]} : vector<2x22x16xf32> to vector<2x16x16xf32>
    %225 = vector.broadcast %222 : f32 to vector<2x16x16xf32>
    %226 = arith.mulf %225, %224 : vector<2x16x16xf32>
    %227 = arith.addf %207, %226 : vector<2x16x16xf32>
    %228 = vector.extract_strided_slice %171 {offsets = [0, 5, 0], sizes = [2, 16, 16], strides = [1, 1, 1]} : vector<2x22x16xf32> to vector<2x16x16xf32>
    %229 = vector.broadcast %223 : f32 to vector<2x16x16xf32>
    %230 = arith.mulf %229, %228 : vector<2x16x16xf32>
    %231 = arith.addf %211, %230 : vector<2x16x16xf32>
    %c44 = arith.constant 44 : index
    %232 = memref.load %arg1[%c44] : memref<98xf32, #tpu.memory_space<smem>>
    %c93 = arith.constant 93 : index
    %233 = memref.load %arg1[%c93] : memref<98xf32, #tpu.memory_space<smem>>
    %234 = vector.extract_strided_slice %170 {offsets = [0, 6, 0], sizes = [2, 16, 16], strides = [1, 1, 1]} : vector<2x22x16xf32> to vector<2x16x16xf32>
    %235 = vector.broadcast %232 : f32 to vector<2x16x16xf32>
    %236 = arith.mulf %235, %234 : vector<2x16x16xf32>
    %237 = arith.addf %217, %236 : vector<2x16x16xf32>
    %238 = vector.extract_strided_slice %171 {offsets = [0, 6, 0], sizes = [2, 16, 16], strides = [1, 1, 1]} : vector<2x22x16xf32> to vector<2x16x16xf32>
    %239 = vector.broadcast %233 : f32 to vector<2x16x16xf32>
    %240 = arith.mulf %239, %238 : vector<2x16x16xf32>
    %241 = arith.addf %221, %240 : vector<2x16x16xf32>
    %c0_51 = arith.constant 0 : index
    %c0_52 = arith.constant 0 : index
    %c3_53 = arith.constant 3 : index
    %242 = vector.load %arg4[%c0_51, %c0_52, %c3_53] : memref<2x22x22xf32, #tpu.memory_space<vmem>>, vector<2x22x16xf32>
    %c0_54 = arith.constant 0 : index
    %c0_55 = arith.constant 0 : index
    %c3_56 = arith.constant 3 : index
    %243 = vector.load %arg5[%c0_54, %c0_55, %c3_56] : memref<2x22x22xf32, #tpu.memory_space<vmem>>, vector<2x22x16xf32>
    %c3_57 = arith.constant 3 : index
    %244 = memref.load %arg1[%c3_57] : memref<98xf32, #tpu.memory_space<smem>>
    %c52 = arith.constant 52 : index
    %245 = memref.load %arg1[%c52] : memref<98xf32, #tpu.memory_space<smem>>
    %246 = vector.extract_strided_slice %242 {offsets = [0, 0, 0], sizes = [2, 16, 16], strides = [1, 1, 1]} : vector<2x22x16xf32> to vector<2x16x16xf32>
    %247 = vector.broadcast %244 : f32 to vector<2x16x16xf32>
    %248 = arith.mulf %247, %246 : vector<2x16x16xf32>
    %249 = arith.addf %237, %248 : vector<2x16x16xf32>
    %250 = vector.extract_strided_slice %243 {offsets = [0, 0, 0], sizes = [2, 16, 16], strides = [1, 1, 1]} : vector<2x22x16xf32> to vector<2x16x16xf32>
    %251 = vector.broadcast %245 : f32 to vector<2x16x16xf32>
    %252 = arith.mulf %251, %250 : vector<2x16x16xf32>
    %253 = arith.addf %241, %252 : vector<2x16x16xf32>
    %c10 = arith.constant 10 : index
    %254 = memref.load %arg1[%c10] : memref<98xf32, #tpu.memory_space<smem>>
    %c59 = arith.constant 59 : index
    %255 = memref.load %arg1[%c59] : memref<98xf32, #tpu.memory_space<smem>>
    %256 = vector.extract_strided_slice %242 {offsets = [0, 1, 0], sizes = [2, 16, 16], strides = [1, 1, 1]} : vector<2x22x16xf32> to vector<2x16x16xf32>
    %257 = vector.broadcast %254 : f32 to vector<2x16x16xf32>
    %258 = arith.mulf %257, %256 : vector<2x16x16xf32>
    %259 = arith.addf %227, %258 : vector<2x16x16xf32>
    %260 = vector.extract_strided_slice %243 {offsets = [0, 1, 0], sizes = [2, 16, 16], strides = [1, 1, 1]} : vector<2x22x16xf32> to vector<2x16x16xf32>
    %261 = vector.broadcast %255 : f32 to vector<2x16x16xf32>
    %262 = arith.mulf %261, %260 : vector<2x16x16xf32>
    %263 = arith.addf %231, %262 : vector<2x16x16xf32>
    %c17 = arith.constant 17 : index
    %264 = memref.load %arg1[%c17] : memref<98xf32, #tpu.memory_space<smem>>
    %c66 = arith.constant 66 : index
    %265 = memref.load %arg1[%c66] : memref<98xf32, #tpu.memory_space<smem>>
    %266 = vector.extract_strided_slice %242 {offsets = [0, 2, 0], sizes = [2, 16, 16], strides = [1, 1, 1]} : vector<2x22x16xf32> to vector<2x16x16xf32>
    %267 = vector.broadcast %264 : f32 to vector<2x16x16xf32>
    %268 = arith.mulf %267, %266 : vector<2x16x16xf32>
    %269 = arith.addf %249, %268 : vector<2x16x16xf32>
    %270 = vector.extract_strided_slice %243 {offsets = [0, 2, 0], sizes = [2, 16, 16], strides = [1, 1, 1]} : vector<2x22x16xf32> to vector<2x16x16xf32>
    %271 = vector.broadcast %265 : f32 to vector<2x16x16xf32>
    %272 = arith.mulf %271, %270 : vector<2x16x16xf32>
    %273 = arith.addf %253, %272 : vector<2x16x16xf32>
    %c24 = arith.constant 24 : index
    %274 = memref.load %arg1[%c24] : memref<98xf32, #tpu.memory_space<smem>>
    %c73 = arith.constant 73 : index
    %275 = memref.load %arg1[%c73] : memref<98xf32, #tpu.memory_space<smem>>
    %276 = vector.extract_strided_slice %242 {offsets = [0, 3, 0], sizes = [2, 16, 16], strides = [1, 1, 1]} : vector<2x22x16xf32> to vector<2x16x16xf32>
    %277 = vector.broadcast %274 : f32 to vector<2x16x16xf32>
    %278 = arith.mulf %277, %276 : vector<2x16x16xf32>
    %279 = arith.addf %259, %278 : vector<2x16x16xf32>
    %280 = vector.extract_strided_slice %243 {offsets = [0, 3, 0], sizes = [2, 16, 16], strides = [1, 1, 1]} : vector<2x22x16xf32> to vector<2x16x16xf32>
    %281 = vector.broadcast %275 : f32 to vector<2x16x16xf32>
    %282 = arith.mulf %281, %280 : vector<2x16x16xf32>
    %283 = arith.addf %263, %282 : vector<2x16x16xf32>
    %c31 = arith.constant 31 : index
    %284 = memref.load %arg1[%c31] : memref<98xf32, #tpu.memory_space<smem>>
    %c80 = arith.constant 80 : index
    %285 = memref.load %arg1[%c80] : memref<98xf32, #tpu.memory_space<smem>>
    %286 = vector.extract_strided_slice %242 {offsets = [0, 4, 0], sizes = [2, 16, 16], strides = [1, 1, 1]} : vector<2x22x16xf32> to vector<2x16x16xf32>
    %287 = vector.broadcast %284 : f32 to vector<2x16x16xf32>
    %288 = arith.mulf %287, %286 : vector<2x16x16xf32>
    %289 = arith.addf %269, %288 : vector<2x16x16xf32>
    %290 = vector.extract_strided_slice %243 {offsets = [0, 4, 0], sizes = [2, 16, 16], strides = [1, 1, 1]} : vector<2x22x16xf32> to vector<2x16x16xf32>
    %291 = vector.broadcast %285 : f32 to vector<2x16x16xf32>
    %292 = arith.mulf %291, %290 : vector<2x16x16xf32>
    %293 = arith.addf %273, %292 : vector<2x16x16xf32>
    %c38 = arith.constant 38 : index
    %294 = memref.load %arg1[%c38] : memref<98xf32, #tpu.memory_space<smem>>
    %c87 = arith.constant 87 : index
    %295 = memref.load %arg1[%c87] : memref<98xf32, #tpu.memory_space<smem>>
    %296 = vector.extract_strided_slice %242 {offsets = [0, 5, 0], sizes = [2, 16, 16], strides = [1, 1, 1]} : vector<2x22x16xf32> to vector<2x16x16xf32>
    %297 = vector.broadcast %294 : f32 to vector<2x16x16xf32>
    %298 = arith.mulf %297, %296 : vector<2x16x16xf32>
    %299 = arith.addf %279, %298 : vector<2x16x16xf32>
    %300 = vector.extract_strided_slice %243 {offsets = [0, 5, 0], sizes = [2, 16, 16], strides = [1, 1, 1]} : vector<2x22x16xf32> to vector<2x16x16xf32>
    %301 = vector.broadcast %295 : f32 to vector<2x16x16xf32>
    %302 = arith.mulf %301, %300 : vector<2x16x16xf32>
    %303 = arith.addf %283, %302 : vector<2x16x16xf32>
    %c45 = arith.constant 45 : index
    %304 = memref.load %arg1[%c45] : memref<98xf32, #tpu.memory_space<smem>>
    %c94 = arith.constant 94 : index
    %305 = memref.load %arg1[%c94] : memref<98xf32, #tpu.memory_space<smem>>
    %306 = vector.extract_strided_slice %242 {offsets = [0, 6, 0], sizes = [2, 16, 16], strides = [1, 1, 1]} : vector<2x22x16xf32> to vector<2x16x16xf32>
    %307 = vector.broadcast %304 : f32 to vector<2x16x16xf32>
    %308 = arith.mulf %307, %306 : vector<2x16x16xf32>
    %309 = arith.addf %289, %308 : vector<2x16x16xf32>
    %310 = vector.extract_strided_slice %243 {offsets = [0, 6, 0], sizes = [2, 16, 16], strides = [1, 1, 1]} : vector<2x22x16xf32> to vector<2x16x16xf32>
    %311 = vector.broadcast %305 : f32 to vector<2x16x16xf32>
    %312 = arith.mulf %311, %310 : vector<2x16x16xf32>
    %313 = arith.addf %293, %312 : vector<2x16x16xf32>
    %c0_58 = arith.constant 0 : index
    %c0_59 = arith.constant 0 : index
    %c4 = arith.constant 4 : index
    %314 = vector.load %arg4[%c0_58, %c0_59, %c4] : memref<2x22x22xf32, #tpu.memory_space<vmem>>, vector<2x22x16xf32>
    %c0_60 = arith.constant 0 : index
    %c0_61 = arith.constant 0 : index
    %c4_62 = arith.constant 4 : index
    %315 = vector.load %arg5[%c0_60, %c0_61, %c4_62] : memref<2x22x22xf32, #tpu.memory_space<vmem>>, vector<2x22x16xf32>
    %c4_63 = arith.constant 4 : index
    %316 = memref.load %arg1[%c4_63] : memref<98xf32, #tpu.memory_space<smem>>
    %c53 = arith.constant 53 : index
    %317 = memref.load %arg1[%c53] : memref<98xf32, #tpu.memory_space<smem>>
    %318 = vector.extract_strided_slice %314 {offsets = [0, 0, 0], sizes = [2, 16, 16], strides = [1, 1, 1]} : vector<2x22x16xf32> to vector<2x16x16xf32>
    %319 = vector.broadcast %316 : f32 to vector<2x16x16xf32>
    %320 = arith.mulf %319, %318 : vector<2x16x16xf32>
    %321 = arith.addf %309, %320 : vector<2x16x16xf32>
    %322 = vector.extract_strided_slice %315 {offsets = [0, 0, 0], sizes = [2, 16, 16], strides = [1, 1, 1]} : vector<2x22x16xf32> to vector<2x16x16xf32>
    %323 = vector.broadcast %317 : f32 to vector<2x16x16xf32>
    %324 = arith.mulf %323, %322 : vector<2x16x16xf32>
    %325 = arith.addf %313, %324 : vector<2x16x16xf32>
    %c11 = arith.constant 11 : index
    %326 = memref.load %arg1[%c11] : memref<98xf32, #tpu.memory_space<smem>>
    %c60 = arith.constant 60 : index
    %327 = memref.load %arg1[%c60] : memref<98xf32, #tpu.memory_space<smem>>
    %328 = vector.extract_strided_slice %314 {offsets = [0, 1, 0], sizes = [2, 16, 16], strides = [1, 1, 1]} : vector<2x22x16xf32> to vector<2x16x16xf32>
    %329 = vector.broadcast %326 : f32 to vector<2x16x16xf32>
    %330 = arith.mulf %329, %328 : vector<2x16x16xf32>
    %331 = arith.addf %299, %330 : vector<2x16x16xf32>
    %332 = vector.extract_strided_slice %315 {offsets = [0, 1, 0], sizes = [2, 16, 16], strides = [1, 1, 1]} : vector<2x22x16xf32> to vector<2x16x16xf32>
    %333 = vector.broadcast %327 : f32 to vector<2x16x16xf32>
    %334 = arith.mulf %333, %332 : vector<2x16x16xf32>
    %335 = arith.addf %303, %334 : vector<2x16x16xf32>
    %c18 = arith.constant 18 : index
    %336 = memref.load %arg1[%c18] : memref<98xf32, #tpu.memory_space<smem>>
    %c67 = arith.constant 67 : index
    %337 = memref.load %arg1[%c67] : memref<98xf32, #tpu.memory_space<smem>>
    %338 = vector.extract_strided_slice %314 {offsets = [0, 2, 0], sizes = [2, 16, 16], strides = [1, 1, 1]} : vector<2x22x16xf32> to vector<2x16x16xf32>
    %339 = vector.broadcast %336 : f32 to vector<2x16x16xf32>
    %340 = arith.mulf %339, %338 : vector<2x16x16xf32>
    %341 = arith.addf %321, %340 : vector<2x16x16xf32>
    %342 = vector.extract_strided_slice %315 {offsets = [0, 2, 0], sizes = [2, 16, 16], strides = [1, 1, 1]} : vector<2x22x16xf32> to vector<2x16x16xf32>
    %343 = vector.broadcast %337 : f32 to vector<2x16x16xf32>
    %344 = arith.mulf %343, %342 : vector<2x16x16xf32>
    %345 = arith.addf %325, %344 : vector<2x16x16xf32>
    %c25 = arith.constant 25 : index
    %346 = memref.load %arg1[%c25] : memref<98xf32, #tpu.memory_space<smem>>
    %c74 = arith.constant 74 : index
    %347 = memref.load %arg1[%c74] : memref<98xf32, #tpu.memory_space<smem>>
    %348 = vector.extract_strided_slice %314 {offsets = [0, 3, 0], sizes = [2, 16, 16], strides = [1, 1, 1]} : vector<2x22x16xf32> to vector<2x16x16xf32>
    %349 = vector.broadcast %346 : f32 to vector<2x16x16xf32>
    %350 = arith.mulf %349, %348 : vector<2x16x16xf32>
    %351 = arith.addf %331, %350 : vector<2x16x16xf32>
    %352 = vector.extract_strided_slice %315 {offsets = [0, 3, 0], sizes = [2, 16, 16], strides = [1, 1, 1]} : vector<2x22x16xf32> to vector<2x16x16xf32>
    %353 = vector.broadcast %347 : f32 to vector<2x16x16xf32>
    %354 = arith.mulf %353, %352 : vector<2x16x16xf32>
    %355 = arith.addf %335, %354 : vector<2x16x16xf32>
    %c32 = arith.constant 32 : index
    %356 = memref.load %arg1[%c32] : memref<98xf32, #tpu.memory_space<smem>>
    %c81 = arith.constant 81 : index
    %357 = memref.load %arg1[%c81] : memref<98xf32, #tpu.memory_space<smem>>
    %358 = vector.extract_strided_slice %314 {offsets = [0, 4, 0], sizes = [2, 16, 16], strides = [1, 1, 1]} : vector<2x22x16xf32> to vector<2x16x16xf32>
    %359 = vector.broadcast %356 : f32 to vector<2x16x16xf32>
    %360 = arith.mulf %359, %358 : vector<2x16x16xf32>
    %361 = arith.addf %341, %360 : vector<2x16x16xf32>
    %362 = vector.extract_strided_slice %315 {offsets = [0, 4, 0], sizes = [2, 16, 16], strides = [1, 1, 1]} : vector<2x22x16xf32> to vector<2x16x16xf32>
    %363 = vector.broadcast %357 : f32 to vector<2x16x16xf32>
    %364 = arith.mulf %363, %362 : vector<2x16x16xf32>
    %365 = arith.addf %345, %364 : vector<2x16x16xf32>
    %c39 = arith.constant 39 : index
    %366 = memref.load %arg1[%c39] : memref<98xf32, #tpu.memory_space<smem>>
    %c88 = arith.constant 88 : index
    %367 = memref.load %arg1[%c88] : memref<98xf32, #tpu.memory_space<smem>>
    %368 = vector.extract_strided_slice %314 {offsets = [0, 5, 0], sizes = [2, 16, 16], strides = [1, 1, 1]} : vector<2x22x16xf32> to vector<2x16x16xf32>
    %369 = vector.broadcast %366 : f32 to vector<2x16x16xf32>
    %370 = arith.mulf %369, %368 : vector<2x16x16xf32>
    %371 = arith.addf %351, %370 : vector<2x16x16xf32>
    %372 = vector.extract_strided_slice %315 {offsets = [0, 5, 0], sizes = [2, 16, 16], strides = [1, 1, 1]} : vector<2x22x16xf32> to vector<2x16x16xf32>
    %373 = vector.broadcast %367 : f32 to vector<2x16x16xf32>
    %374 = arith.mulf %373, %372 : vector<2x16x16xf32>
    %375 = arith.addf %355, %374 : vector<2x16x16xf32>
    %c46 = arith.constant 46 : index
    %376 = memref.load %arg1[%c46] : memref<98xf32, #tpu.memory_space<smem>>
    %c95 = arith.constant 95 : index
    %377 = memref.load %arg1[%c95] : memref<98xf32, #tpu.memory_space<smem>>
    %378 = vector.extract_strided_slice %314 {offsets = [0, 6, 0], sizes = [2, 16, 16], strides = [1, 1, 1]} : vector<2x22x16xf32> to vector<2x16x16xf32>
    %379 = vector.broadcast %376 : f32 to vector<2x16x16xf32>
    %380 = arith.mulf %379, %378 : vector<2x16x16xf32>
    %381 = arith.addf %361, %380 : vector<2x16x16xf32>
    %382 = vector.extract_strided_slice %315 {offsets = [0, 6, 0], sizes = [2, 16, 16], strides = [1, 1, 1]} : vector<2x22x16xf32> to vector<2x16x16xf32>
    %383 = vector.broadcast %377 : f32 to vector<2x16x16xf32>
    %384 = arith.mulf %383, %382 : vector<2x16x16xf32>
    %385 = arith.addf %365, %384 : vector<2x16x16xf32>
    %c0_64 = arith.constant 0 : index
    %c0_65 = arith.constant 0 : index
    %c5 = arith.constant 5 : index
    %386 = vector.load %arg4[%c0_64, %c0_65, %c5] : memref<2x22x22xf32, #tpu.memory_space<vmem>>, vector<2x22x16xf32>
    %c0_66 = arith.constant 0 : index
    %c0_67 = arith.constant 0 : index
    %c5_68 = arith.constant 5 : index
    %387 = vector.load %arg5[%c0_66, %c0_67, %c5_68] : memref<2x22x22xf32, #tpu.memory_space<vmem>>, vector<2x22x16xf32>
    %c5_69 = arith.constant 5 : index
    %388 = memref.load %arg1[%c5_69] : memref<98xf32, #tpu.memory_space<smem>>
    %c54 = arith.constant 54 : index
    %389 = memref.load %arg1[%c54] : memref<98xf32, #tpu.memory_space<smem>>
    %390 = vector.extract_strided_slice %386 {offsets = [0, 0, 0], sizes = [2, 16, 16], strides = [1, 1, 1]} : vector<2x22x16xf32> to vector<2x16x16xf32>
    %391 = vector.broadcast %388 : f32 to vector<2x16x16xf32>
    %392 = arith.mulf %391, %390 : vector<2x16x16xf32>
    %393 = arith.addf %381, %392 : vector<2x16x16xf32>
    %394 = vector.extract_strided_slice %387 {offsets = [0, 0, 0], sizes = [2, 16, 16], strides = [1, 1, 1]} : vector<2x22x16xf32> to vector<2x16x16xf32>
    %395 = vector.broadcast %389 : f32 to vector<2x16x16xf32>
    %396 = arith.mulf %395, %394 : vector<2x16x16xf32>
    %397 = arith.addf %385, %396 : vector<2x16x16xf32>
    %c12 = arith.constant 12 : index
    %398 = memref.load %arg1[%c12] : memref<98xf32, #tpu.memory_space<smem>>
    %c61 = arith.constant 61 : index
    %399 = memref.load %arg1[%c61] : memref<98xf32, #tpu.memory_space<smem>>
    %400 = vector.extract_strided_slice %386 {offsets = [0, 1, 0], sizes = [2, 16, 16], strides = [1, 1, 1]} : vector<2x22x16xf32> to vector<2x16x16xf32>
    %401 = vector.broadcast %398 : f32 to vector<2x16x16xf32>
    %402 = arith.mulf %401, %400 : vector<2x16x16xf32>
    %403 = arith.addf %371, %402 : vector<2x16x16xf32>
    %404 = vector.extract_strided_slice %387 {offsets = [0, 1, 0], sizes = [2, 16, 16], strides = [1, 1, 1]} : vector<2x22x16xf32> to vector<2x16x16xf32>
    %405 = vector.broadcast %399 : f32 to vector<2x16x16xf32>
    %406 = arith.mulf %405, %404 : vector<2x16x16xf32>
    %407 = arith.addf %375, %406 : vector<2x16x16xf32>
    %c19 = arith.constant 19 : index
    %408 = memref.load %arg1[%c19] : memref<98xf32, #tpu.memory_space<smem>>
    %c68 = arith.constant 68 : index
    %409 = memref.load %arg1[%c68] : memref<98xf32, #tpu.memory_space<smem>>
    %410 = vector.extract_strided_slice %386 {offsets = [0, 2, 0], sizes = [2, 16, 16], strides = [1, 1, 1]} : vector<2x22x16xf32> to vector<2x16x16xf32>
    %411 = vector.broadcast %408 : f32 to vector<2x16x16xf32>
    %412 = arith.mulf %411, %410 : vector<2x16x16xf32>
    %413 = arith.addf %393, %412 : vector<2x16x16xf32>
    %414 = vector.extract_strided_slice %387 {offsets = [0, 2, 0], sizes = [2, 16, 16], strides = [1, 1, 1]} : vector<2x22x16xf32> to vector<2x16x16xf32>
    %415 = vector.broadcast %409 : f32 to vector<2x16x16xf32>
    %416 = arith.mulf %415, %414 : vector<2x16x16xf32>
    %417 = arith.addf %397, %416 : vector<2x16x16xf32>
    %c26 = arith.constant 26 : index
    %418 = memref.load %arg1[%c26] : memref<98xf32, #tpu.memory_space<smem>>
    %c75 = arith.constant 75 : index
    %419 = memref.load %arg1[%c75] : memref<98xf32, #tpu.memory_space<smem>>
    %420 = vector.extract_strided_slice %386 {offsets = [0, 3, 0], sizes = [2, 16, 16], strides = [1, 1, 1]} : vector<2x22x16xf32> to vector<2x16x16xf32>
    %421 = vector.broadcast %418 : f32 to vector<2x16x16xf32>
    %422 = arith.mulf %421, %420 : vector<2x16x16xf32>
    %423 = arith.addf %403, %422 : vector<2x16x16xf32>
    %424 = vector.extract_strided_slice %387 {offsets = [0, 3, 0], sizes = [2, 16, 16], strides = [1, 1, 1]} : vector<2x22x16xf32> to vector<2x16x16xf32>
    %425 = vector.broadcast %419 : f32 to vector<2x16x16xf32>
    %426 = arith.mulf %425, %424 : vector<2x16x16xf32>
    %427 = arith.addf %407, %426 : vector<2x16x16xf32>
    %c33 = arith.constant 33 : index
    %428 = memref.load %arg1[%c33] : memref<98xf32, #tpu.memory_space<smem>>
    %c82 = arith.constant 82 : index
    %429 = memref.load %arg1[%c82] : memref<98xf32, #tpu.memory_space<smem>>
    %430 = vector.extract_strided_slice %386 {offsets = [0, 4, 0], sizes = [2, 16, 16], strides = [1, 1, 1]} : vector<2x22x16xf32> to vector<2x16x16xf32>
    %431 = vector.broadcast %428 : f32 to vector<2x16x16xf32>
    %432 = arith.mulf %431, %430 : vector<2x16x16xf32>
    %433 = arith.addf %413, %432 : vector<2x16x16xf32>
    %434 = vector.extract_strided_slice %387 {offsets = [0, 4, 0], sizes = [2, 16, 16], strides = [1, 1, 1]} : vector<2x22x16xf32> to vector<2x16x16xf32>
    %435 = vector.broadcast %429 : f32 to vector<2x16x16xf32>
    %436 = arith.mulf %435, %434 : vector<2x16x16xf32>
    %437 = arith.addf %417, %436 : vector<2x16x16xf32>
    %c40 = arith.constant 40 : index
    %438 = memref.load %arg1[%c40] : memref<98xf32, #tpu.memory_space<smem>>
    %c89 = arith.constant 89 : index
    %439 = memref.load %arg1[%c89] : memref<98xf32, #tpu.memory_space<smem>>
    %440 = vector.extract_strided_slice %386 {offsets = [0, 5, 0], sizes = [2, 16, 16], strides = [1, 1, 1]} : vector<2x22x16xf32> to vector<2x16x16xf32>
    %441 = vector.broadcast %438 : f32 to vector<2x16x16xf32>
    %442 = arith.mulf %441, %440 : vector<2x16x16xf32>
    %443 = arith.addf %423, %442 : vector<2x16x16xf32>
    %444 = vector.extract_strided_slice %387 {offsets = [0, 5, 0], sizes = [2, 16, 16], strides = [1, 1, 1]} : vector<2x22x16xf32> to vector<2x16x16xf32>
    %445 = vector.broadcast %439 : f32 to vector<2x16x16xf32>
    %446 = arith.mulf %445, %444 : vector<2x16x16xf32>
    %447 = arith.addf %427, %446 : vector<2x16x16xf32>
    %c47 = arith.constant 47 : index
    %448 = memref.load %arg1[%c47] : memref<98xf32, #tpu.memory_space<smem>>
    %c96 = arith.constant 96 : index
    %449 = memref.load %arg1[%c96] : memref<98xf32, #tpu.memory_space<smem>>
    %450 = vector.extract_strided_slice %386 {offsets = [0, 6, 0], sizes = [2, 16, 16], strides = [1, 1, 1]} : vector<2x22x16xf32> to vector<2x16x16xf32>
    %451 = vector.broadcast %448 : f32 to vector<2x16x16xf32>
    %452 = arith.mulf %451, %450 : vector<2x16x16xf32>
    %453 = arith.addf %433, %452 : vector<2x16x16xf32>
    %454 = vector.extract_strided_slice %387 {offsets = [0, 6, 0], sizes = [2, 16, 16], strides = [1, 1, 1]} : vector<2x22x16xf32> to vector<2x16x16xf32>
    %455 = vector.broadcast %449 : f32 to vector<2x16x16xf32>
    %456 = arith.mulf %455, %454 : vector<2x16x16xf32>
    %457 = arith.addf %437, %456 : vector<2x16x16xf32>
    %c0_70 = arith.constant 0 : index
    %c0_71 = arith.constant 0 : index
    %c6 = arith.constant 6 : index
    %458 = vector.load %arg4[%c0_70, %c0_71, %c6] : memref<2x22x22xf32, #tpu.memory_space<vmem>>, vector<2x22x16xf32>
    %c0_72 = arith.constant 0 : index
    %c0_73 = arith.constant 0 : index
    %c6_74 = arith.constant 6 : index
    %459 = vector.load %arg5[%c0_72, %c0_73, %c6_74] : memref<2x22x22xf32, #tpu.memory_space<vmem>>, vector<2x22x16xf32>
    %c6_75 = arith.constant 6 : index
    %460 = memref.load %arg1[%c6_75] : memref<98xf32, #tpu.memory_space<smem>>
    %c55 = arith.constant 55 : index
    %461 = memref.load %arg1[%c55] : memref<98xf32, #tpu.memory_space<smem>>
    %462 = vector.extract_strided_slice %458 {offsets = [0, 0, 0], sizes = [2, 16, 16], strides = [1, 1, 1]} : vector<2x22x16xf32> to vector<2x16x16xf32>
    %463 = vector.broadcast %460 : f32 to vector<2x16x16xf32>
    %464 = arith.mulf %463, %462 : vector<2x16x16xf32>
    %465 = arith.addf %453, %464 : vector<2x16x16xf32>
    %466 = vector.extract_strided_slice %459 {offsets = [0, 0, 0], sizes = [2, 16, 16], strides = [1, 1, 1]} : vector<2x22x16xf32> to vector<2x16x16xf32>
    %467 = vector.broadcast %461 : f32 to vector<2x16x16xf32>
    %468 = arith.mulf %467, %466 : vector<2x16x16xf32>
    %469 = arith.addf %457, %468 : vector<2x16x16xf32>
    %c13 = arith.constant 13 : index
    %470 = memref.load %arg1[%c13] : memref<98xf32, #tpu.memory_space<smem>>
    %c62 = arith.constant 62 : index
    %471 = memref.load %arg1[%c62] : memref<98xf32, #tpu.memory_space<smem>>
    %472 = vector.extract_strided_slice %458 {offsets = [0, 1, 0], sizes = [2, 16, 16], strides = [1, 1, 1]} : vector<2x22x16xf32> to vector<2x16x16xf32>
    %473 = vector.broadcast %470 : f32 to vector<2x16x16xf32>
    %474 = arith.mulf %473, %472 : vector<2x16x16xf32>
    %475 = arith.addf %443, %474 : vector<2x16x16xf32>
    %476 = vector.extract_strided_slice %459 {offsets = [0, 1, 0], sizes = [2, 16, 16], strides = [1, 1, 1]} : vector<2x22x16xf32> to vector<2x16x16xf32>
    %477 = vector.broadcast %471 : f32 to vector<2x16x16xf32>
    %478 = arith.mulf %477, %476 : vector<2x16x16xf32>
    %479 = arith.addf %447, %478 : vector<2x16x16xf32>
    %c20 = arith.constant 20 : index
    %480 = memref.load %arg1[%c20] : memref<98xf32, #tpu.memory_space<smem>>
    %c69 = arith.constant 69 : index
    %481 = memref.load %arg1[%c69] : memref<98xf32, #tpu.memory_space<smem>>
    %482 = vector.extract_strided_slice %458 {offsets = [0, 2, 0], sizes = [2, 16, 16], strides = [1, 1, 1]} : vector<2x22x16xf32> to vector<2x16x16xf32>
    %483 = vector.broadcast %480 : f32 to vector<2x16x16xf32>
    %484 = arith.mulf %483, %482 : vector<2x16x16xf32>
    %485 = arith.addf %465, %484 : vector<2x16x16xf32>
    %486 = vector.extract_strided_slice %459 {offsets = [0, 2, 0], sizes = [2, 16, 16], strides = [1, 1, 1]} : vector<2x22x16xf32> to vector<2x16x16xf32>
    %487 = vector.broadcast %481 : f32 to vector<2x16x16xf32>
    %488 = arith.mulf %487, %486 : vector<2x16x16xf32>
    %489 = arith.addf %469, %488 : vector<2x16x16xf32>
    %c27 = arith.constant 27 : index
    %490 = memref.load %arg1[%c27] : memref<98xf32, #tpu.memory_space<smem>>
    %c76 = arith.constant 76 : index
    %491 = memref.load %arg1[%c76] : memref<98xf32, #tpu.memory_space<smem>>
    %492 = vector.extract_strided_slice %458 {offsets = [0, 3, 0], sizes = [2, 16, 16], strides = [1, 1, 1]} : vector<2x22x16xf32> to vector<2x16x16xf32>
    %493 = vector.broadcast %490 : f32 to vector<2x16x16xf32>
    %494 = arith.mulf %493, %492 : vector<2x16x16xf32>
    %495 = arith.addf %475, %494 : vector<2x16x16xf32>
    %496 = vector.extract_strided_slice %459 {offsets = [0, 3, 0], sizes = [2, 16, 16], strides = [1, 1, 1]} : vector<2x22x16xf32> to vector<2x16x16xf32>
    %497 = vector.broadcast %491 : f32 to vector<2x16x16xf32>
    %498 = arith.mulf %497, %496 : vector<2x16x16xf32>
    %499 = arith.addf %479, %498 : vector<2x16x16xf32>
    %c34 = arith.constant 34 : index
    %500 = memref.load %arg1[%c34] : memref<98xf32, #tpu.memory_space<smem>>
    %c83 = arith.constant 83 : index
    %501 = memref.load %arg1[%c83] : memref<98xf32, #tpu.memory_space<smem>>
    %502 = vector.extract_strided_slice %458 {offsets = [0, 4, 0], sizes = [2, 16, 16], strides = [1, 1, 1]} : vector<2x22x16xf32> to vector<2x16x16xf32>
    %503 = vector.broadcast %500 : f32 to vector<2x16x16xf32>
    %504 = arith.mulf %503, %502 : vector<2x16x16xf32>
    %505 = arith.addf %485, %504 : vector<2x16x16xf32>
    %506 = vector.extract_strided_slice %459 {offsets = [0, 4, 0], sizes = [2, 16, 16], strides = [1, 1, 1]} : vector<2x22x16xf32> to vector<2x16x16xf32>
    %507 = vector.broadcast %501 : f32 to vector<2x16x16xf32>
    %508 = arith.mulf %507, %506 : vector<2x16x16xf32>
    %509 = arith.addf %489, %508 : vector<2x16x16xf32>
    %c41 = arith.constant 41 : index
    %510 = memref.load %arg1[%c41] : memref<98xf32, #tpu.memory_space<smem>>
    %c90 = arith.constant 90 : index
    %511 = memref.load %arg1[%c90] : memref<98xf32, #tpu.memory_space<smem>>
    %512 = vector.extract_strided_slice %458 {offsets = [0, 5, 0], sizes = [2, 16, 16], strides = [1, 1, 1]} : vector<2x22x16xf32> to vector<2x16x16xf32>
    %513 = vector.broadcast %510 : f32 to vector<2x16x16xf32>
    %514 = arith.mulf %513, %512 : vector<2x16x16xf32>
    %515 = arith.addf %495, %514 : vector<2x16x16xf32>
    %516 = vector.extract_strided_slice %459 {offsets = [0, 5, 0], sizes = [2, 16, 16], strides = [1, 1, 1]} : vector<2x22x16xf32> to vector<2x16x16xf32>
    %517 = vector.broadcast %511 : f32 to vector<2x16x16xf32>
    %518 = arith.mulf %517, %516 : vector<2x16x16xf32>
    %519 = arith.addf %499, %518 : vector<2x16x16xf32>
    %c48 = arith.constant 48 : index
    %520 = memref.load %arg1[%c48] : memref<98xf32, #tpu.memory_space<smem>>
    %c97 = arith.constant 97 : index
    %521 = memref.load %arg1[%c97] : memref<98xf32, #tpu.memory_space<smem>>
    %522 = vector.extract_strided_slice %458 {offsets = [0, 6, 0], sizes = [2, 16, 16], strides = [1, 1, 1]} : vector<2x22x16xf32> to vector<2x16x16xf32>
    %523 = vector.broadcast %520 : f32 to vector<2x16x16xf32>
    %524 = arith.mulf %523, %522 : vector<2x16x16xf32>
    %525 = arith.addf %505, %524 : vector<2x16x16xf32>
    %526 = vector.extract_strided_slice %459 {offsets = [0, 6, 0], sizes = [2, 16, 16], strides = [1, 1, 1]} : vector<2x22x16xf32> to vector<2x16x16xf32>
    %527 = vector.broadcast %521 : f32 to vector<2x16x16xf32>
    %528 = arith.mulf %527, %526 : vector<2x16x16xf32>
    %529 = arith.addf %509, %528 : vector<2x16x16xf32>
    %530 = arith.addf %525, %529 : vector<2x16x16xf32>
    %531 = arith.addf %515, %519 : vector<2x16x16xf32>
    %532 = arith.addf %530, %531 : vector<2x16x16xf32>
    %533 = arith.negf %532 : vector<2x16x16xf32>
    %534 = math.exp %533 : vector<2x16x16xf32>
    %cst_76 = arith.constant 1.000000e+00 : f32
    %535 = vector.broadcast %cst_76 : f32 to vector<2x16x16xf32>
    %536 = arith.addf %535, %534 : vector<2x16x16xf32>
    %537 = arith.divf %535, %536 : vector<2x16x16xf32>
    %538 = vector.shape_cast %537 : vector<2x16x16xf32> to vector<2x1x16x16xf32>
    %c0_77 = arith.constant 0 : index
    %c0_78 = arith.constant 0 : index
    %c0_79 = arith.constant 0 : index
    %c0_80 = arith.constant 0 : index
    %539 = vector.load %arg3[%c0_77, %c0_78, %c0_79, %c0_80] : memref<2x1x16x16xf32, #tpu.memory_space<vmem>>, vector<2x1x16x16xf32>
    tpu.vector_store %arg3[%c0_77, %c0_78, %c0_79, %c0_80], %538 {strides = array<i32>} : memref<2x1x16x16xf32, #tpu.memory_space<vmem>>, vector<2x1x16x16xf32>,
    return
  }
  func.func @transform_0(%arg0: i32) -> i32 {
    %c0_i32 = arith.constant 0 : i32
    %c0_i32_0 = arith.constant 0 : i32
    return %c0_i32 : i32
  }
  func.func @transform_1(%arg0: i32) -> (i32, i32, i32, i32) {
    %c0_i32 = arith.constant 0 : i32
    %c0_i32_0 = arith.constant 0 : i32
    %c0_i32_1 = arith.constant 0 : i32
    %c0_i32_2 = arith.constant 0 : i32
    return %arg0, %c0_i32, %c0_i32_0, %c0_i32_1 : i32, i32, i32, i32
  }
  func.func @transform_2(%arg0: i32) -> (i32, i32, i32, i32) {
    %c0_i32 = arith.constant 0 : i32
    %c0_i32_0 = arith.constant 0 : i32
    %c0_i32_1 = arith.constant 0 : i32
    %c0_i32_2 = arith.constant 0 : i32
    return %arg0, %c0_i32, %c0_i32_0, %c0_i32_1 : i32, i32, i32, i32
  }
}

</mosaic_0001>

<bundles_post_ra>
// kernel: tpu_custom_call.1
= control target key start
LH: loop header
LB: loop body
LE: loop exit
PB: predicated region body
PF: predicated region fallthrough
CT: control target
= control target key end

     0   :  { %7 = vsyncpa [#allocation7], 0  ;;  %s7752_s0 = inlined_call_operand.hbm [shape: f32[98], index: 0, kind: input, shape index: {}]   ;;  %s7753_s1 = inlined_call_operand.hbm [shape: f32[2,4,16,16], index: 1, kind: input, shape index: {}]   ;;  %s7754_s2 = inlined_call_operand.hbm [shape: f32[2,1,16,16], index: 2, kind: output, shape index: {}]  }
   0x1   :  { %8 = vsyncpa [#allocation5], 0 }
   0x2   :  { %9 = vsyncpa [#allocation6], 0  ;;  %s15_s11 = sshll.u32 %s7752_s0, 4  ;;  %s23_s14 = sshll.u32 %s7753_s1, 4  ;;  %s16_s11 = int_to_ptr.hbm [resolvable:$true] %s15_s11  ;;  %s24_s14 = int_to_ptr.hbm [resolvable:$true] %s23_s14 }
   0x3   :  { %s4282_s15 = smov [#allocation4]   ;;  %s4283_s16 = smov [#allocation8]  }
   0x4   :  { %18 = dma.hbm_to_smem %s16_s11, 16, %s4282_s15, [#allocation7]  }
   0x5   :  { %s25_s17 = sshll.u32 %s4283_s16, 4  ;;  %s4284_s18 = smov 128   ;;  %s26_s17 = int_to_ptr.vmem [resolvable:$true] %s25_s17 }
   0x6   :  { %s4285_s19 = smov 8  }
   0x7   :  { %31 = dma.hbm_to_vmem [thread:$0]  %s24_s14, 2048, %s26_s17, [#allocation5], %s4284_s18, %s4284_s18, %s4285_s19  }
   0x8   :  { %4276 = dma.done.wait [#allocation7], 16  }
   0x9   :  { %4277 = vsyncadd [#allocation7], 4294967280 }
   0xa   :  { %4278 = dma.done.wait [#allocation5], 2048  }
   0xb   :  { %4279 = vsyncadd [#allocation5], 4294965248 }
   0xc   :  { %40 = sfence }
   0xd   :  { %v55_v0 = vld [vmem:[#allocation8] sm:$0xff]  ;;  %v60_v1 = vld [vmem:[#allocation8 + $0x10] sm:$0xff]  ;;  %v56_v10 = vld [vmem:[#allocation8 + $0x8] sm:$0xff]  ;;  %s4286_s0 = smov 3   ;;  %vm41_vm0 = vcmask 179200   ;;  %v4287_v44 = vmov 0.0  }
   0xe   :  { %v73_v2 = vld [vmem:[#allocation8 + $0x20] sm:$0xff]  ;;  %v68_v3 = vmax.f32 %v55_v0, %v60_v1  ;;  %v62_v5 = vld [vmem:[#allocation8 + $0x50] sm:$0xff]  ;;  %v64_v6 = vadd.f32 %v60_v1, %v55_v0  ;;  %v61_v14 = vld [vmem:[#allocation8 + $0x18] sm:$0xff]  ;;  %49 = vst.msk [vmem:[#allocation3] sm:$0xff] %vm41_vm0, %v4287_v44  ;;  %vm44_vm1 = vcmask 177152   ;;  %vm118_vm2 = vcmask 154648  }
   0xf   :  { %v57_v4 = vld [vmem:[#allocation8 + $0x40] sm:$0xff]  ;;  %v86_v7 = vld [vmem:[#allocation8 + $0x30] sm:$0xff]  ;;  %v74_v15 = vld [vmem:[#allocation8 + $0x28] sm:$0xff]  ;;  %v69_v17 = vmax.f32 %v56_v10, %v61_v14  ;;  %v65_v21 = vadd.f32 %v61_v14, %v56_v10  ;;  %50 = vst.msk [vmem:[#allocation3 + $0x8] sm:$0xff] %vm41_vm0, %v4287_v44  ;;  %s4052_s1 = sld [smem:[#allocation4 + $0x32]]  ;;  %s4288_s20 = smov 127  }
  0x10   :  { %v66_v8 = vadd.f32 %v62_v5, %v57_v4  ;;  %v75_v9 = vld [vmem:[#allocation8 + $0x60] sm:$0xff]  ;;  %v81_v11 = vmax.f32 %v68_v3, %v73_v2  ;;  %v88_v12 = vld [vmem:[#allocation8 + $0x70] sm:$0xff]  ;;  %v77_v13 = vadd.f32 %v73_v2, %v64_v6  ;;  %v58_v18 = vld [vmem:[#allocation8 + $0x48] sm:$0xff]  ;;  %v70_v37 = vmax.f32 %v57_v4, %v62_v5  ;;  %42 = vst.msk [vmem:[#allocation2] sm:$0xff] %vm41_vm0, %v4287_v44  ;;  %s4054_s21 = sld [smem:[#allocation4 + $0x39]]  ;;  %s4289_s7 = smov 126  }
  0x11   :  { %v63_v19 = vld [vmem:[#allocation8 + $0x58] sm:$0xff]  ;;  %v76_v20 = vld [vmem:[#allocation8 + $0x68] sm:$0xff]  ;;  %v78_v27 = vadd.f32 %v74_v15, %v65_v21  ;;  %v82_v29 = vmax.f32 %v69_v17, %v74_v15  ;;  %43 = vst.msk [vmem:[#allocation2 + $0x8] sm:$0xff] %vm41_vm0, %v4287_v44  ;;  %s4051_s22 = sld [smem:[#allocation4 + $0x1]]  ;;  %vm218_vm3 = vcmask 1045504   ;;  %vm355_vm4 = vcmask 1043456  }
  0x12   :  { %v79_v16 = vadd.f32 %v75_v9, %v66_v8  ;;  %v94_v22 = vmax.f32 %v81_v11, %v86_v7  ;;  %v90_v23 = vadd.f32 %v86_v7, %v77_v13  ;;  %v67_v24 = vadd.f32 %v63_v19, %v58_v18  ;;  %v87_v26 = vld [vmem:[#allocation8 + $0x38] sm:$0xff]  ;;  %46 = vst.msk [vmem:[#allocation2 + $0x18] sm:$0xff] %vm41_vm0, %v4287_v44  ;;  %s4053_s23 = sld [smem:[#allocation4 + $0x8]] }
  0x13   :  { %v89_v31 = vld [vmem:[#allocation8 + $0x78] sm:$0xff]  ;;  %v91_v33 = vadd.f32 %v87_v26, %v78_v27  ;;  %v95_v35 = vmax.f32 %v82_v29, %v87_v26  ;;  %v71_v39 = vmax.f32 %v58_v18, %v63_v19  ;;  %v83_v40 = vmax.f32 %v70_v37, %v75_v9  ;;  %47 = vst.msk [vmem:[#allocation2 + $0x20] sm:$0xff] %vm41_vm0, %v4287_v44  ;;  %s4056_s24 = sld [smem:[#allocation4 + $0x40]] }
  0x14   :  { %v92_v25 = vadd.f32 %v88_v12, %v79_v16  ;;  %127 = vrot.lane.b32.xlu2 %v94_v22, %s4286_s0  ;;  %v98_v28 = vmul.f32 0.25, %v90_v23  ;;  %v80_v30 = vadd.f32 %v76_v20, %v67_v24  ;;  %52 = vst.msk [vmem:[#allocation3 + $0x18] sm:$0xff] %vm41_vm0, %v4287_v44  ;;  %s4058_s25 = sld [smem:[#allocation4 + $0x47]]  ;;  %vm492_vm5 = vcmask 1041408  }
  0x15   :  { %v99_v36 = vmul.f32 0.25, %v91_v33  ;;  %v84_v41 = vmax.f32 %v71_v39, %v76_v20  ;;  %v96_v42 = vmax.f32 %v83_v40, %v88_v12  ;;  %53 = vst.msk [vmem:[#allocation3 + $0x20] sm:$0xff] %vm41_vm0, %v4287_v44  ;;  %v569_v46 = vstv %s4052_s1  ;;  %s4060_s26 = sld [smem:[#allocation4 + $0x4e]] }
  0x16   :  { %v100_v32 = vmul.f32 0.25, %v92_v25  ;;  %106 = vrot.lane.b32.xlu0 %v98_v28, %s4286_s0  ;;  %v93_v34 = vadd.f32 %v89_v31, %v80_v30  ;;  %51 = vst.msk [vmem:[#allocation3 + $0x10] sm:$0x3f] %vm44_vm1, %v4287_v44  ;;  %v633_v52 = vstv %s4054_s21  ;;  %s4055_s27 = sld [smem:[#allocation4 + $0xf]]  ;;  %vm3918_vm6 = vcmask 1046528  }
  0x17   :  { %v97_v43 = vmax.f32 %v84_v41, %v89_v31  ;;  %45 = vst.msk [vmem:[#allocation2 + $0x10] sm:$0x3f] %vm44_vm1, %v4287_v44  ;;  %v544_v2 = vstv %s4051_s22  ;;  %s4057_s28 = sld [smem:[#allocation4 + $0x16]]  ;;  %vm4013_vm12 = vcmask 130048  }
  0x18   :  { %110 = vrot.lane.b32.xlu1 %v100_v32, %s4286_s0  ;;  %v101_v38 = vmul.f32 0.25, %v93_v34  ;;  %48 = vst.msk [vmem:[#allocation2 + $0x28] sm:$0x3f] %vm44_vm1, %v4287_v44  ;;  %v596_v8 = vstv %s4053_s23  ;;  %s4059_s29 = sld [smem:[#allocation4 + $0x1d]]  ;;  %s4290_s23 = smov 125  }
  0x19   :  { %54 = vst.msk [vmem:[#allocation3 + $0x28] sm:$0x3f] %vm44_vm1, %v4287_v44  ;;  %v4371_v16 = vstv %s4056_s24  ;;  %s4061_s30 = sld [smem:[#allocation4 + $0x24]] }
  0x1a   :  { %v799_v24 = vstv %s4058_s25  ;;  %s4062_s3 = sld [smem:[#allocation4 + $0x55]] }
  0x1b   :  { %v4412_v44 = vstv %s4060_s26  ;;  %s4063_s4 = sld [smem:[#allocation4 + $0x2b]] }
  0x1c   :  { %129 = vrot.lane.b32.xlu2 %v95_v35, %s4286_s0  ;;  %s4064_s5 = sld [smem:[#allocation4 + $0x5c]] }
  0x1d   :  { %s4065_s6 = sld [smem:[#allocation4 + $0x2]] }
  0x1e   :  { %108 = vrot.lane.b32.xlu0 %v99_v36, %s4286_s0  ;;  %s4066_s8 = sld [smem:[#allocation4 + $0x33]] }
  0x1f   :  { %s4067_s9 = sld [smem:[#allocation4 + $0x9]] }
  0x20   :  { %112 = vrot.lane.b32.xlu1 %v101_v38, %s4286_s0  ;;  %s4068_s10 = sld [smem:[#allocation4 + $0x3a]] }
  0x21   :  { %s4069_s11 = sld [smem:[#allocation4 + $0x10]] }
  0x22   :  { %s4070_s12 = sld [smem:[#allocation4 + $0x41]] }
  0x23   :  { %s4071_s13 = sld [smem:[#allocation4 + $0x17]] }
  0x24   :  { %s4072_s14 = sld [smem:[#allocation4 + $0x48]] }
  0x25   :  { %s4073_s15 = sld [smem:[#allocation4 + $0x1e]] }
  0x26   :  { %131 = vrot.lane.b32.xlu0 %v96_v42, %s4286_s0  ;;  %s4074_s16 = sld [smem:[#allocation4 + $0x4f]] }
  0x27   :  { %s4075_s17 = sld [smem:[#allocation4 + $0x25]] }
  0x28   :  { %133 = vrot.lane.b32.xlu1 %v97_v43, %s4286_s0  ;;  %s4076_s0 = sld [smem:[#allocation4 + $0x56]] }
  0x29   :  { %s4077_s1 = sld [smem:[#allocation4 + $0x2c]] }
  0x2a   :  { %s4079_s21 = sld [smem:[#allocation4 + $0x3]] }
  0x2b   :  { %s4080_s22 = sld [smem:[#allocation4 + $0x34]] }
  0x2c   :  { %s4081_s24 = sld [smem:[#allocation4 + $0xa]] }
  0x2d   :  { %s4082_s25 = sld [smem:[#allocation4 + $0x3b]] }
  0x2e   :  { %s4083_s26 = sld [smem:[#allocation4 + $0x11]] }
  0x6e   :  { %v128_v45 = vpop.permute.xlu2 %127 }
  0x6f   :  { %139 = vst.msk [vmem:[#allocation3 + $0x3] sm:$0xff] %vm118_vm2, %v128_v45 }
  0x76   :  { %v4320_v47 = vld [vmem:[#allocation3] sm:$0xff]  ;;  %v130_v48 = vpop.permute.xlu2 %129 }
  0x77   :  { %140 = vst.msk [vmem:[#allocation3 + $0xb] sm:$0xff] %vm118_vm2, %v130_v48  ;;  %v570_v49 = vmul.f32 %v569_v46, %v4320_v47  ;;  %v634_v53 = vmul.f32 %v633_v52, %v4320_v47  ;;  %v888_v48 = vmul.f32 %v4412_v44, %v4320_v47 }
  0x79   :  { %578 = vrot.lane.b32.xlu0 %v570_v49, %s4288_s20 }
  0x7e   :  { %v4325_v50 = vld [vmem:[#allocation3 + $0x8] sm:$0xff]  ;;  %v4349_v3 = vld [vmem:[#allocation3 + $0x10] sm:$0x3f] }
  0x7f   :  { %v571_v51 = vmul.f32 %v569_v46, %v4325_v50  ;;  %v635_v4 = vmul.f32 %v633_v52, %v4325_v50  ;;  %v636_v6 = vmul.f32 %v633_v52, %v4349_v3  ;;  %v801_v28 = vmul.f32 %v799_v24, %v4325_v50 }
  0x80   :  { %v802_v29 = vmul.f32 %v799_v24, %v4349_v3  ;;  %v713_v38 = vmul.f32 %v4371_v16, %v4325_v50  ;;  %v714_v39 = vmul.f32 %v4371_v16, %v4349_v3  ;;  %v4420_v49 = vmul.f32 %v4412_v44, %v4325_v50 }
  0x81   :  { %580 = vrot.lane.b32.xlu1 %v571_v51, %s4288_s20  ;;  %v813_v30 = vrot.slane %v801_v28, 2 }
  0x82   :  { %v815_v31 = vrot.slane %v802_v29, 2  ;;  %v725_v42 = vrot.slane %v713_v38, 2  ;;  %v727_v43 = vrot.slane %v714_v39, 2 }
  0x84   :  { %v816_v35 = vsel %vm218_vm3, %v813_v30, %v815_v31  ;;  %v728_v51 = vsel %vm218_vm3, %v725_v42, %v727_v43 }
  0x88   :  { %v107_v54 = vpop.permute.xlu0 %106 }
  0x89   :  { %119 = vst.msk [vmem:[#allocation2 + $0x3] sm:$0xff] %vm118_vm2, %v107_v54  ;;  %646 = vrot.lane.b32.xlu1 %v634_v53, %s4288_s20  ;;  %v900_v53 = vrot.slane %v888_v48, 4  ;;  %v901_v54 = vrot.slane %v4420_v49, 4 }
  0x8a   :  { %v111_v55 = vpop.permute.xlu1 %110 }
  0x8b   :  { %121 = vst.msk [vmem:[#allocation2 + $0x1b] sm:$0xff] %vm118_vm2, %v111_v55 }
  0x90   :  { %v109_v56 = vpop.permute.xlu0 %108  ;;  %v4357_v7 = vld [vmem:[#allocation2] sm:$0xff] }
  0x91   :  { %120 = vst.msk [vmem:[#allocation2 + $0xb] sm:$0xff] %vm118_vm2, %v109_v56  ;;  %v597_v11 = vmul.f32 %v596_v8, %v4357_v7  ;;  %v545_v15 = vmul.f32 %v544_v2, %v4357_v7  ;;  %v4428_v56 = vstv %s4055_s27  ;;  %s4084_s27 = sld [smem:[#allocation4 + $0x42]] }
  0x92   :  { %v113_v57 = vpop.permute.xlu1 %112  ;;  %v4347_v1 = vld [vmem:[#allocation2 + $0x18] sm:$0xff] }
  0x93   :  { %122 = vst.msk [vmem:[#allocation2 + $0x23] sm:$0xff] %vm118_vm2, %v113_v57  ;;  %v547_v5 = vmul.f32 %v544_v2, %v4347_v1  ;;  %v600_v14 = vmul.f32 %v596_v8, %v4347_v1  ;;  %v902_v57 = vsel %vm355_vm4, %v900_v53, %v901_v54 }
  0x98   :  { %v132_v58 = vpop.permute.xlu0 %131  ;;  %v4367_v13 = vld [vmem:[#allocation2 + $0x8] sm:$0xff]  ;;  %v4386_v23 = vld [vmem:[#allocation2 + $0x10] sm:$0x3f] }
  0x99   :  { %141 = vst.msk [vmem:[#allocation3 + $0x1b] sm:$0xff] %vm118_vm2, %v132_v58  ;;  %v546_v17 = vmul.f32 %v544_v2, %v4367_v13  ;;  %v599_v26 = vmul.f32 %v596_v8, %v4386_v23  ;;  %v598_v33 = vmul.f32 %v596_v8, %v4367_v13  ;;  %v4433_v58 = vmul.f32 %v4428_v56, %v4367_v13 }
  0x9a   :  { %v134_v59 = vpop.permute.xlu1 %133  ;;  %v4383_v20 = vld [vmem:[#allocation2 + $0x20] sm:$0xff]  ;;  %v4398_v32 = vld [vmem:[#allocation2 + $0x28] sm:$0x3f] }
  0x9b   :  { %142 = vst.msk [vmem:[#allocation3 + $0x23] sm:$0xff] %vm118_vm2, %v134_v59  ;;  %v548_v25 = vmul.f32 %v544_v2, %v4383_v20  ;;  %v602_v34 = vmul.f32 %v596_v8, %v4398_v32  ;;  %v601_v45 = vmul.f32 %v596_v8, %v4383_v20  ;;  %v677_v8 = vmul.f32 %v4428_v56, %v4383_v20 }
  0xa0   :  { %v4337_v60 = vld [vmem:[#allocation3 + $0x18] sm:$0xff] }
  0xa1   :  { %v572_v62 = vmul.f32 %v569_v46, %v4337_v60  ;;  %v637_v63 = vmul.f32 %v633_v52, %v4337_v60  ;;  %v715_v18 = vmul.f32 %v4371_v16, %v4337_v60 }
  0xa2   :  { %v4339_v61 = vld [vmem:[#allocation3 + $0x20] sm:$0xff]  ;;  %v4359_v9 = vld [vmem:[#allocation3 + $0x28] sm:$0x3f] }
  0xa3   :  { %v573_v0 = vmul.f32 %v569_v46, %v4339_v61  ;;  %582 = vrot.lane.b32.xlu2 %v572_v62, %s4288_s20  ;;  %652 = vrot.lane.b32.xlu1 %v637_v63, %s4288_s20  ;;  %v638_v10 = vmul.f32 %v633_v52, %v4339_v61  ;;  %v639_v12 = vmul.f32 %v633_v52, %v4359_v9  ;;  %v729_v21 = vrot.slane %v715_v18, 2 }
  0xa4   :  { %v4378_v19 = vmul.f32 %v4371_v16, %v4339_v61  ;;  %v804_v36 = vmul.f32 %v799_v24, %v4339_v61  ;;  %v805_v37 = vmul.f32 %v799_v24, %v4359_v9  ;;  %v800_v52 = vmul.f32 %v799_v24, %v4320_v47 }
  0xa5   :  { %584 = vrot.lane.b32.xlu0 %v573_v0, %s4288_s20  ;;  %v803_v62 = vmul.f32 %v799_v24, %v4337_v60  ;;  %v673_v63 = vmul.f32 %v4428_v56, %v4357_v7  ;;  %v686_v0 = vrot.slane %v4433_v58, 2  ;;  %v752_v24 = vstv %s4057_s28  ;;  %s4085_s28 = sld [smem:[#allocation4 + $0x18]] }
  0xa6   :  { %v730_v22 = vrot.slane %v4378_v19, 2  ;;  %v818_v40 = vrot.slane %v804_v36, 2  ;;  %v820_v41 = vrot.slane %v805_v37, 2  ;;  %v812_v55 = vrot.slane %v800_v52, 2 }
  0xa7   :  { %v817_v2 = vrot.slane %v803_v62, 2  ;;  %v717_v28 = vmul.f32 %v4371_v16, %v4359_v9  ;;  %v890_v36 = vmul.f32 %v4412_v44, %v4349_v3  ;;  %v757_v38 = vmul.f32 %v752_v24, %v4383_v20 }
  0xa8   :  { %v731_v27 = vsel %vm218_vm3, %v729_v21, %v730_v22  ;;  %v821_v46 = vsel %vm218_vm3, %v818_v40, %v820_v41  ;;  %v814_v59 = vsel %vm218_vm3, %v812_v55, %v813_v30  ;;  %v753_v30 = vmul.f32 %v752_v24, %v4357_v7 }
  0xa9   :  { %v758_v39 = vmul.f32 %v752_v24, %v4398_v32 }
  0xab   :  { %648 = vrot.lane.b32.xlu2 %v635_v4, %s4288_s20  ;;  %557 = vrot.lane.b32.xlu1 %v547_v5, %s4288_s20  ;;  %v685_v4 = vrot.slane %v673_v63, 2  ;;  %v712_v5 = vmul.f32 %v4371_v16, %v4320_v47  ;;  %v773_v43 = vrot.slane %v758_v39, 2  ;;  %v892_v63 = vmul.f32 %v4412_v44, %v4339_v61 }
  0xad   :  { %650 = vrot.lane.b32.xlu0 %v636_v6, %s4288_s20  ;;  %v687_v6 = vsel %vm218_vm3, %v685_v4, %v686_v0 }
  0xb3   :  { %654 = vrot.lane.b32.xlu2 %v638_v10, %s4288_s20  ;;  %609 = vrot.lane.b32.xlu1 %v597_v11, %s4288_s20  ;;  %v678_v10 = vmul.f32 %v4428_v56, %v4398_v32  ;;  %v819_v11 = vsel %vm218_vm3, %v817_v2, %v818_v40  ;;  %v893_v2 = vmul.f32 %v4412_v44, %v4359_v9 }
  0xb5   :  { %656 = vrot.lane.b32.xlu0 %v639_v12, %s4288_s20  ;;  %v676_v12 = vmul.f32 %v4428_v56, %v4347_v1 }
  0xb7   :  { %v690_v18 = vrot.slane %v676_v12, 2  ;;  %v908_v12 = vrot.slane %v893_v2, 4 }
  0xbb   :  { %615 = vrot.lane.b32.xlu1 %v600_v14, %s4288_s20  ;;  %553 = vrot.lane.b32.xlu2 %v545_v15, %s4288_s20  ;;  %v724_v14 = vrot.slane %v712_v5, 2  ;;  %v691_v15 = vrot.slane %v677_v8, 2 }
  0xbd   :  { %555 = vrot.lane.b32.xlu0 %v546_v17, %s4288_s20  ;;  %v693_v17 = vrot.slane %v678_v10, 2  ;;  %v726_v21 = vsel %vm218_vm3, %v724_v14, %v725_v42  ;;  %v692_v29 = vsel %vm218_vm3, %v690_v18, %v691_v15  ;;  %v771_v42 = vrot.slane %v757_v38, 2 }
  0xbe   :  { %v675_v18 = vmul.f32 %v4428_v56, %v4386_v23 }
  0xc0   :  { %v688_v56 = vrot.slane %v675_v18, 2 }
  0xc3   :  { %738 = vrot.lane.b32.xlu1 %v731_v27, %s4288_s20  ;;  %559 = vrot.lane.b32.xlu2 %v548_v25, %s4288_s20  ;;  %v694_v25 = vsel %vm218_vm3, %v691_v15, %v693_v17  ;;  %v755_v27 = vmul.f32 %v752_v24, %v4386_v23 }
  0xc5   :  { %613 = vrot.lane.b32.xlu0 %v599_v26, %s4288_s20  ;;  %v754_v26 = vmul.f32 %v752_v24, %v4367_v13 }
  0xcb   :  { %824 = vrot.lane.b32.xlu1 %v816_v35, %s4288_s20  ;;  %611 = vrot.lane.b32.xlu2 %v598_v33, %s4288_s20  ;;  %v768_v33 = vrot.slane %v755_v27, 2  ;;  %v765_v35 = vrot.slane %v753_v30, 2 }
  0xcd   :  { %619 = vrot.lane.b32.xlu0 %v602_v34, %s4288_s20  ;;  %v732_v34 = vrot.slane %v717_v28, 2 }
  0xcf   :  { %v733_v37 = vsel %vm218_vm3, %v730_v22, %v732_v34  ;;  %v774_v22 = vsel %vm218_vm3, %v771_v42, %v773_v43 }
  0xd3   :  { %830 = vrot.lane.b32.xlu1 %v821_v46, %s4288_s20  ;;  %617 = vrot.lane.b32.xlu2 %v601_v45, %s4288_s20  ;;  %v903_v45 = vrot.slane %v890_v36, 4  ;;  %v848_v46 = vstv %s4059_s29  ;;  %s4086_s29 = sld [smem:[#allocation4 + $0x49]] }
  0xd4   :  { %v850_v49 = vmul.f32 %v848_v46, %v4367_v13  ;;  %v849_v55 = vmul.f32 %v848_v46, %v4357_v7  ;;  %v854_v8 = vmul.f32 %v848_v46, %v4398_v32 }
  0xd5   :  { %736 = vrot.lane.b32.xlu0 %v728_v51, %s4288_s20  ;;  %v904_v48 = vsel %vm355_vm4, %v901_v54, %v903_v45  ;;  %v851_v51 = vmul.f32 %v848_v46, %v4386_v23 }
  0xd6   :  { %v861_v62 = vrot.slane %v849_v55, 4  ;;  %v869_v15 = vrot.slane %v854_v8, 4 }
  0xdb   :  { %910 = vrot.lane.b32.xlu1 %v902_v57, %s4288_s20  ;;  %826 = vrot.lane.b32.xlu2 %v815_v31, %s4288_s20  ;;  %v766_v31 = vrot.slane %v754_v26, 2  ;;  %v862_v57 = vrot.slane %v850_v49, 4 }
  0xdd   :  { %822 = vrot.lane.b32.xlu0 %v814_v59, %s4288_s20  ;;  %v769_v16 = vsel %vm218_vm3, %v766_v31, %v768_v33  ;;  %v767_v40 = vsel %vm218_vm3, %v765_v35, %v766_v31  ;;  %v864_v59 = vrot.slane %v851_v51, 4  ;;  %v863_v5 = vsel %vm355_vm4, %v861_v62, %v862_v57 }
  0xde   :  { %v852_v35 = vmul.f32 %v848_v46, %v4347_v1 }
  0xdf   :  { %v865_v54 = vsel %vm355_vm4, %v862_v57, %v864_v59 }
  0xe0   :  { %v866_v38 = vrot.slane %v852_v35, 4 }
  0xe3   :  { %695 = vrot.lane.b32.xlu1 %v687_v6, %s4288_s20  ;;  %832 = vrot.lane.b32.xlu2 %v820_v41, %s4288_s20  ;;  %v756_v41 = vmul.f32 %v752_v24, %v4347_v1  ;;  %v853_v6 = vmul.f32 %v848_v46, %v4383_v20  ;;  %v891_v24 = vmul.f32 %v4412_v44, %v4337_v60 }
  0xe5   :  { %828 = vrot.lane.b32.xlu0 %v819_v11, %s4288_s20  ;;  %v770_v19 = vrot.slane %v756_v41, 2  ;;  %v906_v11 = vrot.slane %v892_v63, 4  ;;  %v867_v14 = vrot.slane %v853_v6, 4  ;;  %v905_v30 = vrot.slane %v891_v24, 4 }
  0xe6   :  { %v975_v41 = vstv %s4062_s3  ;;  %s4088_s3 = sld [smem:[#allocation4 + $0x50]] }
  0xe7   :  { %v772_v52 = vsel %vm218_vm3, %v770_v19, %v771_v42  ;;  %v909_v17 = vsel %vm355_vm4, %v906_v11, %v908_v12  ;;  %v907_v44 = vsel %vm355_vm4, %v905_v30, %v906_v11  ;;  %v977_v59 = vmul.f32 %v975_v41, %v4325_v50 }
  0xe8   :  { %v981_v2 = vmul.f32 %v975_v41, %v4359_v9  ;;  %v1024_v11 = vstv %s4063_s4  ;;  %s4089_s4 = sld [smem:[#allocation4 + $0x26]] }
  0xe9   :  { %v989_v6 = vrot.slane %v977_v59, 4  ;;  %v1028_v24 = vmul.f32 %v1024_v11, %v4347_v1 }
  0xea   :  { %v996_v12 = vrot.slane %v981_v2, 4 }
  0xeb   :  { %701 = vrot.lane.b32.xlu1 %v694_v25, %s4288_s20  ;;  %734 = vrot.lane.b32.xlu2 %v726_v21, %s4288_s20  ;;  %v870_v21 = vsel %vm355_vm4, %v867_v14, %v869_v15  ;;  %v928_v25 = vstv %s4061_s30  ;;  %s4087_s30 = sld [smem:[#allocation4 + $0x1f]] }
  0xec   :  { %v931_v28 = vmul.f32 %v928_v25, %v4386_v23  ;;  %v930_v34 = vmul.f32 %v928_v25, %v4367_v13  ;;  %v934_v58 = vmul.f32 %v928_v25, %v4398_v32  ;;  %v929_v45 = vmul.f32 %v928_v25, %v4357_v7 }
  0xed   :  { %699 = vrot.lane.b32.xlu0 %v692_v29, %s4288_s20  ;;  %v4522_v29 = vpop.permute.xlu0 %578  ;;  %v932_v62 = vmul.f32 %v928_v25, %v4347_v1 }
  0xee   :  { %v944_v31 = vrot.slane %v931_v28, 4  ;;  %v949_v39 = vrot.slane %v934_v58, 4  ;;  %v941_v51 = vrot.slane %v929_v45, 4 }
  0xef   :  { %v946_v8 = vrot.slane %v932_v62, 4 }
  0xf3   :  { %777 = vrot.lane.b32.xlu1 %v769_v16, %s4288_s20  ;;  %740 = vrot.lane.b32.xlu2 %v733_v37, %s4288_s20  ;;  %v4498_v4 = vpop.permute.xlu1 %580  ;;  %v942_v37 = vrot.slane %v930_v34, 4  ;;  %v1063_v34 = vstv %s4064_s5  ;;  %s4090_s5 = sld [smem:[#allocation4 + $0x57]] }
  0xf5   :  { %775 = vrot.lane.b32.xlu0 %v767_v40, %s4288_s20  ;;  %v868_v40 = vsel %vm355_vm4, %v866_v38, %v867_v14  ;;  %v945_v42 = vsel %vm355_vm4, %v942_v37, %v944_v31  ;;  %v943_v55 = vsel %vm355_vm4, %v941_v51, %v942_v37  ;;  %v4569_v14 = vmul.f32 %v1024_v11, %v4383_v20 }
  0xf6   :  { %v1065_v37 = vmul.f32 %v1063_v34, %v4325_v50  ;;  %v1066_v38 = vmul.f32 %v1063_v34, %v4349_v3 }
  0xf8   :  { %v1077_v51 = vrot.slane %v1065_v37, 6 }
  0xfb   :  { %783 = vrot.lane.b32.xlu1 %v774_v22, %s4288_s20  ;;  %912 = vrot.lane.b32.xlu2 %v904_v48, %s4288_s20  ;;  %v4517_v26 = vpop.permute.xlu1 %646  ;;  %v978_v22 = vmul.f32 %v975_v41, %v4349_v3 }
  0xfc   :  { %7775 = vst [vmem:[#allocation14_spill] sm:$0xff] %v4517_v26  ;;  %v4813_v26 = vstv %s4074_s16  ;;  %s4100_s16 = sld [smem:[#allocation4 + $0x4a]] }
  0xfd   :  { %781 = vrot.lane.b32.xlu0 %v772_v52, %s4288_s20  ;;  %v4490_v53 = vpop.permute.xlu2 %582  ;;  %v991_v52 = vrot.slane %v978_v22, 4 }
  0xff   :  { %v992_v18 = vsel %vm355_vm4, %v989_v6, %v991_v52 }
 0x103   :  { %873 = vrot.lane.b32.xlu1 %v865_v54, %s4288_s20  ;;  %779 = vrot.lane.b32.xlu2 %v768_v33, %s4288_s20  ;;  %v689_v33 = vsel %vm218_vm3, %v686_v0, %v688_v56  ;;  %v1043_v56 = vrot.slane %v4569_v14, 6 }
 0x105   :  { %871 = vrot.lane.b32.xlu0 %v863_v5, %s4288_s20  ;;  %v4506_v10 = vpop.permute.xlu2 %648 }
 0x106   :  { %7774 = vst [vmem:[#allocation13_spill] sm:$0xff] %v4506_v10 }
 0x10b   :  { %916 = vrot.lane.b32.xlu1 %v909_v17, %s4288_s20  ;;  %785 = vrot.lane.b32.xlu2 %v773_v43, %s4288_s20  ;;  %v933_v43 = vmul.f32 %v928_v25, %v4383_v20  ;;  %v976_v17 = vmul.f32 %v975_v41, %v4320_v47 }
 0x10d   :  { %877 = vrot.lane.b32.xlu0 %v870_v21, %s4288_s20  ;;  %v4519_v27 = vpop.permute.xlu2 %654  ;;  %v947_v49 = vrot.slane %v933_v43, 4  ;;  %v980_v21 = vmul.f32 %v975_v41, %v4339_v61  ;;  %v1027_v43 = vmul.f32 %v1024_v11, %v4386_v23 }
 0x10e   :  { %7776 = vst [vmem:[#allocation15_spill] sm:$0xff] %v4519_v27 }
 0x10f   :  { %v950_v57 = vsel %vm355_vm4, %v947_v49, %v949_v39  ;;  %v948_v15 = vsel %vm355_vm4, %v946_v8, %v947_v49  ;;  %v1025_v8 = vmul.f32 %v1024_v11, %v4357_v7 }
 0x113   :  { %955 = vrot.lane.b32.xlu1 %v944_v31, %s4288_s20  ;;  %697 = vrot.lane.b32.xlu2 %v689_v33, %s4288_s20  ;;  %v988_v31 = vrot.slane %v976_v17, 4  ;;  %v994_v33 = vrot.slane %v980_v21, 4  ;;  %v1104_v17 = vstv %s4065_s6  ;;  %v1037_v21 = vrot.slane %v1025_v8, 6  ;;  %s4091_s6 = sld [smem:[#allocation4 + $0x2d]] }
 0x115   :  { %914 = vrot.lane.b32.xlu0 %v907_v44, %s4288_s20  ;;  %v4533_v36 = vpop.permute.xlu1 %652  ;;  %v4535_v16 = vpop.permute.xlu2 %553  ;;  %v1042_v44 = vrot.slane %v1028_v24, 6  ;;  %v990_v58 = vsel %vm355_vm4, %v988_v31, %v989_v6  ;;  %v1064_v6 = vmul.f32 %v1063_v34, %v4320_v47  ;;  %v1105_v24 = vmul.f32 %v1104_v17, %v4357_v7 }
 0x116   :  { %7777 = vst [vmem:[#allocation16_spill] sm:$0xff] %v4533_v36 }
 0x117   :  { %v4538_v0 = vpop.permute.xlu0 %584  ;;  %v1044_v35 = vsel %vm492_vm5, %v1042_v44, %v1043_v56 }
 0x11b   :  { %961 = vrot.lane.b32.xlu1 %v949_v39, %s4288_s20  ;;  %875 = vrot.lane.b32.xlu2 %v868_v40, %s4288_s20  ;;  %v979_v39 = vmul.f32 %v975_v41, %v4337_v60  ;;  %v997_v40 = vsel %vm355_vm4, %v994_v33, %v996_v12  ;;  %v1079_v41 = vrot.slane %v1066_v38, 6 }
 0x11d   :  { %953 = vrot.lane.b32.xlu0 %v945_v42, %s4288_s20  ;;  %v4547_v19 = vpop.permute.xlu1 %557  ;;  %v4549_v46 = vpop.permute.xlu2 %559  ;;  %v1026_v42 = vmul.f32 %v1024_v11, %v4367_v13  ;;  %v1080_v59 = vsel %vm492_vm5, %v1077_v51, %v1079_v41  ;;  %v1067_v41 = vmul.f32 %v1063_v34, %v4337_v60 }
 0x11e   :  { %7778 = vst [vmem:[#allocation17_spill] sm:$0xff] %v4547_v19 }
 0x11f   :  { %7779 = vst [vmem:[#allocation18_spill] sm:$0xff] %v4549_v46  ;;  %v4552_v48 = vpop.permute.xlu0 %650 }
 0x120   :  { %7780 = vst [vmem:[#allocation19_spill] sm:$0xff] %v4552_v48 }
 0x123   :  { %1002 = vrot.lane.b32.xlu1 %v991_v52, %s4288_s20  ;;  %951 = vrot.lane.b32.xlu2 %v943_v55, %s4288_s20  ;;  %v993_v52 = vrot.slane %v979_v39, 4  ;;  %v1038_v55 = vrot.slane %v1026_v42, 6 }
 0x125   :  { %959 = vrot.lane.b32.xlu0 %v950_v57, %s4288_s20  ;;  %v4561_v54 = vpop.permute.xlu1 %609  ;;  %v4563_v63 = vpop.permute.xlu2 %611  ;;  %v1040_v57 = vrot.slane %v1027_v43, 6  ;;  %v995_v62 = vsel %vm355_vm4, %v993_v52, %v994_v33  ;;  %v1039_v31 = vsel %vm492_vm5, %v1037_v21, %v1038_v55  ;;  %v1030_v33 = vmul.f32 %v1024_v11, %v4398_v32 }
 0x126   :  { %7781 = vst [vmem:[#allocation20_spill] sm:$0xff] %v4561_v54  ;;  %v1108_v43 = vmul.f32 %v1104_v17, %v4383_v20 }
 0x127   :  { %7782 = vst [vmem:[#allocation21_spill] sm:$0xff] %v4563_v63  ;;  %v4566_v5 = vpop.permute.xlu0 %656  ;;  %v1041_v2 = vsel %vm492_vm5, %v1038_v55, %v1040_v57  ;;  %v1045_v11 = vrot.slane %v1030_v33, 6  ;;  %v1106_v33 = vmul.f32 %v1104_v17, %v4367_v13 }
 0x128   :  { %7783 = vst [vmem:[#allocation22_spill] sm:$0xff] %v4566_v5  ;;  %v4902_v5 = vld [vmem:[#allocation3 + $0x8] sm:$0xff] }
 0x12b   :  { %1008 = vrot.lane.b32.xlu1 %v996_v12, %s4288_s20  ;;  %957 = vrot.lane.b32.xlu2 %v948_v15, %s4288_s20 }
 0x12d   :  { %1000 = vrot.lane.b32.xlu0 %v992_v18, %s4288_s20  ;;  %v4579_v25 = vpop.permute.xlu1 %615  ;;  %v4581_v28 = vpop.permute.xlu2 %617  ;;  %v1076_v18 = vrot.slane %v1064_v6, 6 }
 0x12e   :  { %7784 = vst [vmem:[#allocation23_spill] sm:$0xff] %v4579_v25 }
 0x12f   :  { %7785 = vst [vmem:[#allocation24_spill] sm:$0xff] %v4581_v28  ;;  %v4584_v30 = vpop.permute.xlu0 %555  ;;  %v1078_v44 = vsel %vm492_vm5, %v1076_v18, %v1077_v51  ;;  %v1046_v51 = vsel %vm492_vm5, %v1043_v56, %v1045_v11 }
 0x130   :  { %7786 = vst [vmem:[#allocation25_spill] sm:$0xff] %v4584_v30 }
 0x133   :  { %1051 = vrot.lane.b32.xlu1 %v1044_v35, %s4288_s20  ;;  %998 = vrot.lane.b32.xlu2 %v990_v58, %s4288_s20  ;;  %v1068_v35 = vmul.f32 %v1063_v34, %v4339_v61  ;;  %v1069_v58 = vmul.f32 %v1063_v34, %v4359_v9  ;;  %v1107_v34 = vmul.f32 %v1104_v17, %v4347_v1 }
 0x135   :  { %1006 = vrot.lane.b32.xlu0 %v997_v40, %s4288_s20  ;;  %v4597_v45 = vpop.permute.xlu1 %738  ;;  %v4599_v22 = vpop.permute.xlu2 %826  ;;  %v1082_v40 = vrot.slane %v1068_v35, 6  ;;  %v1084_v42 = vrot.slane %v1069_v58, 6 }
 0x136   :  { %7787 = vst [vmem:[#allocation26_spill] sm:$0xff] %v4597_v45 }
 0x137   :  { %7788 = vst [vmem:[#allocation27_spill] sm:$0xff] %v4599_v22  ;;  %v4601_v49 = vpop.permute.xlu0 %613  ;;  %v1085_v52 = vsel %vm492_vm5, %v1082_v40, %v1084_v42 }
 0x138   :  { %7789 = vst [vmem:[#allocation28_spill] sm:$0xff] %v4601_v49 }
 0x13b   :  { %1088 = vrot.lane.b32.xlu1 %v1080_v59, %s4288_s20  ;;  %1004 = vrot.lane.b32.xlu2 %v995_v62, %s4288_s20  ;;  %v1081_v62 = vrot.slane %v1067_v41, 6 }
 0x13d   :  { %1049 = vrot.lane.b32.xlu0 %v1041_v2, %s4288_s20  ;;  %v4611_v12 = vpop.permute.xlu1 %824  ;;  %v4613_v14 = vpop.permute.xlu2 %832  ;;  %v1129_v2 = vstv %s4066_s8  ;;  %v1083_v6 = vsel %vm492_vm5, %v1081_v62, %v1082_v40  ;;  %s4093_s8 = sld [smem:[#allocation4 + $0x4]] }
 0x13e   :  { %7790 = vst [vmem:[#allocation29_spill] sm:$0xff] %v4611_v12  ;;  %v1132_v56 = vmul.f32 %v1129_v2, %v4337_v60  ;;  %v1130_v42 = vmul.f32 %v1129_v2, %v4320_v47 }
 0x13f   :  { %7791 = vst [vmem:[#allocation30_spill] sm:$0xff] %v4613_v14  ;;  %v4615_v15 = vpop.permute.xlu0 %619 }
 0x140   :  { %7792 = vst [vmem:[#allocation31_spill] sm:$0xff] %v4615_v15 }
 0x143   :  { %1113 = vrot.lane.b32.xlu1 %v1105_v24, %s4289_s7  ;;  %1047 = vrot.lane.b32.xlu2 %v1039_v31, %s4288_s20  ;;  %v1156_v24 = vstv %s4067_s9  ;;  %s4094_s9 = sld [smem:[#allocation4 + $0x35]] }
 0x144   :  { %v1158_v31 = vmul.f32 %v1156_v24, %v4367_v13  ;;  %v1161_v40 = vmul.f32 %v1156_v24, %v4383_v20  ;;  %v1157_v17 = vmul.f32 %v1156_v24, %v4357_v7 }
 0x145   :  { %1086 = vrot.lane.b32.xlu0 %v1078_v44, %s4288_s20  ;;  %v4626_v37 = vpop.permute.xlu1 %830  ;;  %v4628_v38 = vpop.permute.xlu2 %734  ;;  %v1131_v44 = vmul.f32 %v1129_v2, %v4325_v50 }
 0x146   :  { %7793 = vst [vmem:[#allocation32_spill] sm:$0xff] %v4626_v37 }
 0x147   :  { %7794 = vst [vmem:[#allocation33_spill] sm:$0xff] %v4628_v38  ;;  %v4630_v39 = vpop.permute.xlu0 %736 }
 0x148   :  { %7795 = vst [vmem:[#allocation34_spill] sm:$0xff] %v4630_v39 }
 0x14b   :  { %1119 = vrot.lane.b32.xlu1 %v1108_v43, %s4289_s7  ;;  %1053 = vrot.lane.b32.xlu2 %v1046_v51, %s4288_s20 }
 0x14d   :  { %1092 = vrot.lane.b32.xlu0 %v1085_v52, %s4288_s20  ;;  %v4639_v55 = vpop.permute.xlu1 %910  ;;  %v4641_v57 = vpop.permute.xlu2 %740  ;;  %v1193_v52 = vstv %s4068_s10  ;;  %s4291_s10 = smov 124  }
 0x14e   :  { %7796 = vst [vmem:[#allocation35_spill] sm:$0xff] %v4639_v55  ;;  %v1195_v62 = vmul.f32 %v1193_v52, %v4325_v50  ;;  %v1196_v22 = vmul.f32 %v1193_v52, %v4349_v3 }
 0x14f   :  { %7797 = vst [vmem:[#allocation36_spill] sm:$0xff] %v4641_v57  ;;  %v4643_v59 = vpop.permute.xlu0 %822 }
 0x150   :  { %7798 = vst [vmem:[#allocation37_spill] sm:$0xff] %v4643_v59  ;;  %v1197_v59 = vmul.f32 %v1193_v52, %v4337_v60 }
 0x153   :  { %1142 = vrot.lane.b32.xlu1 %v1132_v56, %s4289_s7  ;;  %1090 = vrot.lane.b32.xlu2 %v1083_v6, %s4288_s20  ;;  %v1133_v56 = vmul.f32 %v1129_v2, %v4339_v61  ;;  %v1159_v2 = vmul.f32 %v1156_v24, %v4386_v23  ;;  %s4078_s20 = sld [smem:[#allocation4 + $0x5d]] }
 0x155   :  { %1117 = vrot.lane.b32.xlu0 %v1107_v34, %s4289_s7  ;;  %v4651_v8 = vpop.permute.xlu1 %695  ;;  %v4653_v18 = vpop.permute.xlu2 %912  ;;  %v1160_v34 = vmul.f32 %v1156_v24, %v4347_v1 }
 0x156   :  { %7799 = vst [vmem:[#allocation38_spill] sm:$0xff] %v4651_v8 }
 0x157   :  { %7800 = vst [vmem:[#allocation39_spill] sm:$0xff] %v4653_v18  ;;  %v4655_v21 = vpop.permute.xlu0 %828 }
 0x158   :  { %7801 = vst [vmem:[#allocation40_spill] sm:$0xff] %v4655_v21 }
 0x15b   :  { %1171 = vrot.lane.b32.xlu1 %v1158_v31, %s4289_s7  ;;  %1115 = vrot.lane.b32.xlu2 %v1106_v33, %s4289_s7 }
 0x15d   :  { %1140 = vrot.lane.b32.xlu0 %v1131_v44, %s4289_s7  ;;  %v4663_v35 = vpop.permute.xlu1 %701  ;;  %v4665_v58 = vpop.permute.xlu2 %779  ;;  %v1198_v44 = vmul.f32 %v1193_v52, %v4339_v61 }
 0x15e   :  { %7802 = vst [vmem:[#allocation41_spill] sm:$0xff] %v4663_v35 }
 0x15f   :  { %7803 = vst [vmem:[#allocation42_spill] sm:$0xff] %v4665_v58  ;;  %v4667_v11 = vpop.permute.xlu0 %699  ;;  %v1162_v58 = vmul.f32 %v1156_v24, %v4398_v32 }
 0x160   :  { %7804 = vst [vmem:[#allocation43_spill] sm:$0xff] %v4667_v11 }
 0x163   :  { %1177 = vrot.lane.b32.xlu1 %v1161_v40, %s4289_s7  ;;  %1138 = vrot.lane.b32.xlu2 %v1130_v42, %s4289_s7  ;;  %v1232_v40 = vstv %s4069_s11  ;;  %v1194_v42 = vmul.f32 %v1193_v52, %v4320_v47  ;;  %s4095_s11 = sld [smem:[#allocation4 + $0xb]] }
 0x164   :  { %v1233_v24 = vmul.f32 %v1232_v40, %v4357_v7 }
 0x165   :  { %1169 = vrot.lane.b32.xlu0 %v1157_v17, %s4289_s7  ;;  %v4675_v43 = vpop.permute.xlu1 %777  ;;  %v4677_v51 = vpop.permute.xlu2 %785  ;;  %v1234_v17 = vmul.f32 %v1232_v40, %v4367_v13 }
 0x166   :  { %7805 = vst [vmem:[#allocation44_spill] sm:$0xff] %v4675_v43  ;;  %v1245_v49 = vrot.slane %v1233_v24, 2 }
 0x167   :  { %7806 = vst [vmem:[#allocation45_spill] sm:$0xff] %v4677_v51  ;;  %v4679_v41 = vpop.permute.xlu0 %775  ;;  %v1246_v51 = vrot.slane %v1234_v17, 2 }
 0x168   :  { %7807 = vst [vmem:[#allocation46_spill] sm:$0xff] %v4679_v41 }
 0x16b   :  { %1208 = vrot.lane.b32.xlu1 %v1195_v62, %s4289_s7  ;;  %1144 = vrot.lane.b32.xlu2 %v1133_v56, %s4289_s7  ;;  %v1235_v62 = vmul.f32 %v1232_v40, %v4386_v23 }
 0x16d   :  { %1175 = vrot.lane.b32.xlu0 %v1160_v34, %s4289_s7  ;;  %v4687_v6 = vpop.permute.xlu1 %783  ;;  %v4689_v31 = vpop.permute.xlu2 %697  ;;  %v1248_v43 = vrot.slane %v1235_v62, 2 }
 0x16e   :  { %7808 = vst [vmem:[#allocation47_spill] sm:$0xff] %v4687_v6 }
 0x16f   :  { %7809 = vst [vmem:[#allocation48_spill] sm:$0xff] %v4689_v31  ;;  %v4691_v33 = vpop.permute.xlu0 %781  ;;  %v1249_v15 = vsel %vm218_vm3, %v1246_v51, %v1248_v43 }
 0x170   :  { %7810 = vst [vmem:[#allocation49_spill] sm:$0xff] %v4691_v33  ;;  %v1271_v33 = vstv %s4070_s12  ;;  %s4096_s12 = sld [smem:[#allocation4 + $0x3c]] }
 0x173   :  { %1214 = vrot.lane.b32.xlu1 %v1198_v44, %s4289_s7  ;;  %1173 = vrot.lane.b32.xlu2 %v1159_v2, %s4289_s7  ;;  %v1272_v44 = vmul.f32 %v1271_v33, %v4320_v47  ;;  %v1273_v2 = vmul.f32 %v1271_v33, %v4325_v50 }
 0x175   :  { %1206 = vrot.lane.b32.xlu0 %v1194_v42, %s4289_s7  ;;  %v4701_v56 = vpop.permute.xlu1 %873  ;;  %v4703_v34 = vpop.permute.xlu2 %875  ;;  %v1284_v12 = vrot.slane %v1272_v44, 2  ;;  %v1285_v43 = vrot.slane %v1273_v2, 2  ;;  %v1238_v44 = vmul.f32 %v1232_v40, %v4398_v32 }
 0x176   :  { %7811 = vst [vmem:[#allocation50_spill] sm:$0xff] %v4701_v56 }
 0x177   :  { %7812 = vst [vmem:[#allocation51_spill] sm:$0xff] %v4703_v34  ;;  %v4705_v6 = vpop.permute.xlu0 %871  ;;  %v1286_v28 = vsel %vm218_vm3, %v1284_v12, %v1285_v43 }
 0x178   :  { %7813 = vst [vmem:[#allocation52_spill] sm:$0xff] %v4705_v6 }
 0x17b   :  { %1257 = vrot.lane.b32.xlu1 %v1249_v15, %s4289_s7  ;;  %1179 = vrot.lane.b32.xlu2 %v1162_v58, %s4289_s7  ;;  %v1276_v15 = vmul.f32 %v1271_v33, %v4339_v61  ;;  %v1277_v58 = vmul.f32 %v1271_v33, %v4359_v9 }
 0x17d   :  { %1212 = vrot.lane.b32.xlu0 %v1197_v59, %s4289_s7  ;;  %v4715_v42 = vpop.permute.xlu1 %916  ;;  %v4717_v17 = vpop.permute.xlu2 %951  ;;  %v1247_v59 = vsel %vm218_vm3, %v1245_v49, %v1246_v51  ;;  %v1290_v25 = vrot.slane %v1276_v15, 2  ;;  %v1292_v63 = vrot.slane %v1277_v58, 2  ;;  %v1253_v51 = vrot.slane %v1238_v44, 2 }
 0x17e   :  { %7814 = vst [vmem:[#allocation53_spill] sm:$0xff] %v4715_v42  ;;  %v1236_v15 = vmul.f32 %v1232_v40, %v4347_v1 }
 0x17f   :  { %7815 = vst [vmem:[#allocation54_spill] sm:$0xff] %v4717_v17  ;;  %v4720_v62 = vpop.permute.xlu0 %877  ;;  %v1237_v17 = vmul.f32 %v1232_v40, %v4383_v20 }
 0x180   :  { %7816 = vst [vmem:[#allocation55_spill] sm:$0xff] %v4720_v62 }
 0x181   :  { %v1251_v49 = vrot.slane %v1237_v17, 2 }
 0x183   :  { %1294 = vrot.lane.b32.xlu1 %v1286_v28, %s4289_s7  ;;  %1210 = vrot.lane.b32.xlu2 %v1196_v22, %s4289_s7  ;;  %v1199_v28 = vmul.f32 %v1193_v52, %v4359_v9  ;;  %v1293_v22 = vsel %vm218_vm3, %v1290_v25, %v1292_v63  ;;  %v1254_v48 = vsel %vm218_vm3, %v1251_v49, %v1253_v51  ;;  %v1250_v51 = vrot.slane %v1236_v15, 2 }
 0x185   :  { %1255 = vrot.lane.b32.xlu0 %v1247_v59, %s4289_s7  ;;  %v4732_v2 = vpop.permute.xlu1 %955  ;;  %v4734_v12 = vpop.permute.xlu2 %957  ;;  %v1275_v59 = vmul.f32 %v1271_v33, %v4337_v60 }
 0x186   :  { %7817 = vst [vmem:[#allocation56_spill] sm:$0xff] %v4732_v2  ;;  %v1312_v2 = vstv %s4071_s13  ;;  %s4097_s13 = sld [smem:[#allocation4 + $0x12]] }
 0x187   :  { %7818 = vst [vmem:[#allocation57_spill] sm:$0xff] %v4734_v12  ;;  %v4736_v24 = vpop.permute.xlu0 %914  ;;  %v1315_v52 = vmul.f32 %v1312_v2, %v4386_v23  ;;  %v1289_v44 = vrot.slane %v1275_v59, 2  ;;  %v1274_v12 = vmul.f32 %v1271_v33, %v4349_v3  ;;  %v1314_v40 = vmul.f32 %v1312_v2, %v4367_v13 }
 0x188   :  { %7819 = vst [vmem:[#allocation58_spill] sm:$0xff] %v4736_v24  ;;  %v1318_v15 = vmul.f32 %v1312_v2, %v4398_v32 }
 0x189   :  { %v1287_v33 = vrot.slane %v1274_v12, 2 }
 0x18b   :  { %1300 = vrot.lane.b32.xlu1 %v1293_v22, %s4289_s7  ;;  %1216 = vrot.lane.b32.xlu2 %v1199_v28, %s4289_s7  ;;  %v1328_v22 = vrot.slane %v1315_v52, 2  ;;  %v1252_v28 = vsel %vm218_vm3, %v1250_v51, %v1251_v49  ;;  %v1326_v52 = vrot.slane %v1314_v40, 2  ;;  %v1333_v51 = vrot.slane %v1318_v15, 2 }
 0x18d   :  { %1261 = vrot.lane.b32.xlu0 %v1254_v48, %s4289_s7  ;;  %v4746_v58 = vpop.permute.xlu1 %961  ;;  %v4748_v17 = vpop.permute.xlu2 %998  ;;  %v1291_v48 = vsel %vm218_vm3, %v1289_v44, %v1290_v25  ;;  %v1288_v25 = vsel %vm218_vm3, %v1285_v43, %v1287_v33  ;;  %v1359_v44 = vstv %s4072_s14  ;;  %s4098_s14 = sld [smem:[#allocation4 + $0x43]] }
 0x18e   :  { %7820 = vst [vmem:[#allocation59_spill] sm:$0xff] %v4746_v58  ;;  %v1362_v40 = vmul.f32 %v1359_v44, %v4349_v3  ;;  %v1316_v58 = vmul.f32 %v1312_v2, %v4347_v1 }
 0x18f   :  { %7821 = vst [vmem:[#allocation60_spill] sm:$0xff] %v4748_v17  ;;  %v4751_v63 = vpop.permute.xlu0 %953 }
 0x190   :  { %7822 = vst [vmem:[#allocation61_spill] sm:$0xff] %v4751_v63  ;;  %v1375_v33 = vrot.slane %v1362_v40, 2 }
 0x193   :  { %1339 = vrot.lane.b32.xlu1 %v1328_v22, %s4289_s7  ;;  %1259 = vrot.lane.b32.xlu2 %v1252_v28, %s4289_s7  ;;  %v1329_v28 = vsel %vm218_vm3, %v1326_v52, %v1328_v22 }
 0x195   :  { %1298 = vrot.lane.b32.xlu0 %v1291_v48, %s4289_s7  ;;  %v4760_v17 = vpop.permute.xlu1 %1002  ;;  %v4762_v59 = vpop.permute.xlu2 %1004  ;;  %v1317_v48 = vmul.f32 %v1312_v2, %v4383_v20 }
 0x196   :  { %7823 = vst [vmem:[#allocation62_spill] sm:$0xff] %v4760_v17  ;;  %v1313_v17 = vmul.f32 %v1312_v2, %v4357_v7  ;;  %v1360_v2 = vmul.f32 %v1359_v44, %v4320_v47 }
 0x197   :  { %7824 = vst [vmem:[#allocation63_spill] sm:$0xff] %v4762_v59  ;;  %v4765_v49 = vpop.permute.xlu0 %959  ;;  %v1331_v15 = vrot.slane %v1317_v48, 2  ;;  %v1450_v59 = vmul.f32 %v4813_v26, %v4349_v3 }
 0x198   :  { %7825 = vst [vmem:[#allocation64_spill] sm:$0xff] %v4765_v49  ;;  %v1325_v22 = vrot.slane %v1313_v17, 2  ;;  %v1365_v17 = vmul.f32 %v1359_v44, %v4359_v9  ;;  %v1364_v9 = vmul.f32 %v1359_v44, %v4339_v61 }
 0x199   :  { %v1334_v49 = vsel %vm218_vm3, %v1331_v15, %v1333_v51  ;;  %v1463_v3 = vrot.slane %v1450_v59, 4  ;;  %v4847_v59 = vld [vmem:[#allocation3] sm:$0xff] }
 0x19b   :  { %1345 = vrot.lane.b32.xlu1 %v1333_v51, %s4289_s7  ;;  %1296 = vrot.lane.b32.xlu2 %v1288_v25, %s4289_s7  ;;  %v1327_v25 = vsel %vm218_vm3, %v1325_v22, %v1326_v52  ;;  %v1330_v51 = vrot.slane %v1316_v58, 2  ;;  %v1380_v22 = vrot.slane %v1365_v17, 2 }
 0x19d   :  { %1337 = vrot.lane.b32.xlu0 %v1329_v28, %s4289_s7  ;;  %v4774_v63 = vpop.permute.xlu1 %1008  ;;  %v4776_v12 = vpop.permute.xlu2 %1047  ;;  %v1361_v28 = vmul.f32 %v1359_v44, %v4325_v50 }
 0x19e   :  { %7826 = vst [vmem:[#allocation65_spill] sm:$0xff] %v4774_v63 }
 0x19f   :  { %7827 = vst [vmem:[#allocation66_spill] sm:$0xff] %v4776_v12  ;;  %v4779_v43 = vpop.permute.xlu0 %1000  ;;  %v1373_v52 = vrot.slane %v1361_v28, 2 }
 0x1a0   :  { %7828 = vst [vmem:[#allocation67_spill] sm:$0xff] %v4779_v43  ;;  %v1408_v43 = vstv %s4073_s15  ;;  %s4099_s15 = sld [smem:[#allocation4 + $0x19]] }
 0x1a1   :  { %v4797_v41 = vmul.f32 %v1408_v43, %v4383_v20  ;;  %v1412_v58 = vmul.f32 %v1408_v43, %v4347_v1  ;;  %v1414_v21 = vmul.f32 %v1408_v43, %v4398_v32 }
 0x1a3   :  { %1386 = vrot.lane.b32.xlu1 %v1375_v33, %s4289_s7  ;;  %1335 = vrot.lane.b32.xlu2 %v1327_v25, %s4289_s7  ;;  %v1332_v25 = vsel %vm218_vm3, %v1330_v51, %v1331_v15  ;;  %v7755_v47 = vrot.slane %v4797_v41, 4  ;;  %v1372_v51 = vrot.slane %v1360_v2, 2  ;;  %v1426_v54 = vrot.slane %v1412_v58, 4 }
 0x1a4   :  { %v7844_v37 = vrot.slane %v4797_v41, 4 }
 0x1a5   :  { %1343 = vrot.lane.b32.xlu0 %v1334_v49, %s4289_s7  ;;  %v4788_v10 = vpop.permute.xlu1 %1051  ;;  %v4790_v48 = vpop.permute.xlu2 %1053  ;;  %v1376_v49 = vsel %vm218_vm3, %v1373_v52, %v1375_v33  ;;  %v1378_v33 = vrot.slane %v1364_v9, 2  ;;  %v1428_v61 = vsel %vm355_vm4, %v1426_v54, %v7755_v47  ;;  %v1374_v1 = vsel %vm218_vm3, %v1372_v51, %v1373_v52 }
 0x1a6   :  { %7829 = vst [vmem:[#allocation68_spill] sm:$0xff] %v4788_v10  ;;  %v1623_v10 = vstv %s4078_s20  ;;  %s4104_s20 = sld [smem:[#allocation4 + $0x58]] }
 0x1a7   :  { %7830 = vst [vmem:[#allocation69_spill] sm:$0xff] %v4790_v48  ;;  %v4793_v40 = vpop.permute.xlu0 %1006  ;;  %v1381_v2 = vsel %vm218_vm3, %v1378_v33, %v1380_v22 }
 0x1a8   :  { %7831 = vst [vmem:[#allocation70_spill] sm:$0xff] %v4793_v40 }
 0x1ab   :  { %1392 = vrot.lane.b32.xlu1 %v1380_v22, %s4289_s7  ;;  %1341 = vrot.lane.b32.xlu2 %v1332_v25, %s4289_s7  ;;  %v1363_v25 = vmul.f32 %v1359_v44, %v4337_v60  ;;  %v1410_v60 = vmul.f32 %v1408_v43, %v4367_v13  ;;  %v1411_v44 = vmul.f32 %v1408_v43, %v4386_v23 }
 0x1ad   :  { %1384 = vrot.lane.b32.xlu0 %v1376_v49, %s4289_s7  ;;  %v4806_v28 = vpop.permute.xlu1 %1088  ;;  %v4808_v15 = vpop.permute.xlu2 %1090  ;;  %v1449_v49 = vmul.f32 %v4813_v26, %v4325_v50  ;;  %v1377_v58 = vrot.slane %v1363_v25, 2  ;;  %v1422_v22 = vrot.slane %v1410_v60, 4  ;;  %v1424_v51 = vrot.slane %v1411_v44, 4 }
 0x1ae   :  { %7832 = vst [vmem:[#allocation71_spill] sm:$0xff] %v4806_v28  ;;  %v1448_v25 = vmul.f32 %v4847_v59, %v4813_v26 }
 0x1af   :  { %7833 = vst [vmem:[#allocation72_spill] sm:$0xff] %v4808_v15  ;;  %v4810_v17 = vpop.permute.xlu0 %1049  ;;  %v1461_v9 = vrot.slane %v1449_v49, 4  ;;  %v1379_v47 = vsel %vm218_vm3, %v1377_v58, %v1378_v33  ;;  %v1409_v49 = vmul.f32 %v1408_v43, %v4357_v7 }
 0x1b0   :  { %7834 = vst [vmem:[#allocation73_spill] sm:$0xff] %v4810_v17 }
 0x1b3   :  { %1435 = vrot.lane.b32.xlu1 %v1428_v61, %s4289_s7  ;;  %1382 = vrot.lane.b32.xlu2 %v1374_v1, %s4289_s7  ;;  %v4836_v61 = vstv %s4075_s17  ;;  %v1464_v1 = vsel %vm355_vm4, %v1461_v9, %v1463_v3  ;;  %v1460_v3 = vrot.slane %v1448_v25, 4  ;;  %v4874_v25 = vld [vmem:[#allocation3 + $0x20] sm:$0xff]  ;;  %s4101_s17 = sld [smem:[#allocation4 + $0x20]] }
 0x1b4   :  { %v4842_v23 = vmul.f32 %v4836_v61, %v4367_v13  ;;  %v1489_v33 = vmul.f32 %v4836_v61, %v4357_v7  ;;  %v4868_v7 = vmul.f32 %v4836_v61, %v4383_v20  ;;  %v4883_v20 = vld [vmem:[#allocation2 + $0x18] sm:$0xff]  ;;  %v1628_v15 = vmul.f32 %v4874_v25, %v1623_v10 }
 0x1b5   :  { %1390 = vrot.lane.b32.xlu0 %v1381_v2, %s4289_s7  ;;  %v4830_v54 = vpop.permute.xlu1 %1113  ;;  %v4832_v52 = vpop.permute.xlu2 %1115  ;;  %v1425_v2 = vsel %vm355_vm4, %v1422_v22, %v1424_v51  ;;  %v1421_v51 = vrot.slane %v1409_v49, 4  ;;  %v1462_v36 = vsel %vm355_vm4, %v1460_v3, %v1461_v9  ;;  %v4878_v49 = vld [vmem:[#allocation3 + $0x28] sm:$0x3f]  ;;  %v1492_v32 = vmul.f32 %v4883_v20, %v4836_v61 }
 0x1b6   :  { %7835 = vst [vmem:[#allocation74_spill] sm:$0xff] %v4830_v54  ;;  %v1501_v58 = vrot.slane %v1489_v33, 4  ;;  %v1452_v33 = vmul.f32 %v4874_v25, %v4813_v26  ;;  %v7851_v28 = vrot.slane %v4842_v23, 4 }
 0x1b7   :  { %7836 = vst [vmem:[#allocation75_spill] sm:$0xff] %v4832_v52  ;;  %v4834_v50 = vpop.permute.xlu0 %1086  ;;  %v1506_v40 = vrot.slane %v1492_v32, 4 }
 0x1b8   :  { %7837 = vst [vmem:[#allocation76_spill] sm:$0xff] %v4834_v50  ;;  %v5135_v50 = vstv %s4085_s28  ;;  %s4046_s28 = sld [smem:[#allocation4 + $0x4d]] }
 0x1bb   :  { %1472 = vrot.lane.b32.xlu1 %v1464_v1, %s4289_s7  ;;  %1388 = vrot.lane.b32.xlu2 %v1379_v47, %s4289_s7  ;;  %v7756_v47 = vrot.slane %v4842_v23, 4 }
 0x1bd   :  { %1433 = vrot.lane.b32.xlu0 %v1425_v2, %s4289_s7  ;;  %v4855_v13 = vpop.permute.xlu1 %1119  ;;  %v4857_v60 = vpop.permute.xlu2 %1138  ;;  %v1503_v1 = vsel %vm355_vm4, %v1501_v58, %v7756_v47  ;;  %v1423_v2 = vsel %vm355_vm4, %v1421_v51, %v1422_v22  ;;  %v1453_v22 = vmul.f32 %v4878_v49, %v4813_v26  ;;  %v1507_v58 = vrot.slane %v4868_v7, 4 }
 0x1be   :  { %7838 = vst [vmem:[#allocation77_spill] sm:$0xff] %v4855_v13  ;;  %v1429_v51 = vrot.slane %v1414_v21, 4  ;;  %v4908_v21 = vld [vmem:[#allocation3 + $0x18] sm:$0xff] }
 0x1bf   :  { %7839 = vst [vmem:[#allocation78_spill] sm:$0xff] %v4857_v60  ;;  %v4859_v44 = vpop.permute.xlu0 %1092  ;;  %v1468_v47 = vrot.slane %v1453_v22, 4  ;;  %v1508_v63 = vsel %vm355_vm4, %v1506_v40, %v1507_v58  ;;  %v4920_v40 = vld [vmem:[#allocation2 + $0x10] sm:$0x3f] }
 0x1c0   :  { %7840 = vst [vmem:[#allocation79_spill] sm:$0xff] %v4859_v44  ;;  %v1430_v14 = vsel %vm355_vm4, %v7844_v37, %v1429_v51  ;;  %v1491_v32 = vmul.f32 %v4920_v40, %v4836_v61 }
 0x1c3   :  { %1511 = vrot.lane.b32.xlu1 %v1503_v1, %s4289_s7  ;;  %1431 = vrot.lane.b32.xlu2 %v1423_v2, %s4289_s7  ;;  %v4894_v1 = vstv %s4076_s0  ;;  %v1466_v2 = vrot.slane %v1452_v33, 4  ;;  %v1451_v33 = vmul.f32 %v4908_v21, %v4813_v26  ;;  %s4102_s0 = sld [smem:[#allocation4 + $0x51]] }
 0x1c4   :  { %v4906_v7 = vmul.f32 %v4902_v5, %v4894_v1 }
 0x1c5   :  { %1470 = vrot.lane.b32.xlu0 %v1462_v36, %s4289_s7  ;;  %v4887_v43 = vpop.permute.xlu1 %1142  ;;  %v4889_v9 = vpop.permute.xlu2 %1144  ;;  %v1536_v36 = vmul.f32 %v4847_v59, %v4894_v1  ;;  %v1469_v22 = vsel %vm355_vm4, %v1466_v2, %v1468_v47  ;;  %v1465_v27 = vrot.slane %v1451_v33, 4 }
 0x1c6   :  { %7841 = vst [vmem:[#allocation80_spill] sm:$0xff] %v4887_v43  ;;  %v1549_v47 = vrot.slane %v4906_v7, 4  ;;  %v4977_v43 = vld [vmem:[#allocation2 + $0x20] sm:$0xff] }
 0x1c7   :  { %7842 = vst [vmem:[#allocation81_spill] sm:$0xff] %v4889_v9  ;;  %v4891_v3 = vpop.permute.xlu0 %1117  ;;  %v1548_v26 = vrot.slane %v1536_v36, 4 }
 0x1c8   :  { %7843 = vst [vmem:[#allocation82_spill] sm:$0xff] %v4891_v3  ;;  %v4953_v3 = vld [vmem:[#allocation2 + $0x8] sm:$0xff] }
 0x1c9   :  { %v5140_v48 = vmul.f32 %v4953_v3, %v5135_v50 }
 0x1cb   :  { %1517 = vrot.lane.b32.xlu1 %v1508_v63, %s4289_s7  ;;  %1437 = vrot.lane.b32.xlu2 %v1430_v14, %s4289_s7  ;;  %v1504_v63 = vrot.slane %v1491_v32, 4  ;;  %v1550_v14 = vsel %vm355_vm4, %v1548_v26, %v1549_v47 }
 0x1cd   :  { %1476 = vrot.lane.b32.xlu0 %v1469_v22, %s4289_s7  ;;  %v4916_v37 = vpop.permute.xlu1 %1171  ;;  %v4918_v41 = vpop.permute.xlu2 %1173  ;;  %v1467_v22 = vsel %vm355_vm4, %v1465_v27, %v1466_v2  ;;  %v4944_v27 = vld [vmem:[#allocation2 + $0x28] sm:$0x3f] }
 0x1ce   :  { %7845 = vst [vmem:[#allocation83_spill] sm:$0xff] %v4916_v37  ;;  %v1539_v37 = vmul.f32 %v4908_v21, %v4894_v1  ;;  %v1494_v2 = vmul.f32 %v4944_v27, %v4836_v61  ;;  %v4961_v61 = vld [vmem:[#allocation2] sm:$0xff] }
 0x1cf   :  { %7846 = vst [vmem:[#allocation84_spill] sm:$0xff] %v4918_v41  ;;  %v4924_v51 = vpop.permute.xlu0 %1140  ;;  %v4933_v41 = vmul.f32 %v4874_v25, %v4894_v1 }
 0x1d0   :  { %7847 = vst [vmem:[#allocation85_spill] sm:$0xff] %v4924_v51  ;;  %v1553_v32 = vrot.slane %v1539_v37, 4  ;;  %v1584_v51 = vstv %s4077_s1  ;;  %s4103_s1 = sld [smem:[#allocation4 + $0x27]] }
 0x1d1   :  { %v1554_v26 = vrot.slane %v4933_v41, 4  ;;  %v1585_v37 = vmul.f32 %v4961_v61, %v1584_v51 }
 0x1d3   :  { %1558 = vrot.lane.b32.xlu1 %v1550_v14, %s4289_s7  ;;  %1474 = vrot.lane.b32.xlu2 %v1467_v22, %s4289_s7  ;;  %v1509_v14 = vrot.slane %v1494_v2, 4  ;;  %v1555_v22 = vsel %vm355_vm4, %v1553_v32, %v1554_v26 }
 0x1d5   :  { %1515 = vrot.lane.b32.xlu0 %v1504_v63, %s4289_s7  ;;  %v4938_v36 = vpop.permute.xlu1 %1177  ;;  %v4940_v7 = vpop.permute.xlu2 %1179 }
 0x1d6   :  { %7848 = vst [vmem:[#allocation86_spill] sm:$0xff] %v4938_v36  ;;  %v1505_v36 = vsel %vm355_vm4, %v7851_v28, %v1504_v63  ;;  %v4970_v63 = vld [vmem:[#allocation3 + $0x10] sm:$0x3f] }
 0x1d7   :  { %7849 = vst [vmem:[#allocation87_spill] sm:$0xff] %v4940_v7  ;;  %v4942_v33 = vpop.permute.xlu0 %1169  ;;  %v4956_v7 = vmul.f32 %v4953_v3, %v1584_v51  ;;  %v1538_v2 = vmul.f32 %v4970_v63, %v4894_v1 }
 0x1d8   :  { %7850 = vst [vmem:[#allocation88_spill] sm:$0xff] %v4942_v33 }
 0x1d9   :  { %v1598_v32 = vrot.slane %v4956_v7, 6  ;;  %v1551_v33 = vrot.slane %v1538_v2, 4 }
 0x1db   :  { %1564 = vrot.lane.b32.xlu1 %v1555_v22, %s4289_s7  ;;  %1513 = vrot.lane.b32.xlu2 %v1505_v36, %s4289_s7  ;;  %v1597_v36 = vrot.slane %v1585_v37, 6  ;;  %v1510_v22 = vsel %vm355_vm4, %v1507_v58, %v1509_v14  ;;  %v1541_v58 = vmul.f32 %v4878_v49, %v4894_v1 }
 0x1dd   :  { %1521 = vrot.lane.b32.xlu0 %v1509_v14, %s4289_s7  ;;  %v4964_v41 = vpop.permute.xlu1 %1208  ;;  %v4966_v23 = vpop.permute.xlu2 %1210  ;;  %v1599_v9 = vsel %vm492_vm5, %v1597_v36, %v1598_v32 }
 0x1de   :  { %7852 = vst [vmem:[#allocation89_spill] sm:$0xff] %v4964_v41  ;;  %v1589_v41 = vmul.f32 %v4977_v43, %v1584_v51 }
 0x1df   :  { %7853 = vst [vmem:[#allocation90_spill] sm:$0xff] %v4966_v23  ;;  %v4968_v28 = vpop.permute.xlu0 %1175  ;;  %v1590_v23 = vmul.f32 %v4944_v27, %v1584_v51 }
 0x1e0   :  { %7854 = vst [vmem:[#allocation91_spill] sm:$0xff] %v4968_v28  ;;  %v1603_v2 = vrot.slane %v1589_v41, 6  ;;  %v1556_v28 = vrot.slane %v1541_v58, 4 }
 0x1e1   :  { %v1605_v36 = vrot.slane %v1590_v23, 6  ;;  %v1588_v23 = vmul.f32 %v4883_v20, %v1584_v51 }
 0x1e3   :  { %1607 = vrot.lane.b32.xlu1 %v1599_v9, %s4289_s7  ;;  %1519 = vrot.lane.b32.xlu2 %v1510_v22, %s4289_s7  ;;  %v1606_v44 = vsel %vm492_vm5, %v1603_v2, %v1605_v36  ;;  %v1552_v9 = vsel %vm355_vm4, %v1549_v47, %v1551_v33  ;;  %v1627_v22 = vmul.f32 %v4908_v21, %v1623_v10  ;;  %v1642_v47 = vrot.slane %v1628_v15, 6 }
 0x1e5   :  { %1562 = vrot.lane.b32.xlu0 %v1551_v33, %s4289_s7  ;;  %v4984_v7 = vpop.permute.xlu1 %1214  ;;  %v4986_v37 = vpop.permute.xlu2 %1216  ;;  %v1641_v36 = vrot.slane %v1627_v22, 6  ;;  %v1602_v33 = vrot.slane %v1588_v23, 6 }
 0x1e6   :  { %7855 = vst [vmem:[#allocation92_spill] sm:$0xff] %v4984_v7  ;;  %v1625_v7 = vmul.f32 %v4902_v5, %v1623_v10 }
 0x1e7   :  { %7856 = vst [vmem:[#allocation93_spill] sm:$0xff] %v4986_v37  ;;  %v4990_v14 = vpop.permute.xlu0 %1206  ;;  %v1604_v37 = vsel %vm492_vm5, %v1602_v33, %v1603_v2  ;;  %v1664_v2 = vstv %s4079_s21  ;;  %v1624_v33 = vmul.f32 %v4847_v59, %v1623_v10  ;;  %s4105_s21 = sld [smem:[#allocation4 + $0x2e]] }
 0x1e8   :  { %7857 = vst [vmem:[#allocation94_spill] sm:$0xff] %v4990_v14  ;;  %v1643_v14 = vsel %vm492_vm5, %v1641_v36, %v1642_v47 }
 0x1eb   :  { %1613 = vrot.lane.b32.xlu1 %v1606_v44, %s4289_s7  ;;  %1560 = vrot.lane.b32.xlu2 %v1552_v9, %s4289_s7  ;;  %v1557_v44 = vsel %vm355_vm4, %v1554_v26, %v1556_v28  ;;  %v1587_v9 = vmul.f32 %v4920_v40, %v1584_v51  ;;  %v1637_v51 = vrot.slane %v1625_v7, 6 }
 0x1ed   :  { %1568 = vrot.lane.b32.xlu0 %v1556_v28, %s4289_s7  ;;  %v4999_v1 = vpop.permute.xlu1 %1257  ;;  %v5001_v41 = vpop.permute.xlu2 %1259  ;;  %v1600_v26 = vrot.slane %v1587_v9, 6  ;;  %v1689_v9 = vstv %s4080_s22  ;;  %s4106_s22 = sld [smem:[#allocation4 + $0x5f]] }
 0x1ee   :  { %7858 = vst [vmem:[#allocation95_spill] sm:$0xff] %v4999_v1 }
 0x1ef   :  { %7859 = vst [vmem:[#allocation96_spill] sm:$0xff] %v5001_v41  ;;  %v5004_v58 = vpop.permute.xlu0 %1212  ;;  %v1601_v36 = vsel %vm492_vm5, %v1598_v32, %v1600_v26  ;;  %v1690_v32 = vmul.f32 %v4847_v59, %v1689_v9  ;;  %v1665_v26 = vmul.f32 %v4961_v61, %v1664_v2  ;;  %v1693_v41 = vmul.f32 %v4874_v25, %v1689_v9 }
 0x1f0   :  { %7860 = vst [vmem:[#allocation97_spill] sm:$0xff] %v5004_v58  ;;  %v1626_v58 = vmul.f32 %v4970_v63, %v1623_v10 }
 0x1f2   :  { %v1639_v28 = vrot.slane %v1626_v58, 6 }
 0x1f3   :  { %1650 = vrot.lane.b32.xlu1 %v1643_v14, %s4289_s7  ;;  %1566 = vrot.lane.b32.xlu2 %v1557_v44, %s4289_s7  ;;  %v1666_v14 = vmul.f32 %v4953_v3, %v1664_v2 }
 0x1f4   :  { %v1640_v44 = vsel %vm492_vm5, %v1637_v51, %v1639_v28 }
 0x1f5   :  { %1611 = vrot.lane.b32.xlu0 %v1604_v37, %s4289_s7  ;;  %v5015_v15 = vpop.permute.xlu1 %1294  ;;  %v5017_v22 = vpop.permute.xlu2 %1296 }
 0x1f6   :  { %7861 = vst [vmem:[#allocation98_spill] sm:$0xff] %v5015_v15 }
 0x1f7   :  { %7862 = vst [vmem:[#allocation99_spill] sm:$0xff] %v5017_v22  ;;  %v5019_v23 = vpop.permute.xlu0 %1255  ;;  %v1636_v22 = vrot.slane %v1624_v33, 6 }
 0x1f8   :  { %7863 = vst [vmem:[#allocation100_spill] sm:$0xff] %v5019_v23 }
 0x1f9   :  { %v1638_v28 = vsel %vm492_vm5, %v1636_v22, %v1637_v51  ;;  %v1668_v22 = vmul.f32 %v4977_v43, %v1664_v2 }
 0x1fb   :  { %1675 = vrot.lane.b32.xlu1 %v1666_v14, %s4290_s23  ;;  %1609 = vrot.lane.b32.xlu2 %v1601_v36, %s4289_s7  ;;  %v1629_v14 = vmul.f32 %v4878_v49, %v1623_v10 }
 0x1fd   :  { %1648 = vrot.lane.b32.xlu0 %v1640_v44, %s4289_s7  ;;  %v5028_v37 = vpop.permute.xlu1 %1300  ;;  %v5030_v7 = vpop.permute.xlu2 %1335  ;;  %v1644_v33 = vrot.slane %v1629_v14, 6 }
 0x1fe   :  { %7864 = vst [vmem:[#allocation101_spill] sm:$0xff] %v5028_v37 }
 0x1ff   :  { %7865 = vst [vmem:[#allocation102_spill] sm:$0xff] %v5030_v7  ;;  %v5032_v58 = vpop.permute.xlu0 %1261  ;;  %v1645_v10 = vsel %vm492_vm5, %v1642_v47, %v1644_v33 }
 0x200   :  { %7866 = vst [vmem:[#allocation103_spill] sm:$0xff] %v5032_v58 }
 0x203   :  { %1698 = vrot.lane.b32.xlu1 %v1690_v32, %s4290_s23  ;;  %1646 = vrot.lane.b32.xlu2 %v1638_v28, %s4289_s7  ;;  %v1716_v28 = vstv %s4081_s24  ;;  %s4292_s24 = smov 123  }
 0x204   :  { %v1719_v14 = vmul.f32 %v4920_v40, %v1716_v28 }
 0x205   :  { %1673 = vrot.lane.b32.xlu0 %v1665_v26, %s4290_s23  ;;  %v5041_v36 = vpop.permute.xlu1 %1339  ;;  %v5043_v44 = vpop.permute.xlu2 %1341 }
 0x206   :  { %7867 = vst [vmem:[#allocation104_spill] sm:$0xff] %v5041_v36  ;;  %v1667_v36 = vmul.f32 %v4883_v20, %v1664_v2  ;;  %v1718_v2 = vmul.f32 %v4953_v3, %v1716_v28 }
 0x207   :  { %7868 = vst [vmem:[#allocation105_spill] sm:$0xff] %v5043_v44  ;;  %v5045_v7 = vpop.permute.xlu0 %1298  ;;  %v1692_v44 = vmul.f32 %v4908_v21, %v1689_v9 }
 0x208   :  { %7869 = vst [vmem:[#allocation106_spill] sm:$0xff] %v5045_v7 }
 0x20b   :  { %1704 = vrot.lane.b32.xlu1 %v1693_v41, %s4290_s23  ;;  %1652 = vrot.lane.b32.xlu2 %v1645_v10, %s4289_s7  ;;  %v1691_v10 = vmul.f32 %v4902_v5, %v1689_v9  ;;  %v1721_v9 = vmul.f32 %v4977_v43, %v1716_v28  ;;  %s4092_s7 = sld [smem:[#allocation4 + $0x5e]] }
 0x20d   :  { %1679 = vrot.lane.b32.xlu0 %v1668_v22, %s4290_s23  ;;  %v5053_v51 = vpop.permute.xlu1 %1345  ;;  %v5055_v32 = vpop.permute.xlu2 %1382  ;;  %v1722_v22 = vmul.f32 %v4944_v27, %v1716_v28 }
 0x20e   :  { %7870 = vst [vmem:[#allocation107_spill] sm:$0xff] %v5053_v51  ;;  %v1792_v51 = vstv %s4083_s26  ;;  %s4108_s26 = sld [smem:[#allocation4 + $0x36]] }
 0x20f   :  { %7871 = vst [vmem:[#allocation108_spill] sm:$0xff] %v5055_v32  ;;  %v5057_v26 = vpop.permute.xlu0 %1337  ;;  %v1720_v32 = vmul.f32 %v4883_v20, %v1716_v28 }
 0x210   :  { %7872 = vst [vmem:[#allocation109_spill] sm:$0xff] %v5057_v26  ;;  %v1717_v26 = vmul.f32 %v4961_v61, %v1716_v28 }
 0x213   :  { %1733 = vrot.lane.b32.xlu1 %v1719_v14, %s4290_s23  ;;  %1677 = vrot.lane.b32.xlu2 %v1667_v36, %s4290_s23 }
 0x215   :  { %1702 = vrot.lane.b32.xlu0 %v1692_v44, %s4290_s23  ;;  %v5065_v41 = vpop.permute.xlu1 %1386  ;;  %v5067_v47 = vpop.permute.xlu2 %1388 }
 0x216   :  { %7873 = vst [vmem:[#allocation110_spill] sm:$0xff] %v5065_v41 }
 0x217   :  { %7874 = vst [vmem:[#allocation111_spill] sm:$0xff] %v5067_v47  ;;  %v5069_v33 = vpop.permute.xlu0 %1343 }
 0x218   :  { %7875 = vst [vmem:[#allocation112_spill] sm:$0xff] %v5069_v33  ;;  %v1753_v33 = vstv %s4082_s25  ;;  %s4042_s25 = sld [smem:[#allocation4 + $0x3f]] }
 0x219   :  { %v1756_v41 = vmul.f32 %v4970_v63, %v1753_v33  ;;  %v1755_v47 = vmul.f32 %v4902_v5, %v1753_v33  ;;  %v1754_v37 = vmul.f32 %v4847_v59, %v1753_v33 }
 0x21b   :  { %1739 = vrot.lane.b32.xlu1 %v1722_v22, %s4290_s23  ;;  %1700 = vrot.lane.b32.xlu2 %v1691_v10, %s4290_s23 }
 0x21d   :  { %1731 = vrot.lane.b32.xlu0 %v1718_v2, %s4290_s23  ;;  %v5077_v36 = vpop.permute.xlu1 %1392  ;;  %v5079_v44 = vpop.permute.xlu2 %1431 }
 0x21e   :  { %7876 = vst [vmem:[#allocation113_spill] sm:$0xff] %v5077_v36 }
 0x21f   :  { %7877 = vst [vmem:[#allocation114_spill] sm:$0xff] %v5079_v44  ;;  %v5081_v14 = vpop.permute.xlu0 %1384 }
 0x220   :  { %7878 = vst [vmem:[#allocation115_spill] sm:$0xff] %v5081_v14  ;;  %v1759_v14 = vmul.f32 %v4878_v49, %v1753_v33 }
 0x223   :  { %1770 = vrot.lane.b32.xlu1 %v1756_v41, %s4290_s23  ;;  %1729 = vrot.lane.b32.xlu2 %v1717_v26, %s4290_s23  ;;  %v5099_v41 = vmul.f32 %v4977_v43, %v1792_v51  ;;  %v1796_v26 = vmul.f32 %v4883_v20, %v1792_v51 }
 0x225   :  { %1737 = vrot.lane.b32.xlu0 %v1721_v9, %s4290_s23  ;;  %v5089_v22 = vpop.permute.xlu1 %1435  ;;  %v5091_v10 = vpop.permute.xlu2 %1437  ;;  %v7757_v28 = vrot.slane %v5099_v41, 2  ;;  %v1810_v7 = vrot.slane %v1796_v26, 2  ;;  %v1794_v26 = vmul.f32 %v4953_v3, %v1792_v51 }
 0x226   :  { %7879 = vst [vmem:[#allocation116_spill] sm:$0xff] %v5089_v22  ;;  %v5112_v22 = vstv %s4084_s27  ;;  %s4038_s27 = sld [smem:[#allocation4 + $0x31]] }
 0x227   :  { %7880 = vst [vmem:[#allocation117_spill] sm:$0xff] %v5091_v10  ;;  %v5093_v2 = vpop.permute.xlu0 %1390  ;;  %v1806_v60 = vrot.slane %v1794_v26, 2 }
 0x228   :  { %7881 = vst [vmem:[#allocation118_spill] sm:$0xff] %v5093_v2 }
 0x22b   :  { %1776 = vrot.lane.b32.xlu1 %v1759_v14, %s4290_s23  ;;  %1735 = vrot.lane.b32.xlu2 %v1720_v32, %s4290_s23  ;;  %v1758_v32 = vmul.f32 %v4874_v25, %v1753_v33  ;;  %v1833_v14 = vmul.f32 %v4902_v5, %v5112_v22 }
 0x22d   :  { %1768 = vrot.lane.b32.xlu0 %v1755_v47, %s4290_s23  ;;  %v5105_v9 = vpop.permute.xlu1 %1472  ;;  %v5107_v2 = vpop.permute.xlu2 %1474  ;;  %v1812_v47 = vsel %vm218_vm3, %v1810_v7, %v7757_v28  ;;  %v1845_v28 = vrot.slane %v1833_v14, 2 }
 0x22e   :  { %7882 = vst [vmem:[#allocation119_spill] sm:$0xff] %v5105_v9  ;;  %v1834_v9 = vmul.f32 %v4970_v63, %v5112_v22 }
 0x22f   :  { %7883 = vst [vmem:[#allocation120_spill] sm:$0xff] %v5107_v2  ;;  %v5109_v36 = vpop.permute.xlu0 %1433  ;;  %v1795_v2 = vmul.f32 %v4920_v40, %v1792_v51 }
 0x230   :  { %7884 = vst [vmem:[#allocation121_spill] sm:$0xff] %v5109_v36  ;;  %v1847_v15 = vrot.slane %v1834_v9, 2  ;;  %v1832_v9 = vmul.f32 %v4847_v59, %v5112_v22  ;;  %v7894_v36 = vrot.slane %v5099_v41, 2 }
 0x231   :  { %v1808_v13 = vrot.slane %v1795_v2, 2 }
 0x233   :  { %1819 = vrot.lane.b32.xlu1 %v1812_v47, %s4290_s23  ;;  %1766 = vrot.lane.b32.xlu2 %v1754_v37, %s4290_s23  ;;  %v1757_v47 = vmul.f32 %v4908_v21, %v1753_v33  ;;  %v1848_v37 = vsel %vm218_vm3, %v1845_v28, %v1847_v15  ;;  %v1873_v33 = vmul.f32 %v4961_v61, %v5135_v50 }
 0x234   :  { %v1793_v15 = vmul.f32 %v4961_v61, %v1792_v51 }
 0x235   :  { %1774 = vrot.lane.b32.xlu0 %v1758_v32, %s4290_s23  ;;  %v5128_v10 = vpop.permute.xlu1 %1511  ;;  %v5130_v58 = vpop.permute.xlu2 %1513  ;;  %v1809_v32 = vsel %vm218_vm3, %v1806_v60, %v1808_v13  ;;  %v1886_v13 = vrot.slane %v5140_v48, 2  ;;  %v1836_v48 = vmul.f32 %v4874_v25, %v5112_v22 }
 0x236   :  { %7885 = vst [vmem:[#allocation122_spill] sm:$0xff] %v5128_v10 }
 0x237   :  { %7886 = vst [vmem:[#allocation123_spill] sm:$0xff] %v5130_v58  ;;  %v5132_v7 = vpop.permute.xlu0 %1470  ;;  %v1805_v58 = vrot.slane %v1793_v15, 2  ;;  %v1919_v15 = vstv %s4086_s29  ;;  %s4050_s29 = sld [smem:[#allocation4 + $0x5b]] }
 0x238   :  { %7887 = vst [vmem:[#allocation124_spill] sm:$0xff] %v5132_v7  ;;  %v5162_v7 = vmul.f32 %v4977_v43, %v5135_v50 }
 0x23b   :  { %1856 = vrot.lane.b32.xlu1 %v1848_v37, %s4290_s23  ;;  %1772 = vrot.lane.b32.xlu2 %v1757_v47, %s4290_s23  ;;  %v1844_v47 = vrot.slane %v1832_v9, 2  ;;  %v1885_v37 = vrot.slane %v1873_v33, 2  ;;  %v1837_v9 = vmul.f32 %v4878_v49, %v5112_v22 }
 0x23d   :  { %1817 = vrot.lane.b32.xlu0 %v1809_v32, %s4290_s23  ;;  %v5151_v2 = vpop.permute.xlu1 %1517  ;;  %v5153_v14 = vpop.permute.xlu2 %1519  ;;  %v1887_v10 = vsel %vm218_vm3, %v1885_v37, %v1886_v13  ;;  %v1807_v32 = vsel %vm218_vm3, %v1805_v58, %v1806_v60  ;;  %v1876_v60 = vmul.f32 %v4883_v20, %v5135_v50  ;;  %v1852_v37 = vrot.slane %v1837_v9, 2 }
 0x23e   :  { %7888 = vst [vmem:[#allocation125_spill] sm:$0xff] %v5151_v2  ;;  %v1798_v2 = vmul.f32 %v4944_v27, %v1792_v51 }
 0x23f   :  { %7889 = vst [vmem:[#allocation126_spill] sm:$0xff] %v5153_v14  ;;  %v5155_v26 = vpop.permute.xlu0 %1476  ;;  %v1846_v14 = vsel %vm218_vm3, %v1844_v47, %v1845_v28  ;;  %v1850_v47 = vrot.slane %v1836_v48, 2 }
 0x240   :  { %7890 = vst [vmem:[#allocation127_spill] sm:$0xff] %v5155_v26  ;;  %v1813_v33 = vrot.slane %v1798_v2, 2  ;;  %v1920_v26 = vmul.f32 %v4847_v59, %v1919_v15 }
 0x242   :  { %v1814_v44 = vsel %vm218_vm3, %v7894_v36, %v1813_v33  ;;  %v1875_v36 = vmul.f32 %v4920_v40, %v5135_v50  ;;  %v1932_v9 = vrot.slane %v1920_v26, 2 }
 0x243   :  { %1895 = vrot.lane.b32.xlu1 %v1887_v10, %s4290_s23  ;;  %1815 = vrot.lane.b32.xlu2 %v1807_v32, %s4290_s23  ;;  %v1891_v10 = vrot.slane %v5162_v7, 2  ;;  %v1890_v32 = vrot.slane %v1876_v60, 2  ;;  %v1853_v7 = vsel %vm218_vm3, %v1850_v47, %v1852_v37 }
 0x244   :  { %v1888_v33 = vrot.slane %v1875_v36, 2 }
 0x245   :  { %1854 = vrot.lane.b32.xlu0 %v1846_v14, %s4290_s23  ;;  %v5175_v58 = vpop.permute.xlu1 %1558  ;;  %v5177_v51 = vpop.permute.xlu2 %1560  ;;  %v1892_v14 = vsel %vm218_vm3, %v1890_v32, %v1891_v10  ;;  %v1923_v32 = vmul.f32 %v4908_v21, %v1919_v15 }
 0x246   :  { %7891 = vst [vmem:[#allocation128_spill] sm:$0xff] %v5175_v58  ;;  %v1921_v58 = vmul.f32 %v4902_v5, %v1919_v15 }
 0x247   :  { %7892 = vst [vmem:[#allocation129_spill] sm:$0xff] %v5177_v51  ;;  %v5179_v28 = vpop.permute.xlu0 %1515  ;;  %v1835_v51 = vmul.f32 %v4908_v21, %v5112_v22 }
 0x248   :  { %7893 = vst [vmem:[#allocation130_spill] sm:$0xff] %v5179_v28  ;;  %v1933_v60 = vrot.slane %v1921_v58, 2 }
 0x249   :  { %v1849_v22 = vrot.slane %v1835_v51, 2  ;;  %v1878_v51 = vmul.f32 %v4944_v27, %v5135_v50 }
 0x24a   :  { %v1934_v37 = vsel %vm218_vm3, %v1932_v9, %v1933_v60  ;;  %v1968_v9 = vstv %s4087_s30  ;;  %s4040_s30 = sld [smem:[#allocation4 + $0x38]] }
 0x24b   :  { %1901 = vrot.lane.b32.xlu1 %v1892_v14, %s4290_s23  ;;  %1821 = vrot.lane.b32.xlu2 %v1814_v44, %s4290_s23  ;;  %v1851_v44 = vsel %vm218_vm3, %v1849_v22, %v1850_v47  ;;  %v1924_v14 = vmul.f32 %v4874_v25, %v1919_v15  ;;  %v1937_v47 = vrot.slane %v1923_v32, 2  ;;  %v1893_v22 = vrot.slane %v1878_v51, 2 }
 0x24c   :  { %v1973_v28 = vmul.f32 %v4977_v43, %v1968_v9 }
 0x24d   :  { %1860 = vrot.lane.b32.xlu0 %v1853_v7, %s4290_s23  ;;  %v5194_v2 = vpop.permute.xlu1 %1564  ;;  %v5196_v48 = vpop.permute.xlu2 %1566  ;;  %v1938_v36 = vrot.slane %v1924_v14, 2  ;;  %v1922_v14 = vmul.f32 %v4970_v63, %v1919_v15 }
 0x24e   :  { %7895 = vst [vmem:[#allocation131_spill] sm:$0xff] %v5194_v2  ;;  %v1974_v2 = vmul.f32 %v4944_v27, %v1968_v9 }
 0x24f   :  { %7896 = vst [vmem:[#allocation132_spill] sm:$0xff] %v5196_v48  ;;  %v5200_v41 = vpop.permute.xlu0 %1521  ;;  %v2007_v48 = vstv %s4088_s3  ;;  %s4044_s3 = sld [smem:[#allocation4 + $0x46]] }
 0x250   :  { %7897 = vst [vmem:[#allocation133_spill] sm:$0xff] %v5200_v41  ;;  %v1939_v41 = vsel %vm218_vm3, %v1937_v47, %v1938_v36  ;;  %v1935_v47 = vrot.slane %v1922_v14, 2  ;;  %v1925_v14 = vmul.f32 %v4878_v49, %v1919_v15 }
 0x253   :  { %1942 = vrot.lane.b32.xlu1 %v1934_v37, %s4290_s23  ;;  %1858 = vrot.lane.b32.xlu2 %v1851_v44, %s4290_s23  ;;  %v1889_v37 = vsel %vm218_vm3, %v1886_v13, %v1888_v33  ;;  %v5220_v44 = vmul.f32 %v4953_v3, %v1968_v9 }
 0x255   :  { %1899 = vrot.lane.b32.xlu0 %v1888_v33, %s4290_s23  ;;  %v5209_v7 = vpop.permute.xlu1 %1607  ;;  %v5211_v26 = vpop.permute.xlu2 %1609  ;;  %v1982_v13 = vrot.slane %v5220_v44, 4 }
 0x256   :  { %7898 = vst [vmem:[#allocation134_spill] sm:$0xff] %v5209_v7 }
 0x257   :  { %7899 = vst [vmem:[#allocation135_spill] sm:$0xff] %v5211_v26  ;;  %v5213_v58 = vpop.permute.xlu0 %1562  ;;  %v2095_v26 = vstv %s4090_s5  ;;  %s4109_s5 = sld [smem:[#allocation4 + $0xc]] }
 0x258   :  { %7900 = vst [vmem:[#allocation136_spill] sm:$0xff] %v5213_v58  ;;  %v1969_v58 = vmul.f32 %v4961_v61, %v1968_v9 }
 0x25a   :  { %v1981_v33 = vrot.slane %v1969_v58, 4 }
 0x25b   :  { %1948 = vrot.lane.b32.xlu1 %v1939_v41, %s4290_s23  ;;  %1897 = vrot.lane.b32.xlu2 %v1889_v37, %s4290_s23  ;;  %v1894_v37 = vsel %vm218_vm3, %v1891_v10, %v1893_v22  ;;  %v1989_v10 = vrot.slane %v1974_v2, 4  ;;  %v1972_v2 = vmul.f32 %v4883_v20, %v1968_v9 }
 0x25c   :  { %v1983_v41 = vsel %vm355_vm4, %v1981_v33, %v1982_v13  ;;  %v1987_v33 = vrot.slane %v1973_v28, 4 }
 0x25d   :  { %1905 = vrot.lane.b32.xlu0 %v1893_v22, %s4290_s23  ;;  %v5226_v50 = vpop.permute.xlu1 %1613  ;;  %v5228_v32 = vpop.permute.xlu2 %1646  ;;  %v1936_v22 = vsel %vm218_vm3, %v1933_v60, %v1935_v47 }
 0x25e   :  { %7901 = vst [vmem:[#allocation137_spill] sm:$0xff] %v5226_v50  ;;  %v5252_v50 = vmul.f32 %v4874_v25, %v2007_v48 }
 0x25f   :  { %7902 = vst [vmem:[#allocation138_spill] sm:$0xff] %v5228_v32  ;;  %v5231_v51 = vpop.permute.xlu0 %1568  ;;  %v1940_v32 = vrot.slane %v1925_v14, 2 }
 0x260   :  { %7903 = vst [vmem:[#allocation139_spill] sm:$0xff] %v5231_v51  ;;  %v2026_v14 = vrot.slane %v5252_v50, 4  ;;  %v2009_v50 = vmul.f32 %v4902_v5, %v2007_v48 }
 0x263   :  { %1991 = vrot.lane.b32.xlu1 %v1983_v41, %s4290_s23  ;;  %1903 = vrot.lane.b32.xlu2 %v1894_v37, %s4290_s23  ;;  %v1990_v41 = vsel %vm355_vm4, %v1987_v33, %v1989_v10  ;;  %v2011_v37 = vmul.f32 %v4908_v21, %v2007_v48  ;;  %v1986_v10 = vrot.slane %v1972_v2, 4 }
 0x265   :  { %1946 = vrot.lane.b32.xlu0 %v1935_v47, %s4290_s23  ;;  %v5241_v51 = vpop.permute.xlu1 %1650  ;;  %v5243_v44 = vpop.permute.xlu2 %1652  ;;  %v2025_v47 = vrot.slane %v2011_v37, 4 }
 0x266   :  { %7904 = vst [vmem:[#allocation140_spill] sm:$0xff] %v5241_v51 }
 0x267   :  { %7905 = vst [vmem:[#allocation141_spill] sm:$0xff] %v5243_v44  ;;  %v5245_v58 = vpop.permute.xlu0 %1611  ;;  %v2048_v44 = vstv %s4089_s4  ;;  %s4048_s4 = sld [smem:[#allocation4 + $0x54]] }
 0x268   :  { %7906 = vst [vmem:[#allocation142_spill] sm:$0xff] %v5245_v58  ;;  %v1941_v58 = vsel %vm218_vm3, %v1938_v36, %v1940_v32  ;;  %v5269_v51 = vmul.f32 %v4920_v40, %v2048_v44  ;;  %v2010_v36 = vmul.f32 %v4970_v63, %v2007_v48 }
 0x26b   :  { %1997 = vrot.lane.b32.xlu1 %v1990_v41, %s4290_s23  ;;  %1944 = vrot.lane.b32.xlu2 %v1936_v22, %s4290_s23  ;;  %v2027_v41 = vsel %vm355_vm4, %v2025_v47, %v2026_v14  ;;  %v2050_v22 = vmul.f32 %v4953_v3, %v2048_v44 }
 0x26d   :  { %1952 = vrot.lane.b32.xlu0 %v1940_v32, %s4290_s23  ;;  %v5257_v28 = vpop.permute.xlu1 %1675  ;;  %v5259_v15 = vpop.permute.xlu2 %1677  ;;  %v2062_v47 = vrot.slane %v2050_v22, 4 }
 0x26e   :  { %7907 = vst [vmem:[#allocation143_spill] sm:$0xff] %v5257_v28  ;;  %v1988_v28 = vsel %vm355_vm4, %v1986_v10, %v1987_v33  ;;  %v2021_v10 = vrot.slane %v2009_v50, 4 }
 0x26f   :  { %7908 = vst [vmem:[#allocation144_spill] sm:$0xff] %v5259_v15  ;;  %v5262_v60 = vpop.permute.xlu0 %1648  ;;  %v1971_v15 = vmul.f32 %v4920_v40, %v1968_v9  ;;  %v7758_v9 = vrot.slane %v5269_v51, 4 }
 0x270   :  { %7909 = vst [vmem:[#allocation145_spill] sm:$0xff] %v5262_v60 }
 0x271   :  { %v1984_v33 = vrot.slane %v1971_v15, 4  ;;  %v2065_v60 = vsel %vm355_vm4, %v2062_v47, %v7758_v9 }
 0x273   :  { %2034 = vrot.lane.b32.xlu1 %v2027_v41, %s4290_s23  ;;  %1950 = vrot.lane.b32.xlu2 %v1941_v58, %s4290_s23  ;;  %v2023_v41 = vrot.slane %v2010_v36, 4  ;;  %v2053_v58 = vmul.f32 %v4977_v43, %v2048_v44  ;;  %v2049_v36 = vmul.f32 %v4961_v61, %v2048_v44 }
 0x275   :  { %1995 = vrot.lane.b32.xlu0 %v1988_v28, %s4290_s23  ;;  %v5278_v32 = vpop.permute.xlu1 %1698  ;;  %v5280_v37 = vpop.permute.xlu2 %1700  ;;  %v1985_v28 = vsel %vm355_vm4, %v1982_v13, %v1984_v33  ;;  %v2024_v22 = vsel %vm355_vm4, %v2021_v10, %v2023_v41  ;;  %v2067_v33 = vrot.slane %v2053_v58, 4  ;;  %v2061_v41 = vrot.slane %v2049_v36, 4 }
 0x276   :  { %7910 = vst [vmem:[#allocation146_spill] sm:$0xff] %v5278_v32  ;;  %v5291_v32 = vmul.f32 %v4944_v27, %v2048_v44  ;;  %v2052_v58 = vmul.f32 %v4883_v20, %v2048_v44  ;;  %v2096_v44 = vmul.f32 %v4847_v59, %v2095_v26 }
 0x277   :  { %7911 = vst [vmem:[#allocation147_spill] sm:$0xff] %v5280_v37  ;;  %v5282_v2 = vpop.permute.xlu0 %1673  ;;  %v2008_v37 = vmul.f32 %v4847_v59, %v2007_v48  ;;  %v2063_v7 = vsel %vm355_vm4, %v2061_v41, %v2062_v47 }
 0x278   :  { %7912 = vst [vmem:[#allocation148_spill] sm:$0xff] %v5282_v2  ;;  %v2069_v9 = vrot.slane %v5291_v32, 4 }
 0x279   :  { %v2020_v2 = vrot.slane %v2008_v37, 4 }
 0x27b   :  { %2073 = vrot.lane.b32.xlu1 %v2065_v60, %s4290_s23  ;;  %1993 = vrot.lane.b32.xlu2 %v1985_v28, %s4290_s23  ;;  %v2097_v60 = vmul.f32 %v4902_v5, %v2095_v26  ;;  %v2070_v28 = vsel %vm355_vm4, %v2067_v33, %v2069_v9 }
 0x27d   :  { %2032 = vrot.lane.b32.xlu0 %v2024_v22, %s4290_s23  ;;  %v5298_v15 = vpop.permute.xlu1 %1704  ;;  %v5300_v50 = vpop.permute.xlu2 %1729  ;;  %v2022_v22 = vsel %vm355_vm4, %v2020_v2, %v2021_v10  ;;  %v2109_v10 = vrot.slane %v2097_v60, 4 }
 0x27e   :  { %7913 = vst [vmem:[#allocation149_spill] sm:$0xff] %v5298_v15  ;;  %v5310_v15 = vmul.f32 %v4970_v63, %v2095_v26 }
 0x27f   :  { %7914 = vst [vmem:[#allocation150_spill] sm:$0xff] %v5300_v50  ;;  %v5303_v13 = vpop.permute.xlu0 %1679  ;;  %v2013_v50 = vmul.f32 %v4878_v49, %v2007_v48 }
 0x280   :  { %7915 = vst [vmem:[#allocation151_spill] sm:$0xff] %v5303_v13  ;;  %v2111_v36 = vrot.slane %v5310_v15, 4  ;;  %v2066_v13 = vrot.slane %v2052_v58, 4 }
 0x281   :  { %v2028_v48 = vrot.slane %v2013_v50, 4 }
 0x282   :  { %v2112_v47 = vsel %vm355_vm4, %v2109_v10, %v2111_v36 }
 0x283   :  { %2079 = vrot.lane.b32.xlu1 %v2070_v28, %s4290_s23  ;;  %2030 = vrot.lane.b32.xlu2 %v2022_v22, %s4290_s23  ;;  %v2029_v41 = vsel %vm355_vm4, %v2026_v14, %v2028_v48  ;;  %v5329_v28 = vmul.f32 %v4878_v49, %v2095_v26  ;;  %v2068_v22 = vsel %vm355_vm4, %v2066_v13, %v2067_v33  ;;  %v2108_v48 = vrot.slane %v2096_v44, 4 }
 0x284   :  { %v2144_v13 = vstv %s4091_s6  ;;  %s5880_s6 = sld [smem:[#allocation4]] }
 0x285   :  { %2071 = vrot.lane.b32.xlu0 %v2063_v7, %s4290_s23  ;;  %v5317_v32 = vpop.permute.xlu1 %1733  ;;  %v5319_v37 = vpop.permute.xlu2 %1735  ;;  %v2100_v7 = vmul.f32 %v4874_v25, %v2095_v26  ;;  %v2116_v58 = vrot.slane %v5329_v28, 4 }
 0x286   :  { %7916 = vst [vmem:[#allocation152_spill] sm:$0xff] %v5317_v32 }
 0x287   :  { %7917 = vst [vmem:[#allocation153_spill] sm:$0xff] %v5319_v37  ;;  %v5322_v2 = vpop.permute.xlu0 %1702  ;;  %v2114_v60 = vrot.slane %v2100_v7, 4  ;;  %v2099_v7 = vmul.f32 %v4908_v21, %v2095_v26 }
 0x288   :  { %7918 = vst [vmem:[#allocation154_spill] sm:$0xff] %v5322_v2 }
 0x289   :  { %v2117_v33 = vsel %vm355_vm4, %v2114_v60, %v2116_v58  ;;  %v2113_v32 = vrot.slane %v2099_v7, 4 }
 0x28b   :  { %2120 = vrot.lane.b32.xlu1 %v2112_v47, %s4290_s23  ;;  %2036 = vrot.lane.b32.xlu2 %v2029_v41, %s4290_s23  ;;  %v2146_v47 = vmul.f32 %v4953_v3, %v2144_v13  ;;  %v2147_v41 = vmul.f32 %v4920_v40, %v2144_v13  ;;  %v2115_v26 = vsel %vm355_vm4, %v2113_v32, %v2114_v60 }
 0x28d   :  { %2077 = vrot.lane.b32.xlu0 %v2068_v22, %s4290_s23  ;;  %v5336_v15 = vpop.permute.xlu1 %1739  ;;  %v5338_v50 = vpop.permute.xlu2 %1766  ;;  %v2110_v22 = vsel %vm355_vm4, %v2108_v48, %v2109_v10  ;;  %v2160_v37 = vrot.slane %v2147_v41, 6  ;;  %v2183_v10 = vstv %s4092_s7  ;;  %v2145_v41 = vmul.f32 %v4961_v61, %v2144_v13  ;;  %s5889_s7 = sld [smem:[#allocation4 + $0xe]] }
 0x28e   :  { %7919 = vst [vmem:[#allocation155_spill] sm:$0xff] %v5336_v15  ;;  %v2158_v15 = vrot.slane %v2146_v47, 6  ;;  %v2188_v32 = vmul.f32 %v4874_v25, %v2183_v10  ;;  %v2189_v60 = vmul.f32 %v4878_v49, %v2183_v10 }
 0x28f   :  { %7920 = vst [vmem:[#allocation156_spill] sm:$0xff] %v5338_v50  ;;  %v5340_v14 = vpop.permute.xlu0 %1731  ;;  %v7922_v50 = vrot.slane %v5269_v51, 4  ;;  %v2185_v51 = vmul.f32 %v4902_v5, %v2183_v10 }
 0x290   :  { %7921 = vst [vmem:[#allocation157_spill] sm:$0xff] %v5340_v14  ;;  %v2161_v48 = vsel %vm492_vm5, %v2158_v15, %v2160_v37  ;;  %v2204_v49 = vrot.slane %v2189_v60, 6 }
 0x291   :  { %v2197_v7 = vrot.slane %v2185_v51, 6 }
 0x293   :  { %2126 = vrot.lane.b32.xlu1 %v2117_v33, %s4290_s23  ;;  %2075 = vrot.lane.b32.xlu2 %v7922_v50, %s4290_s23  ;;  %v2184_v33 = vmul.f32 %v4847_v59, %v2183_v10 }
 0x295   :  { %2118 = vrot.lane.b32.xlu0 %v2110_v22, %s4290_s23  ;;  %v5353_v28 = vpop.permute.xlu1 %1770  ;;  %v5355_v44 = vpop.permute.xlu2 %1772  ;;  %v2196_v37 = vrot.slane %v2184_v33, 6 }
 0x296   :  { %7923 = vst [vmem:[#allocation158_spill] sm:$0xff] %v5353_v28 }
 0x297   :  { %7924 = vst [vmem:[#allocation159_spill] sm:$0xff] %v5355_v44  ;;  %v5357_v14 = vpop.permute.xlu0 %1737  ;;  %v2198_v28 = vsel %vm492_vm5, %v2196_v37, %v2197_v7  ;;  %v2202_v37 = vrot.slane %v2188_v32, 6 }
 0x298   :  { %7925 = vst [vmem:[#allocation160_spill] sm:$0xff] %v5357_v14  ;;  %v2157_v14 = vrot.slane %v2145_v41, 6 }
 0x29b   :  { %2169 = vrot.lane.b32.xlu1 %v2161_v48, %s4290_s23  ;;  %2081 = vrot.lane.b32.xlu2 %v2069_v9, %s4290_s23  ;;  %v2159_v9 = vsel %vm492_vm5, %v2157_v14, %v2158_v15  ;;  %v2149_v48 = vmul.f32 %v4977_v43, %v2144_v13 }
 0x29d   :  { %2124 = vrot.lane.b32.xlu0 %v2115_v26, %s4290_s23  ;;  %v5366_v50 = vpop.permute.xlu1 %1776  ;;  %v5368_v47 = vpop.permute.xlu2 %1815  ;;  %v2150_v26 = vmul.f32 %v4944_v27, %v2144_v13  ;;  %v2163_v15 = vrot.slane %v2149_v48, 6  ;;  %v2224_v48 = vstv %s4093_s8  ;;  %s5892_s8 = sld [smem:[#allocation4 + $0x1c]] }
 0x29e   :  { %7926 = vst [vmem:[#allocation161_spill] sm:$0xff] %v5366_v50 }
 0x29f   :  { %7927 = vst [vmem:[#allocation162_spill] sm:$0xff] %v5368_v47  ;;  %v5371_v22 = vpop.permute.xlu0 %1768  ;;  %v2165_v14 = vrot.slane %v2150_v26, 6 }
 0x2a0   :  { %7928 = vst [vmem:[#allocation163_spill] sm:$0xff] %v5371_v22  ;;  %v2148_v22 = vmul.f32 %v4883_v20, %v2144_v13 }
 0x2a3   :  { %2206 = vrot.lane.b32.xlu1 %v2198_v28, %s4290_s23  ;;  %2122 = vrot.lane.b32.xlu2 %v2111_v36, %s4290_s23  ;;  %v2205_v28 = vsel %vm492_vm5, %v2202_v37, %v2204_v49  ;;  %v2166_v36 = vsel %vm492_vm5, %v2163_v15, %v2165_v14  ;;  %v2162_v49 = vrot.slane %v2148_v22, 6  ;;  %v2227_v14 = vmul.f32 %v4883_v20, %v2224_v48 }
 0x2a5   :  { %2167 = vrot.lane.b32.xlu0 %v2159_v9, %s4290_s23  ;;  %v5382_v33 = vpop.permute.xlu1 %1819  ;;  %v5384_v51 = vpop.permute.xlu2 %1821  ;;  %v2187_v9 = vmul.f32 %v4908_v21, %v2183_v10 }
 0x2a6   :  { %7929 = vst [vmem:[#allocation164_spill] sm:$0xff] %v5382_v33 }
 0x2a7   :  { %7930 = vst [vmem:[#allocation165_spill] sm:$0xff] %v5384_v51  ;;  %v5386_v41 = vpop.permute.xlu0 %1774  ;;  %v2201_v26 = vrot.slane %v2187_v9, 6  ;;  %v2249_v9 = vstv %s4094_s9  ;;  %s5907_s9 = sld [smem:[#allocation4 + $0x3d]] }
 0x2a8   :  { %7931 = vst [vmem:[#allocation166_spill] sm:$0xff] %v5386_v41 }
 0x2ab   :  { %2212 = vrot.lane.b32.xlu1 %v2205_v28, %s4290_s23  ;;  %2128 = vrot.lane.b32.xlu2 %v2116_v58, %s4290_s23  ;;  %v2164_v58 = vsel %vm492_vm5, %v2162_v49, %v2163_v15  ;;  %v2186_v28 = vmul.f32 %v4970_v63, %v2183_v10  ;;  %v2251_v10 = vmul.f32 %v4902_v5, %v2249_v9 }
 0x2ac   :  { %v2225_v5 = vmul.f32 %v4961_v61, %v2224_v48 }
 0x2ad   :  { %2173 = vrot.lane.b32.xlu0 %v2166_v36, %s4290_s23  ;;  %v5395_v44 = vpop.permute.xlu1 %1856  ;;  %v5397_v32 = vpop.permute.xlu2 %1858  ;;  %v2203_v36 = vsel %vm492_vm5, %v2201_v26, %v2202_v37  ;;  %v2199_v50 = vrot.slane %v2186_v28, 6  ;;  %v2226_v37 = vmul.f32 %v4953_v3, %v2224_v48 }
 0x2ae   :  { %7932 = vst [vmem:[#allocation167_spill] sm:$0xff] %v5395_v44  ;;  %v5523_v44 = vld [vmem:[#allocation2 + $0x18] sm:$0xff] }
 0x2af   :  { %7933 = vst [vmem:[#allocation168_spill] sm:$0xff] %v5397_v32  ;;  %v5399_v60 = vpop.permute.xlu0 %1817  ;;  %v2200_v15 = vsel %vm492_vm5, %v2197_v7, %v2199_v50  ;;  %v2432_v32 = vstv %s4099_s15  ;;  %s6258_s15 = sld [smem:[#allocation4 + $0x15]] }
 0x2b0   :  { %7934 = vst [vmem:[#allocation169_spill] sm:$0xff] %v5399_v60 }
 0x2b3   :  { %2237 = vrot.lane.b32.xlu1 %v2227_v14, %s4291_s10  ;;  %2171 = vrot.lane.b32.xlu2 %v2164_v58, %s4290_s23  ;;  %v2276_v58 = vstv %s4095_s11  ;;  %s5983_s11 = sld [smem:[#allocation4 + $0x13]] }
 0x2b4   :  { %v2277_v28 = vmul.f32 %v4961_v61, %v2276_v58 }
 0x2b5   :  { %2210 = vrot.lane.b32.xlu0 %v2203_v36, %s4290_s23  ;;  %v5408_v13 = vpop.permute.xlu1 %1895  ;;  %v5410_v41 = vpop.permute.xlu2 %1897  ;;  %v2250_v36 = vmul.f32 %v4847_v59, %v2249_v9 }
 0x2b6   :  { %7935 = vst [vmem:[#allocation170_spill] sm:$0xff] %v5408_v13 }
 0x2b7   :  { %7936 = vst [vmem:[#allocation171_spill] sm:$0xff] %v5410_v41  ;;  %v5412_v22 = vpop.permute.xlu0 %1854 }
 0x2b8   :  { %7937 = vst [vmem:[#allocation172_spill] sm:$0xff] %v5412_v22 }
 0x2bb   :  { %2260 = vrot.lane.b32.xlu1 %v2251_v10, %s4291_s10  ;;  %2208 = vrot.lane.b32.xlu2 %v2200_v15, %s4290_s23  ;;  %v2228_v15 = vmul.f32 %v4977_v43, %v2224_v48  ;;  %v2252_v48 = vmul.f32 %v4908_v21, %v2249_v9  ;;  %s4107_s23 = sld [smem:[#allocation4 + $0x5]] }
 0x2bd   :  { %2235 = vrot.lane.b32.xlu0 %v2226_v37, %s4291_s10  ;;  %v5420_v26 = vpop.permute.xlu1 %1901  ;;  %v5422_v49 = vpop.permute.xlu2 %1903  ;;  %v2280_v37 = vmul.f32 %v4883_v20, %v2276_v58 }
 0x2be   :  { %7938 = vst [vmem:[#allocation173_spill] sm:$0xff] %v5420_v26 }
 0x2bf   :  { %7939 = vst [vmem:[#allocation174_spill] sm:$0xff] %v5422_v49  ;;  %v5424_v14 = vpop.permute.xlu0 %1860  ;;  %v2253_v49 = vmul.f32 %v4874_v25, %v2249_v9  ;;  %v2279_v25 = vmul.f32 %v4920_v40, %v2276_v58  ;;  %v2352_v9 = vstv %s4097_s13  ;;  %s6213_s13 = sld [smem:[#allocation4 + $0x7]] }
 0x2c0   :  { %7940 = vst [vmem:[#allocation175_spill] sm:$0xff] %v5424_v14  ;;  %v5468_v40 = vmul.f32 %v4953_v3, %v2352_v9 }
 0x2c3   :  { %2289 = vrot.lane.b32.xlu1 %v2277_v28, %s4291_s10  ;;  %2233 = vrot.lane.b32.xlu2 %v2225_v5, %s4291_s10 }
 0x2c5   :  { %2258 = vrot.lane.b32.xlu0 %v2250_v36, %s4291_s10  ;;  %v5432_v50 = vpop.permute.xlu1 %1942  ;;  %v5434_v7 = vpop.permute.xlu2 %1944  ;;  %v2313_v36 = vstv %s4096_s12  ;;  %s6050_s12 = sld [smem:[#allocation4 + $0x44]] }
 0x2c6   :  { %7941 = vst [vmem:[#allocation176_spill] sm:$0xff] %v5432_v50  ;;  %v2317_v41 = vmul.f32 %v4908_v21, %v2313_v36  ;;  %v2282_v50 = vmul.f32 %v4944_v27, %v2276_v58 }
 0x2c7   :  { %7942 = vst [vmem:[#allocation177_spill] sm:$0xff] %v5434_v7  ;;  %v5436_v10 = vpop.permute.xlu0 %1899  ;;  %v5450_v7 = vld [vmem:[#allocation3] sm:$0xff] }
 0x2c8   :  { %7943 = vst [vmem:[#allocation178_spill] sm:$0xff] %v5436_v10  ;;  %v2314_v20 = vmul.f32 %v5450_v7, %v2313_v36 }
 0x2cb   :  { %2295 = vrot.lane.b32.xlu1 %v2280_v37, %s4291_s10  ;;  %2239 = vrot.lane.b32.xlu2 %v2228_v15, %s4291_s10 }
 0x2cd   :  { %2264 = vrot.lane.b32.xlu0 %v2253_v49, %s4291_s10  ;;  %v5444_v59 = vpop.permute.xlu1 %1948  ;;  %v5446_v28 = vpop.permute.xlu2 %1950 }
 0x2ce   :  { %7944 = vst [vmem:[#allocation179_spill] sm:$0xff] %v5444_v59 }
 0x2cf   :  { %7945 = vst [vmem:[#allocation180_spill] sm:$0xff] %v5446_v28  ;;  %v5448_v5 = vpop.permute.xlu0 %1905 }
 0x2d0   :  { %7946 = vst [vmem:[#allocation181_spill] sm:$0xff] %v5448_v5  ;;  %v2278_v5 = vmul.f32 %v4953_v3, %v2276_v58  ;;  %v2281_v3 = vmul.f32 %v4977_v43, %v2276_v58 }
 0x2d3   :  { %2326 = vrot.lane.b32.xlu1 %v2314_v20, %s4291_s10  ;;  %2262 = vrot.lane.b32.xlu2 %v2252_v48, %s4291_s10  ;;  %v2353_v20 = vmul.f32 %v4961_v61, %v2352_v9  ;;  %v2357_v61 = vmul.f32 %v4977_v43, %v2352_v9 }
 0x2d5   :  { %2293 = vrot.lane.b32.xlu0 %v2279_v25, %s4291_s10  ;;  %v5458_v49 = vpop.permute.xlu1 %1991  ;;  %v5460_v37 = vpop.permute.xlu2 %1993  ;;  %v2365_v10 = vrot.slane %v2353_v20, 2  ;;  %v2371_v13 = vrot.slane %v2357_v61, 2  ;;  %v5510_v61 = vld [vmem:[#allocation3 + $0x20] sm:$0xff] }
 0x2d6   :  { %7947 = vst [vmem:[#allocation182_spill] sm:$0xff] %v5458_v49  ;;  %v5590_v49 = vld [vmem:[#allocation3 + $0x10] sm:$0x3f] }
 0x2d7   :  { %7948 = vst [vmem:[#allocation183_spill] sm:$0xff] %v5460_v37  ;;  %v5462_v15 = vpop.permute.xlu0 %1946  ;;  %v2479_v37 = vstv %s4100_s16  ;;  %s6269_s16 = sld [smem:[#allocation4 + $0x23]] }
 0x2d8   :  { %7949 = vst [vmem:[#allocation184_spill] sm:$0xff] %v5462_v15  ;;  %v7759_v15 = vrot.slane %v5468_v40, 2 }
 0x2db   :  { %2332 = vrot.lane.b32.xlu1 %v2317_v41, %s4291_s10  ;;  %2291 = vrot.lane.b32.xlu2 %v2278_v5, %s4291_s10  ;;  %v2316_v41 = vmul.f32 %v4970_v63, %v2313_v36  ;;  %v2358_v5 = vmul.f32 %v4944_v27, %v2352_v9  ;;  %v5502_v27 = vld [vmem:[#allocation3 + $0x28] sm:$0x3f] }
 0x2dd   :  { %2299 = vrot.lane.b32.xlu0 %v2282_v50, %s4291_s10  ;;  %v5474_v48 = vpop.permute.xlu1 %1997  ;;  %v5476_v25 = vpop.permute.xlu2 %2030  ;;  %v2367_v50 = vsel %vm218_vm3, %v2365_v10, %v7759_v15  ;;  %v2373_v59 = vrot.slane %v2358_v5, 2  ;;  %v5500_v10 = vstv %s4098_s14  ;;  %s6236_s14 = sld [smem:[#allocation4 + $0x1a]] }
 0x2de   :  { %7950 = vst [vmem:[#allocation185_spill] sm:$0xff] %v5474_v48  ;;  %v5514_v5 = vmul.f32 %v5510_v61, %v5500_v10  ;;  %v2392_v48 = vmul.f32 %v5450_v7, %v5500_v10 }
 0x2df   :  { %7951 = vst [vmem:[#allocation186_spill] sm:$0xff] %v5476_v25  ;;  %v5478_v21 = vpop.permute.xlu0 %1952 }
 0x2e0   :  { %7952 = vst [vmem:[#allocation187_spill] sm:$0xff] %v5478_v21  ;;  %v5497_v21 = vld [vmem:[#allocation3 + $0x8] sm:$0xff]  ;;  %v7760_v33 = vrot.slane %v5514_v5, 2 }
 0x2e1   :  { %v2315_v43 = vmul.f32 %v5497_v21, %v2313_v36 }
 0x2e3   :  { %2375 = vrot.lane.b32.xlu1 %v2367_v50, %s4291_s10  ;;  %2297 = vrot.lane.b32.xlu2 %v2281_v3, %s4291_s10  ;;  %v2319_v3 = vmul.f32 %v5502_v27, %v2313_v36  ;;  %v5506_v50 = vld [vmem:[#allocation3 + $0x18] sm:$0xff] }
 0x2e4   :  { %v2395_v15 = vmul.f32 %v5506_v50, %v5500_v10 }
 0x2e5   :  { %2330 = vrot.lane.b32.xlu0 %v2316_v41, %s4291_s10  ;;  %v5491_v20 = vpop.permute.xlu1 %2034  ;;  %v5493_v58 = vpop.permute.xlu2 %2036  ;;  %v2374_v41 = vsel %vm218_vm3, %v2371_v13, %v2373_v59 }
 0x2e6   :  { %7953 = vst [vmem:[#allocation188_spill] sm:$0xff] %v5491_v20  ;;  %v2409_v20 = vrot.slane %v2395_v15, 2 }
 0x2e7   :  { %7954 = vst [vmem:[#allocation189_spill] sm:$0xff] %v5493_v58  ;;  %v5495_v26 = vpop.permute.xlu0 %1995 }
 0x2e8   :  { %7955 = vst [vmem:[#allocation190_spill] sm:$0xff] %v5495_v26  ;;  %v2356_v26 = vmul.f32 %v5523_v44, %v2352_v9 }
 0x2ea   :  { %v2370_v14 = vrot.slane %v2356_v26, 2 }
 0x2eb   :  { %2381 = vrot.lane.b32.xlu1 %v2374_v41, %s4291_s10  ;;  %2328 = vrot.lane.b32.xlu2 %v2315_v43, %s4291_s10  ;;  %v2318_v41 = vmul.f32 %v5510_v61, %v2313_v36  ;;  %v2411_v43 = vsel %vm218_vm3, %v2409_v20, %v7760_v33  ;;  %v2393_v36 = vmul.f32 %v5497_v21, %v5500_v10 }
 0x2ec   :  { %v2372_v26 = vsel %vm218_vm3, %v2370_v14, %v2371_v13  ;;  %v2394_v20 = vmul.f32 %v4970_v63, %v5500_v10 }
 0x2ed   :  { %2336 = vrot.lane.b32.xlu0 %v2319_v3, %s4291_s10  ;;  %v5519_v28 = vpop.permute.xlu1 %2073  ;;  %v5521_v59 = vpop.permute.xlu2 %2075  ;;  %v5533_v3 = vld [vmem:[#allocation2 + $0x8] sm:$0xff] }
 0x2ee   :  { %7956 = vst [vmem:[#allocation191_spill] sm:$0xff] %v5519_v28  ;;  %v2434_v28 = vmul.f32 %v5533_v3, %v2432_v32 }
 0x2ef   :  { %7957 = vst [vmem:[#allocation192_spill] sm:$0xff] %v5521_v59  ;;  %v5526_v58 = vpop.permute.xlu0 %2032  ;;  %v5536_v59 = vld [vmem:[#allocation2 + $0x10] sm:$0x3f] }
 0x2f0   :  { %7958 = vst [vmem:[#allocation193_spill] sm:$0xff] %v5526_v58  ;;  %v5539_v2 = vmul.f32 %v5536_v59, %v2432_v32  ;;  %v2355_v15 = vmul.f32 %v5536_v59, %v2352_v9  ;;  %v2446_v9 = vrot.slane %v2434_v28, 2 }
 0x2f2   :  { %v7761_v13 = vrot.slane %v5539_v2, 2  ;;  %v2368_v14 = vrot.slane %v2355_v15, 2 }
 0x2f3   :  { %2418 = vrot.lane.b32.xlu1 %v2411_v43, %s4291_s10  ;;  %2334 = vrot.lane.b32.xlu2 %v2318_v41, %s4291_s10  ;;  %v2405_v43 = vrot.slane %v2393_v36, 2  ;;  %v2407_v41 = vrot.slane %v2394_v20, 2 }
 0x2f4   :  { %v2449_v63 = vsel %vm218_vm3, %v2446_v9, %v7761_v13  ;;  %v2404_v13 = vrot.slane %v2392_v48, 2  ;;  %v2397_v48 = vmul.f32 %v5502_v27, %v5500_v10 }
 0x2f5   :  { %2379 = vrot.lane.b32.xlu0 %v2372_v26, %s4291_s10  ;;  %v5550_v33 = vpop.permute.xlu1 %2079  ;;  %v5552_v58 = vpop.permute.xlu2 %2081  ;;  %v7962_v26 = vrot.slane %v5468_v40, 2  ;;  %v2408_v36 = vsel %vm218_vm3, %v2405_v43, %v2407_v41 }
 0x2f6   :  { %7959 = vst [vmem:[#allocation194_spill] sm:$0xff] %v5550_v33  ;;  %v2412_v10 = vrot.slane %v2397_v48, 2 }
 0x2f7   :  { %7960 = vst [vmem:[#allocation195_spill] sm:$0xff] %v5552_v58  ;;  %v5554_v25 = vpop.permute.xlu0 %2071  ;;  %v2369_v33 = vsel %vm218_vm3, %v7962_v26, %v2368_v14  ;;  %v5565_v58 = vld [vmem:[#allocation2 + $0x20] sm:$0xff] }
 0x2f8   :  { %7961 = vst [vmem:[#allocation196_spill] sm:$0xff] %v5554_v25  ;;  %v2437_v28 = vmul.f32 %v5565_v58, %v2432_v32  ;;  %v5568_v25 = vld [vmem:[#allocation2 + $0x28] sm:$0x3f]  ;;  %v5581_v14 = vld [vmem:[#allocation2] sm:$0xff] }
 0x2f9   :  { %v5571_v15 = vmul.f32 %v5568_v25, %v2432_v32  ;;  %v2433_v26 = vmul.f32 %v5581_v14, %v2432_v32 }
 0x2fa   :  { %v2451_v51 = vrot.slane %v2437_v28, 2 }
 0x2fb   :  { %2457 = vrot.lane.b32.xlu1 %v2449_v63, %s4291_s10  ;;  %2377 = vrot.lane.b32.xlu2 %v2369_v33, %s4291_s10  ;;  %v2453_v41 = vrot.slane %v5571_v15, 2  ;;  %v2445_v63 = vrot.slane %v2433_v26, 2  ;;  %v2406_v33 = vsel %vm218_vm3, %v2404_v13, %v2405_v43  ;;  %v2436_v15 = vmul.f32 %v5523_v44, %v2432_v32 }
 0x2fd   :  { %2416 = vrot.lane.b32.xlu0 %v2408_v36, %s4291_s10  ;;  %v5577_v40 = vpop.permute.xlu1 %2120  ;;  %v5579_v20 = vpop.permute.xlu2 %2122  ;;  %v2454_v36 = vsel %vm218_vm3, %v2451_v51, %v2453_v41  ;;  %v2447_v28 = vsel %vm218_vm3, %v2445_v63, %v2446_v9  ;;  %v2450_v47 = vrot.slane %v2436_v15, 2  ;;  %v7969_v63 = vrot.slane %v5514_v5, 2 }
 0x2fe   :  { %7963 = vst [vmem:[#allocation197_spill] sm:$0xff] %v5577_v40  ;;  %v2481_v40 = vmul.f32 %v5497_v21, %v2479_v37 }
 0x2ff   :  { %7964 = vst [vmem:[#allocation198_spill] sm:$0xff] %v5579_v20  ;;  %v5584_v22 = vpop.permute.xlu0 %2077  ;;  %v5593_v20 = vmul.f32 %v5590_v49, %v2479_v37  ;;  %v2452_v32 = vsel %vm218_vm3, %v2450_v47, %v2451_v51  ;;  %v2528_v47 = vstv %s4101_s17  ;;  %s6325_s17 = sld [smem:[#allocation4 + $0x4b]] }
 0x300   :  { %7965 = vst [vmem:[#allocation199_spill] sm:$0xff] %v5584_v22  ;;  %v2493_v22 = vrot.slane %v2481_v40, 2  ;;  %v2480_v40 = vmul.f32 %v5450_v7, %v2479_v37 }
 0x301   :  { %v2495_v60 = vrot.slane %v5593_v20, 2 }
 0x303   :  { %2463 = vrot.lane.b32.xlu1 %v2454_v36, %s4291_s10  ;;  %2414 = vrot.lane.b32.xlu2 %v2406_v33, %s4291_s10  ;;  %v2496_v9 = vsel %vm218_vm3, %v2493_v22, %v2495_v60  ;;  %v2413_v33 = vsel %vm218_vm3, %v7969_v63, %v2412_v10  ;;  %v2484_v36 = vmul.f32 %v5510_v61, %v2479_v37  ;;  %v2492_v63 = vrot.slane %v2480_v40, 2 }
 0x305   :  { %2455 = vrot.lane.b32.xlu0 %v2447_v28, %s4291_s10  ;;  %v5601_v13 = vpop.permute.xlu1 %2126  ;;  %v5603_v43 = vpop.permute.xlu2 %2128  ;;  %v5615_v28 = vmul.f32 %v5502_v27, %v2479_v37  ;;  %v2498_v15 = vrot.slane %v2484_v36, 2  ;;  %v2483_v36 = vmul.f32 %v5506_v50, %v2479_v37 }
 0x306   :  { %7966 = vst [vmem:[#allocation200_spill] sm:$0xff] %v5601_v13 }
 0x307   :  { %7967 = vst [vmem:[#allocation201_spill] sm:$0xff] %v5603_v43  ;;  %v5606_v26 = vpop.permute.xlu0 %2118  ;;  %v2500_v10 = vrot.slane %v5615_v28, 2 }
 0x308   :  { %7968 = vst [vmem:[#allocation202_spill] sm:$0xff] %v5606_v26  ;;  %v7973_v26 = vrot.slane %v5539_v2, 2 }
 0x309   :  { %v2501_v51 = vsel %vm218_vm3, %v2498_v15, %v2500_v10 }
 0x30b   :  { %2504 = vrot.lane.b32.xlu1 %v2496_v9, %s4291_s10  ;;  %2420 = vrot.lane.b32.xlu2 %v2413_v33, %s4291_s10  ;;  %v2530_v9 = vmul.f32 %v5533_v3, %v2528_v47  ;;  %v2531_v33 = vmul.f32 %v5536_v59, %v2528_v47 }
 0x30d   :  { %2461 = vrot.lane.b32.xlu0 %v2452_v32, %s4291_s10  ;;  %v5622_v20 = vpop.permute.xlu1 %2169  ;;  %v5624_v5 = vpop.permute.xlu2 %2171  ;;  %v2494_v32 = vsel %vm218_vm3, %v2492_v63, %v2493_v22  ;;  %v2542_v43 = vrot.slane %v2530_v9, 4  ;;  %v2544_v13 = vrot.slane %v2531_v33, 4  ;;  %v2567_v22 = vstv %s4102_s0  ;;  %s6399_s0 = sld [smem:[#allocation4 + $0x21]] }
 0x30e   :  { %7970 = vst [vmem:[#allocation203_spill] sm:$0xff] %v5622_v20  ;;  %v2569_v2 = vmul.f32 %v5497_v21, %v2567_v22  ;;  %v2529_v33 = vmul.f32 %v5581_v14, %v2528_v47  ;;  %v5857_v20 = vstv %s4109_s5  ;;  %s4129_s5 = sld [smem:[#allocation4 + $0x22]] }
 0x30f   :  { %7971 = vst [vmem:[#allocation204_spill] sm:$0xff] %v5624_v5  ;;  %v5626_v48 = vpop.permute.xlu0 %2124  ;;  %v2497_v5 = vrot.slane %v2483_v36, 2  ;;  %v2545_v63 = vsel %vm355_vm4, %v2542_v43, %v2544_v13  ;;  %v2838_v23 = vmul.f32 %v5533_v3, %v5857_v20 }
 0x310   :  { %7972 = vst [vmem:[#allocation205_spill] sm:$0xff] %v5626_v48  ;;  %v2581_v36 = vrot.slane %v2569_v2, 4 }
 0x311   :  { %v2499_v37 = vsel %vm218_vm3, %v2497_v5, %v2498_v15  ;;  %v2572_v5 = vmul.f32 %v5510_v61, %v2567_v22  ;;  %v2573_v15 = vmul.f32 %v5502_v27, %v2567_v22 }
 0x313   :  { %2510 = vrot.lane.b32.xlu1 %v2501_v51, %s4291_s10  ;;  %2459 = vrot.lane.b32.xlu2 %v7973_v26, %s4291_s10  ;;  %v2568_v51 = vmul.f32 %v5450_v7, %v2567_v22 }
 0x315   :  { %2502 = vrot.lane.b32.xlu0 %v2494_v32, %s4291_s10  ;;  %v5639_v28 = vpop.permute.xlu1 %2206  ;;  %v5641_v40 = vpop.permute.xlu2 %2208  ;;  %v2580_v13 = vrot.slane %v2568_v51, 4 }
 0x316   :  { %7974 = vst [vmem:[#allocation206_spill] sm:$0xff] %v5639_v28 }
 0x317   :  { %7975 = vst [vmem:[#allocation207_spill] sm:$0xff] %v5641_v40  ;;  %v5643_v48 = vpop.permute.xlu0 %2167  ;;  %v2541_v40 = vrot.slane %v2529_v33, 4  ;;  %v2582_v28 = vsel %vm355_vm4, %v2580_v13, %v2581_v36  ;;  %v2586_v13 = vrot.slane %v2572_v5, 4 }
 0x318   :  { %7976 = vst [vmem:[#allocation208_spill] sm:$0xff] %v5643_v48 }
 0x31b   :  { %2553 = vrot.lane.b32.xlu1 %v2545_v63, %s4291_s10  ;;  %2465 = vrot.lane.b32.xlu2 %v2453_v41, %s4291_s10  ;;  %v2543_v41 = vsel %vm355_vm4, %v2541_v40, %v2542_v43  ;;  %v2533_v63 = vmul.f32 %v5565_v58, %v2528_v47 }
 0x31d   :  { %2508 = vrot.lane.b32.xlu0 %v2499_v37, %s4291_s10  ;;  %v5652_v26 = vpop.permute.xlu1 %2212  ;;  %v5654_v9 = vpop.permute.xlu2 %2233  ;;  %v2534_v37 = vmul.f32 %v5568_v25, %v2528_v47  ;;  %v2547_v43 = vrot.slane %v2533_v63, 4 }
 0x31e   :  { %7977 = vst [vmem:[#allocation209_spill] sm:$0xff] %v5652_v26  ;;  %v2588_v26 = vrot.slane %v2573_v15, 4 }
 0x31f   :  { %7978 = vst [vmem:[#allocation210_spill] sm:$0xff] %v5654_v9  ;;  %v5657_v32 = vpop.permute.xlu0 %2173  ;;  %v2549_v40 = vrot.slane %v2534_v37, 4 }
 0x320   :  { %7979 = vst [vmem:[#allocation211_spill] sm:$0xff] %v5657_v32 }
 0x323   :  { %2590 = vrot.lane.b32.xlu1 %v2582_v28, %s4291_s10  ;;  %2506 = vrot.lane.b32.xlu2 %v2495_v60, %s4291_s10  ;;  %v2589_v28 = vsel %vm355_vm4, %v2586_v13, %v2588_v26  ;;  %v2550_v60 = vsel %vm355_vm4, %v2547_v43, %v2549_v40 }
 0x325   :  { %2551 = vrot.lane.b32.xlu0 %v2543_v41, %s4291_s10  ;;  %v5668_v51 = vpop.permute.xlu1 %2237  ;;  %v5670_v2 = vpop.permute.xlu2 %2239  ;;  %v2571_v41 = vmul.f32 %v5506_v50, %v2567_v22 }
 0x326   :  { %7980 = vst [vmem:[#allocation212_spill] sm:$0xff] %v5668_v51  ;;  %v2608_v51 = vstv %s4103_s1  ;;  %s6460_s1 = sld [smem:[#allocation4 + $0x52]] }
 0x327   :  { %7981 = vst [vmem:[#allocation213_spill] sm:$0xff] %v5670_v2  ;;  %v5672_v33 = vpop.permute.xlu0 %2210  ;;  %v2532_v2 = vmul.f32 %v5523_v44, %v2528_v47  ;;  %v2611_v15 = vmul.f32 %v5536_v59, %v2608_v51  ;;  %v2585_v63 = vrot.slane %v2571_v41, 4  ;;  %v2610_v47 = vmul.f32 %v5533_v3, %v2608_v51 }
 0x328   :  { %7982 = vst [vmem:[#allocation214_spill] sm:$0xff] %v5672_v33 }
 0x329   :  { %v2546_v37 = vrot.slane %v2532_v2, 4  ;;  %v2624_v40 = vrot.slane %v2611_v15, 4  ;;  %v2614_v2 = vmul.f32 %v5568_v25, %v2608_v51  ;;  %v2622_v15 = vrot.slane %v2610_v47, 4 }
 0x32b   :  { %2596 = vrot.lane.b32.xlu1 %v2589_v28, %s4291_s10  ;;  %2512 = vrot.lane.b32.xlu2 %v2500_v10, %s4291_s10  ;;  %v2548_v10 = vsel %vm355_vm4, %v2546_v37, %v2547_v43  ;;  %v2570_v28 = vmul.f32 %v5590_v49, %v2567_v22  ;;  %v2629_v37 = vrot.slane %v2614_v2, 4 }
 0x32d   :  { %2557 = vrot.lane.b32.xlu0 %v2550_v60, %s4291_s10  ;;  %v5681_v33 = vpop.permute.xlu1 %2260  ;;  %v5683_v5 = vpop.permute.xlu2 %2262  ;;  %v2587_v60 = vsel %vm355_vm4, %v2585_v63, %v2586_v13  ;;  %v2583_v22 = vrot.slane %v2570_v28, 4  ;;  %v2655_v63 = vstv %s4104_s20  ;;  %s6569_s20 = sld [smem:[#allocation4 + $0x28]] }
 0x32e   :  { %7983 = vst [vmem:[#allocation215_spill] sm:$0xff] %v5681_v33  ;;  %v2658_v47 = vmul.f32 %v5590_v49, %v2655_v63 }
 0x32f   :  { %7984 = vst [vmem:[#allocation216_spill] sm:$0xff] %v5683_v5  ;;  %v5686_v26 = vpop.permute.xlu0 %2235  ;;  %v2584_v13 = vsel %vm355_vm4, %v2581_v36, %v2583_v22 }
 0x330   :  { %7985 = vst [vmem:[#allocation217_spill] sm:$0xff] %v5686_v26  ;;  %v2671_v22 = vrot.slane %v2658_v47, 4 }
 0x333   :  { %2635 = vrot.lane.b32.xlu1 %v2624_v40, %s4291_s10  ;;  %2555 = vrot.lane.b32.xlu2 %v2548_v10, %s4291_s10  ;;  %v2625_v10 = vsel %vm355_vm4, %v2622_v15, %v2624_v40 }
 0x335   :  { %2594 = vrot.lane.b32.xlu0 %v2587_v60, %s4291_s10  ;;  %v5695_v33 = vpop.permute.xlu1 %2289  ;;  %v5697_v41 = vpop.permute.xlu2 %2291  ;;  %v2613_v60 = vmul.f32 %v5565_v58, %v2608_v51 }
 0x336   :  { %7986 = vst [vmem:[#allocation218_spill] sm:$0xff] %v5695_v33 }
 0x337   :  { %7987 = vst [vmem:[#allocation219_spill] sm:$0xff] %v5697_v41  ;;  %v5700_v43 = vpop.permute.xlu0 %2258  ;;  %v2609_v41 = vmul.f32 %v5581_v14, %v2608_v51  ;;  %v2627_v2 = vrot.slane %v2613_v60, 4 }
 0x338   :  { %7988 = vst [vmem:[#allocation220_spill] sm:$0xff] %v5700_v43 }
 0x339   :  { %v2621_v40 = vrot.slane %v2609_v41, 4  ;;  %v2630_v5 = vsel %vm355_vm4, %v2627_v2, %v2629_v37  ;;  %v2661_v41 = vmul.f32 %v5502_v27, %v2655_v63 }
 0x33b   :  { %2641 = vrot.lane.b32.xlu1 %v2629_v37, %s4291_s10  ;;  %2592 = vrot.lane.b32.xlu2 %v2584_v13, %s4291_s10  ;;  %v2623_v13 = vsel %vm355_vm4, %v2621_v40, %v2622_v15  ;;  %v2676_v40 = vrot.slane %v2661_v41, 4 }
 0x33d   :  { %2633 = vrot.lane.b32.xlu0 %v2625_v10, %s4291_s10  ;;  %v5709_v33 = vpop.permute.xlu1 %2295  ;;  %v5711_v28 = vpop.permute.xlu2 %2297  ;;  %v2657_v10 = vmul.f32 %v5497_v21, %v2655_v63 }
 0x33e   :  { %7989 = vst [vmem:[#allocation221_spill] sm:$0xff] %v5709_v33 }
 0x33f   :  { %7990 = vst [vmem:[#allocation222_spill] sm:$0xff] %v5711_v28  ;;  %v5714_v36 = vpop.permute.xlu0 %2264  ;;  %v2612_v28 = vmul.f32 %v5523_v44, %v2608_v51  ;;  %v2669_v15 = vrot.slane %v2657_v10, 4  ;;  %v2656_v51 = vmul.f32 %v5450_v7, %v2655_v63 }
 0x340   :  { %7991 = vst [vmem:[#allocation223_spill] sm:$0xff] %v5714_v36  ;;  %v2704_v36 = vstv %s4105_s21  ;;  %s6683_s21 = sld [smem:[#allocation4 + $0x59]] }
 0x341   :  { %v2626_v37 = vrot.slane %v2612_v28, 4  ;;  %v5732_v43 = vmul.f32 %v5565_v58, %v2704_v36  ;;  %v2708_v28 = vmul.f32 %v5523_v44, %v2704_v36 }
 0x343   :  { %2682 = vrot.lane.b32.xlu1 %v2671_v22, %s4291_s10  ;;  %2631 = vrot.lane.b32.xlu2 %v2623_v13, %s4291_s10  ;;  %v2628_v13 = vsel %vm355_vm4, %v2626_v37, %v2627_v2  ;;  %v2723_v37 = vrot.slane %v5732_v43, 6  ;;  %v2722_v32 = vrot.slane %v2708_v28, 6  ;;  %v2706_v43 = vmul.f32 %v5533_v3, %v2704_v36 }
 0x345   :  { %2639 = vrot.lane.b32.xlu0 %v2630_v5, %s4291_s10  ;;  %v5723_v33 = vpop.permute.xlu1 %2326  ;;  %v5725_v60 = vpop.permute.xlu2 %2328  ;;  %v2672_v5 = vsel %vm355_vm4, %v2669_v15, %v2671_v22  ;;  %v2743_v22 = vstv %s4106_s22  ;;  %v2724_v26 = vsel %vm492_vm5, %v2722_v32, %v2723_v37  ;;  %s6803_s22 = sld [smem:[#allocation4 + $0x2f]] }
 0x346   :  { %7992 = vst [vmem:[#allocation224_spill] sm:$0xff] %v5723_v33  ;;  %v2668_v33 = vrot.slane %v2656_v51, 4  ;;  %v2746_v9 = vmul.f32 %v5590_v49, %v2743_v22 }
 0x347   :  { %7993 = vst [vmem:[#allocation225_spill] sm:$0xff] %v5725_v60  ;;  %v5728_v47 = vpop.permute.xlu0 %2293  ;;  %v2660_v60 = vmul.f32 %v5510_v61, %v2655_v63 }
 0x348   :  { %7994 = vst [vmem:[#allocation226_spill] sm:$0xff] %v5728_v47 }
 0x349   :  { %v2674_v47 = vrot.slane %v2660_v60, 4  ;;  %v2707_v60 = vmul.f32 %v5536_v59, %v2704_v36 }
 0x34b   :  { %2688 = vrot.lane.b32.xlu1 %v2676_v40, %s4291_s10  ;;  %2637 = vrot.lane.b32.xlu2 %v2628_v13, %s4291_s10  ;;  %v2745_v13 = vmul.f32 %v5497_v21, %v2743_v22 }
 0x34d   :  { %2680 = vrot.lane.b32.xlu0 %v2672_v5, %s4291_s10  ;;  %v5741_v10 = vpop.permute.xlu1 %2332  ;;  %v5743_v2 = vpop.permute.xlu2 %2334  ;;  %v2670_v5 = vsel %vm355_vm4, %v2668_v33, %v2669_v15  ;;  %v2757_v15 = vrot.slane %v2745_v13, 6 }
 0x34e   :  { %7995 = vst [vmem:[#allocation227_spill] sm:$0xff] %v5741_v10  ;;  %v2659_v10 = vmul.f32 %v5506_v50, %v2655_v63  ;;  %v2759_v63 = vrot.slane %v2746_v9, 6  ;;  %v2705_v9 = vmul.f32 %v5581_v14, %v2704_v36 }
 0x34f   :  { %7996 = vst [vmem:[#allocation228_spill] sm:$0xff] %v5743_v2  ;;  %v5745_v41 = vpop.permute.xlu0 %2299  ;;  %v2677_v2 = vsel %vm355_vm4, %v2674_v47, %v2676_v40  ;;  %v2718_v40 = vrot.slane %v2706_v43, 6 }
 0x350   :  { %7997 = vst [vmem:[#allocation229_spill] sm:$0xff] %v5745_v41  ;;  %v2673_v28 = vrot.slane %v2659_v10, 4 }
 0x352   :  { %v2675_v41 = vsel %vm355_vm4, %v2673_v28, %v2674_v47 }
 0x353   :  { %2731 = vrot.lane.b32.xlu1 %v2724_v26, %s4291_s10  ;;  %2678 = vrot.lane.b32.xlu2 %v2670_v5, %s4291_s10  ;;  %v2720_v26 = vrot.slane %v2707_v60, 6  ;;  %v2760_v5 = vsel %vm492_vm5, %v2757_v15, %v2759_v63  ;;  %v5779_v60 = vstv %s4107_s23  ;;  %v2717_v63 = vrot.slane %v2705_v9, 6  ;;  %s6903_s23 = sld [smem:[#allocation4 + $0x60]] }
 0x354   :  { %v2785_v28 = vmul.f32 %v5581_v14, %v5779_v60 }
 0x355   :  { %2686 = vrot.lane.b32.xlu0 %v2677_v2, %s4291_s10  ;;  %v5759_v51 = vpop.permute.xlu1 %2375  ;;  %v5761_v32 = vpop.permute.xlu2 %2377  ;;  %v2721_v48 = vsel %vm492_vm5, %v2718_v40, %v2720_v26  ;;  %v2744_v2 = vmul.f32 %v5450_v7, %v2743_v22  ;;  %v2710_v26 = vmul.f32 %v5568_v25, %v2704_v36 }
 0x356   :  { %7998 = vst [vmem:[#allocation230_spill] sm:$0xff] %v5759_v51 }
 0x357   :  { %7999 = vst [vmem:[#allocation231_spill] sm:$0xff] %v5761_v32  ;;  %v5763_v33 = vpop.permute.xlu0 %2330  ;;  %v2756_v47 = vrot.slane %v2744_v2, 6  ;;  %v2725_v36 = vrot.slane %v2710_v26, 6 }
 0x358   :  { %8000 = vst [vmem:[#allocation232_spill] sm:$0xff] %v5763_v33  ;;  %v2749_v33 = vmul.f32 %v5502_v27, %v2743_v22 }
 0x35b   :  { %2768 = vrot.lane.b32.xlu1 %v2760_v5, %s4291_s10  ;;  %2684 = vrot.lane.b32.xlu2 %v2675_v41, %s4291_s10  ;;  %v2719_v41 = vsel %vm492_vm5, %v2717_v63, %v2718_v40  ;;  %v2748_v5 = vmul.f32 %v5510_v61, %v2743_v22  ;;  %v2788_v63 = vmul.f32 %v5565_v58, %v5779_v60 }
 0x35d   :  { %2729 = vrot.lane.b32.xlu0 %v2721_v48, %s4291_s10  ;;  %v5773_v10 = vpop.permute.xlu1 %2381  ;;  %v5775_v13 = vpop.permute.xlu2 %2414  ;;  %v2758_v48 = vsel %vm492_vm5, %v2756_v47, %v2757_v15  ;;  %v2762_v15 = vrot.slane %v2748_v5, 6  ;;  %v2764_v47 = vrot.slane %v2749_v33, 6 }
 0x35e   :  { %8001 = vst [vmem:[#allocation233_spill] sm:$0xff] %v5773_v10 }
 0x35f   :  { %8002 = vst [vmem:[#allocation234_spill] sm:$0xff] %v5775_v13  ;;  %v5777_v43 = vpop.permute.xlu0 %2336 }
 0x360   :  { %8003 = vst [vmem:[#allocation235_spill] sm:$0xff] %v5777_v43 }
 0x363   :  { %2793 = vrot.lane.b32.xlu1 %v2785_v28, %s4292_s24  ;;  %2727 = vrot.lane.b32.xlu2 %v2719_v41, %s4291_s10  ;;  %v2726_v28 = vsel %vm492_vm5, %v2723_v37, %v2725_v36  ;;  %v2747_v41 = vmul.f32 %v5506_v50, %v2743_v22  ;;  %v5811_v22 = vstv %s4042_s25  ;;  %v5813_v36 = vstv %s4108_s26  ;;  %s7000_s25 = sld [smem:[#allocation4 + $0x6]] }
 0x364   :  { %v240_v43 = vmul.f32 %v5590_v49, %v5811_v22  ;;  %v2811_v54 = vmul.f32 %v5497_v21, %v5813_v36  ;;  %s7032_s26 = sld [smem:[#allocation4 + $0x37]] }
 0x365   :  { %2766 = vrot.lane.b32.xlu0 %v2758_v48, %s4291_s10  ;;  %v5791_v2 = vpop.permute.xlu1 %2418  ;;  %v5793_v9 = vpop.permute.xlu2 %2420  ;;  %v2765_v48 = vsel %vm492_vm5, %v2762_v15, %v2764_v47  ;;  %v2761_v37 = vrot.slane %v2747_v41, 6  ;;  %v2812_v47 = vmul.f32 %v5506_v50, %v5813_v36  ;;  %v238_v41 = vmul.f32 %v5450_v7, %v5811_v22 }
 0x366   :  { %8004 = vst [vmem:[#allocation236_spill] sm:$0xff] %v5791_v2  ;;  %v253_v32 = vrot.slane %v240_v43, 2 }
 0x367   :  { %8005 = vst [vmem:[#allocation237_spill] sm:$0xff] %v5793_v9  ;;  %v5795_v40 = vpop.permute.xlu0 %2379  ;;  %v5841_v9 = vstv %s4040_s30  ;;  %v250_v10 = vrot.slane %v238_v41, 2  ;;  %v2786_v41 = vmul.f32 %v5533_v3, %v5779_v60  ;;  %s4126_s30 = sld [smem:[#allocation4 + $0x45]] }
 0x368   :  { %8006 = vst [vmem:[#allocation238_spill] sm:$0xff] %v5795_v40  ;;  %v191_v56 = vmul.f32 %v5450_v7, %v5841_v9  ;;  %v195_v57 = vmul.f32 %v5510_v61, %v5841_v9 }
 0x36b   :  { %2799 = vrot.lane.b32.xlu1 %v2788_v63, %s4292_s24  ;;  %2733 = vrot.lane.b32.xlu2 %v2726_v28, %s4291_s10  ;;  %v2787_v63 = vmul.f32 %v5523_v44, %v5779_v60  ;;  %v2763_v28 = vsel %vm492_vm5, %v2761_v37, %v2762_v15  ;;  %v5833_v15 = vstv %s4050_s29  ;;  %s4125_s29 = sld [smem:[#allocation4 + $0x14]] }
 0x36c   :  { %v513_v62 = vmul.f32 %v5497_v21, %v5833_v15  ;;  %v514_v12 = vmul.f32 %v5590_v49, %v5833_v15 }
 0x36d   :  { %2772 = vrot.lane.b32.xlu0 %v2765_v48, %s4291_s10  ;;  %v5805_v33 = vpop.permute.xlu1 %2457  ;;  %v5807_v26 = vpop.permute.xlu2 %2459  ;;  %v239_v48 = vmul.f32 %v5497_v21, %v5811_v22 }
 0x36e   :  { %8007 = vst [vmem:[#allocation239_spill] sm:$0xff] %v5805_v33  ;;  %v5822_v33 = vstv %s4046_s28  ;;  %s7149_s28 = sld [smem:[#allocation4 + $0xd]] }
 0x36f   :  { %8008 = vst [vmem:[#allocation240_spill] sm:$0xff] %v5807_v26  ;;  %v5809_v5 = vpop.permute.xlu0 %2416  ;;  %v5828_v26 = vstv %s4038_s27  ;;  %v375_v40 = vmul.f32 %v5450_v7, %v5822_v33  ;;  %v251_v13 = vrot.slane %v239_v48, 2  ;;  %v377_v51 = vmul.f32 %v5590_v49, %v5822_v33  ;;  %s4293_s27 = smov 122  }
 0x370   :  { %8009 = vst [vmem:[#allocation241_spill] sm:$0xff] %v5809_v5  ;;  %v168_v60 = vmul.f32 %v5497_v21, %v5828_v26 }
 0x371   :  { %v387_v1 = vrot.slane %v375_v40, 4  ;;  %v252_v17 = vsel %vm218_vm3, %v250_v10, %v251_v13  ;;  %v390_v40 = vrot.slane %v377_v51, 4 }
 0x373   :  { %2822 = vrot.lane.b32.xlu1 %v2812_v47, %s4292_s24  ;;  %2770 = vrot.lane.b32.xlu2 %v2763_v28, %s4291_s10  ;;  %v5843_v47 = vstv %s4044_s3  ;;  %v5845_v28 = vstv %s4048_s4  ;;  %s5909_s10 = sld [smem:[#allocation4 + $0x2a]] }
 0x374   :  { %v306_v48 = vmul.f32 %v5450_v7, %v5843_v47  ;;  %v443_v43 = vmul.f32 %v5450_v7, %v5845_v28  ;;  %v5871_v52 = vmul.f32 %v5590_v49, %v5843_v47  ;;  %v444_v42 = vmul.f32 %v5497_v21, %v5845_v28  ;;  %s4127_s3 = sld [smem:[#allocation4 + $0x1b]] }
 0x375   :  { %2797 = vrot.lane.b32.xlu0 %v2787_v63, %s4292_s24  ;;  %v5835_v37 = vpop.permute.xlu1 %2463  ;;  %v5837_v5 = vpop.permute.xlu2 %2465  ;;  %v376_v63 = vmul.f32 %v5497_v21, %v5822_v33  ;;  %s4128_s4 = sld [smem:[#allocation4 + $0x4c]] }
 0x376   :  { %8010 = vst [vmem:[#allocation242_spill] sm:$0xff] %v5835_v37  ;;  %v167_v37 = vmul.f32 %v5450_v7, %v5828_v26  ;;  %v318_v34 = vrot.slane %v306_v48, 2 }
 0x377   :  { %8011 = vst [vmem:[#allocation243_spill] sm:$0xff] %v5837_v5  ;;  %v5847_v2 = vpop.permute.xlu0 %2455  ;;  %v512_v5 = vmul.f32 %v5450_v7, %v5833_v15  ;;  %v388_v24 = vrot.slane %v376_v63, 4  ;;  %v254_v63 = vsel %vm218_vm3, %v251_v13, %v253_v32  ;;  %v5903_v13 = vmul.f32 %v5590_v49, %v5845_v28 }
 0x378   :  { %8012 = vst [vmem:[#allocation244_spill] sm:$0xff] %v5847_v2  ;;  %v307_v2 = vmul.f32 %v5497_v21, %v5843_v47  ;;  %v265_v48 = vadd.f32 %v254_v63, %v168_v60  ;;  %v456_v32 = vrot.slane %v444_v42, 4  ;;  %v2837_v42 = vmul.f32 %v5581_v14, %v5857_v20 }
 0x379   :  { %v524_v51 = vrot.slane %v512_v5, 6  ;;  %8015 = vst [vmem:[#allocation247_spill] sm:$0xff] %v5903_v13  ;;  %v389_v5 = vsel %vm355_vm4, %v387_v1, %v388_v24  ;;  %v391_v35 = vsel %vm355_vm4, %v388_v24, %v390_v40  ;;  %v8017_v1 = vrot.slane %v5871_v52, 2 }
 0x37a   :  { %v319_v10 = vrot.slane %v307_v2, 2  ;;  %v264_v2 = vadd.f32 %v252_v17, %v167_v37  ;;  %v2810_v17 = vmul.f32 %v5450_v7, %v5813_v36  ;;  %v7762_v37 = vrot.slane %v5903_v13, 4 }
 0x37b   :  { %2851 = vrot.lane.b32.xlu1 %v2838_v23, %s4292_s24  ;;  %2795 = vrot.lane.b32.xlu2 %v2786_v41, %s4292_s24  ;;  %v5931_v40 = vmul.f32 %v5510_v61, %v5811_v22  ;;  %v241_v63 = vmul.f32 %v5506_v50, %v5811_v22  ;;  %v447_v13 = vmul.f32 %v5510_v61, %v5845_v28 }
 0x37c   :  { %v320_v11 = vsel %vm218_vm3, %v318_v34, %v319_v10  ;;  %v401_v24 = vadd.f32 %v389_v5, %v264_v2  ;;  %v5949_v5 = vstv %s5880_s6  ;;  %s4131_s6 = sld [smem:[#allocation4 + $0x29]] }
 0x37d   :  { %2820 = vrot.lane.b32.xlu0 %v2811_v54, %s4292_s24  ;;  %v5894_v23 = vpop.permute.xlu1 %2504  ;;  %v5896_v41 = vpop.permute.xlu2 %2506  ;;  %v525_v54 = vrot.slane %v513_v62, 6  ;;  %v2841_v62 = vmul.f32 %v5565_v58, %v5857_v20  ;;  %v334_v60 = vadd.f32 %v320_v11, %v191_v56  ;;  %v459_v56 = vsel %vm355_vm4, %v456_v32, %v7762_v37 }
 0x37e   :  { %8013 = vst [vmem:[#allocation245_spill] sm:$0xff] %v5894_v23  ;;  %v455_v23 = vrot.slane %v443_v43, 4  ;;  %v402_v43 = vadd.f32 %v391_v35, %v265_v48  ;;  %v461_v30 = vrot.slane %v447_v13, 4 }
 0x37f   :  { %8014 = vst [vmem:[#allocation246_spill] sm:$0xff] %v5896_v41  ;;  %v5905_v6 = vpop.permute.xlu0 %2461  ;;  %v527_v41 = vrot.slane %v514_v12, 6  ;;  %v322_v12 = vsel %vm218_vm3, %v319_v10, %v8017_v1  ;;  %v526_v34 = vsel %vm492_vm5, %v524_v51, %v525_v54  ;;  %v5936_v10 = vstv %s5889_s7  ;;  %s4132_s7 = sld [smem:[#allocation4 + $0x5a]] }
 0x380   :  { %8016 = vst [vmem:[#allocation248_spill] sm:$0xff] %v5905_v6  ;;  %v192_v6 = vmul.f32 %v5497_v21, %v5841_v9  ;;  %v457_v51 = vsel %vm355_vm4, %v455_v23, %v456_v32  ;;  %v5956_v1 = vadd.f32 %v526_v34, %v401_v24  ;;  %v5962_v23 = vstv %s5909_s10  ;;  %s4134_s10 = sld [smem:[#allocation4 + $0x61]] }
 0x381   :  { %v528_v35 = vsel %vm492_vm5, %v525_v54, %v527_v41  ;;  %v5959_v41 = vstv %s5892_s8  ;;  %v7763_v32 = vrot.slane %v5931_v40, 2  ;;  %v5977_v24 = vmul.f32 %v5581_v14, %v5949_v5  ;;  %s4130_s8 = sld [smem:[#allocation4 + $0x53]] }
 0x382   :  { %v335_v2 = vadd.f32 %v322_v12, %v192_v6  ;;  %v5966_v6 = vmul.f32 %v5581_v14, %v5936_v10  ;;  %v5968_v54 = vadd.f32 %v528_v35, %v402_v43  ;;  %v5970_v12 = vadd.f32 %v457_v51, %v334_v60 }
 0x383   :  { %2857 = vrot.lane.b32.xlu1 %v2841_v62, %s4292_s24  ;;  %2818 = vrot.lane.b32.xlu2 %v2810_v17, %s4292_s24  ;;  %v5954_v17 = vstv %s5907_s9  ;;  %v5987_v43 = vmul.f32 %v5510_v61, %v5822_v33  ;;  %v5991_v60 = vmul.f32 %v5581_v14, %v5959_v41  ;;  %v2840_v35 = vmul.f32 %v5523_v44, %v5857_v20  ;;  %s4133_s9 = sld [smem:[#allocation4 + $0x30]] }
 0x384   :  { %8021 = vst [vmem:[#allocation252_spill] sm:$0xff] %v5970_v12  ;;  %v5973_v37 = vadd.f32 %v459_v56, %v335_v2  ;;  %v2875_v34 = vmul.f32 %v5497_v21, %v5954_v17  ;;  %v378_v51 = vmul.f32 %v5506_v50, %v5822_v33  ;;  %v515_v2 = vmul.f32 %v5506_v50, %v5833_v15 }
 0x385   :  { %2849 = vrot.lane.b32.xlu0 %v2837_v42, %s4292_s24  ;;  %v5941_v48 = vpop.permute.xlu1 %2510  ;;  %v5943_v11 = vpop.permute.xlu2 %2512  ;;  %v255_v42 = vrot.slane %v241_v63, 2  ;;  %v5995_v63 = vmul.f32 %v5581_v14, %v5962_v23  ;;  %v310_v12 = vmul.f32 %v5510_v61, %v5843_v47  ;;  %v6034_v56 = vmul.f32 %v5523_v44, %v5959_v41 }
 0x386   :  { %8018 = vst [vmem:[#allocation249_spill] sm:$0xff] %v5941_v48  ;;  %v309_v48 = vmul.f32 %v5506_v50, %v5843_v47  ;;  %v6045_v18 = vmul.f32 %v5523_v44, %v5962_v23  ;;  %v392_v45 = vrot.slane %v378_v51, 4  ;;  %v6062_v51 = vstv %s5983_s11  ;;  %s4294_s11 = smov [#allocation9]  }
 0x387   :  { %8019 = vst [vmem:[#allocation250_spill] sm:$0xff] %v5943_v11  ;;  %v5951_v62 = vpop.permute.xlu0 %2502  ;;  %v6017_v11 = vmul.f32 %v5502_v27, %v5843_v47 }
 0x388   :  { %8020 = vst [vmem:[#allocation251_spill] sm:$0xff] %v5951_v62  ;;  %v2813_v62 = vmul.f32 %v5510_v61, %v5813_v36  ;;  %v6001_v36 = vmul.f32 %v5510_v61, %v5833_v15  ;;  %v323_v31 = vrot.slane %v309_v48, 2  ;;  %v6072_v48 = vmul.f32 %v5533_v3, %v6062_v51 }
 0x389   :  { %8022 = vst [vmem:[#allocation253_spill] sm:$0xff] %v5973_v37  ;;  %v257_v37 = vsel %vm218_vm3, %v255_v42, %v7763_v32  ;;  %v6030_v42 = vmul.f32 %v5523_v44, %v5936_v10  ;;  %v8029_v19 = vrot.slane %v6017_v11, 2 }
 0x38a   :  { %v8028_v38 = vrot.slane %v6001_v36, 6  ;;  %v2926_v13 = vrot.slane %v6072_v48, 2  ;;  %v8033_v48 = vrot.slane %v5931_v40, 2 }
 0x38b   :  { %2888 = vrot.lane.b32.xlu1 %v2875_v34, %s4292_s24  ;;  %2824 = vrot.lane.b32.xlu2 %v2813_v62, %s4292_s24  ;;  %v169_v34 = vmul.f32 %v5506_v50, %v5828_v26  ;;  %v6026_v62 = vmul.f32 %v5523_v44, %v5949_v5  ;;  %v243_v44 = vmul.f32 %v5502_v27, %v5811_v22 }
 0x38c   :  { %v2915_v22 = vmul.f32 %v5536_v59, %v6062_v51 }
 0x38d   :  { %2855 = vrot.lane.b32.xlu0 %v2840_v35, %s4292_s24  ;;  %v6036_v32 = vpop.permute.xlu1 %2553  ;;  %v6038_v47 = vpop.permute.xlu2 %2555  ;;  %v266_v55 = vadd.f32 %v257_v37, %v169_v34  ;;  %v2839_v37 = vmul.f32 %v5536_v59, %v5857_v20  ;;  %v8027_v34 = vrot.slane %v5987_v43, 4  ;;  %v258_v39 = vrot.slane %v243_v44, 2 }
 0x38e   :  { %8023 = vst [vmem:[#allocation254_spill] sm:$0xff] %v6036_v32  ;;  %v529_v32 = vrot.slane %v515_v2, 6  ;;  %v2874_v2 = vmul.f32 %v5450_v7, %v5954_v17  ;;  %v517_v44 = vmul.f32 %v5502_v27, %v5833_v15  ;;  %v6128_v15 = vmul.f32 %v5565_v58, %v5936_v10 }
 0x38f   :  { %8024 = vst [vmem:[#allocation255_spill] sm:$0xff] %v6038_v47  ;;  %v6047_v8 = vpop.permute.xlu0 %2508  ;;  %v324_v47 = vrot.slane %v310_v12, 2  ;;  %v6066_v12 = vmul.f32 %v5502_v27, %v5845_v28  ;;  %v394_v35 = vsel %vm355_vm4, %v392_v45, %v8027_v34  ;;  %v446_v34 = vmul.f32 %v5506_v50, %v5845_v28 }
 0x390   :  { %8025 = vst [vmem:[#allocation256_spill] sm:$0xff] %v6047_v8  ;;  %v2878_v8 = vmul.f32 %v5510_v61, %v5954_v17  ;;  %v403_v7 = vadd.f32 %v394_v35, %v266_v55  ;;  %v531_v46 = vsel %vm492_vm5, %v529_v32, %v8028_v38  ;;  %v6097_v55 = vmul.f32 %v5533_v3, %v5936_v10 }
 0x391   :  { %8026 = vst [vmem:[#allocation257_spill] sm:$0xff] %v6066_v12  ;;  %v327_v45 = vsel %vm218_vm3, %v324_v47, %v8029_v19  ;;  %v194_v28 = vmul.f32 %v5506_v50, %v5841_v9  ;;  %v170_v19 = vmul.f32 %v5510_v61, %v5828_v26  ;;  %v2877_v26 = vmul.f32 %v5506_v50, %v5954_v17 }
 0x392   :  { %v6148_v50 = vmul.f32 %v5533_v3, %v5962_v23 }
 0x393   :  { %2894 = vrot.lane.b32.xlu1 %v2878_v8, %s4292_s24  ;;  %2853 = vrot.lane.b32.xlu2 %v2839_v37, %s4292_s24  ;;  %v325_v8 = vsel %vm218_vm3, %v323_v31, %v324_v47  ;;  %v2928_v37 = vrot.slane %v2915_v22, 2  ;;  %v338_v31 = vadd.f32 %v327_v45, %v195_v57  ;;  %v380_v47 = vmul.f32 %v5502_v27, %v5822_v33 }
 0x394   :  { %v259_v57 = vsel %vm218_vm3, %v8033_v48, %v258_v39  ;;  %v2842_v22 = vmul.f32 %v5568_v25, %v5857_v20  ;;  %v532_v20 = vrot.slane %v517_v44, 6  ;;  %v8037_v44 = vrot.slane %v6097_v55, 2 }
 0x395   :  { %2886 = vrot.lane.b32.xlu0 %v2874_v2, %s4292_s24  ;;  %v6099_v35 = vpop.permute.xlu1 %2590  ;;  %v6101_v38 = vpop.permute.xlu2 %2592  ;;  %v6114_v2 = vstv %s6050_s12  ;;  %v2929_v45 = vsel %vm218_vm3, %v2926_v13, %v2928_v37  ;;  %v395_v48 = vrot.slane %v380_v47, 4  ;;  %v6152_v37 = vadd.f32 %v531_v46, %v403_v7  ;;  %s4022_s12 = sshll.u32 %s4294_s11, 4  ;;  %s4023_s12 = int_to_ptr.vmem [resolvable:$true] %s4022_s12 }
 0x396   :  { %8030 = vst [vmem:[#allocation258_spill] sm:$0xff] %v6099_v35  ;;  %v460_v35 = vrot.slane %v446_v34, 4  ;;  %v6135_v34 = vld [vmem:[#allocation3] sm:$0xff]  ;;  %v6141_v39 = vmul.f32 %v5497_v21, %v6114_v2  ;;  %v267_v21 = vadd.f32 %v259_v57, %v170_v19  ;;  %v2913_v7 = vmul.f32 %v5581_v14, %v6062_v51 }
 0x397   :  { %8031 = vst [vmem:[#allocation259_spill] sm:$0xff] %v6101_v38  ;;  %v6106_v32 = vpop.permute.xlu0 %2551  ;;  %v337_v38 = vadd.f32 %v325_v8, %v194_v28  ;;  %v2952_v40 = vmul.f32 %v6135_v34, %v6114_v2  ;;  %v8035_v8 = vrot.slane %v6066_v12, 4  ;;  %v8041_v57 = vrot.slane %v5987_v43, 4 }
 0x398   :  { %8032 = vst [vmem:[#allocation260_spill] sm:$0xff] %v6106_v32  ;;  %v6120_v32 = vmul.f32 %v5533_v3, %v5959_v41  ;;  %v462_v47 = vsel %vm355_vm4, %v460_v35, %v461_v30  ;;  %v8038_v3 = vrot.slane %v5966_v6, 2  ;;  %v2965_v6 = vrot.slane %v6141_v39, 2  ;;  %v8080_v39 = vld [vmem:[#allocation66_spill] sm:$0xff] }
 0x399   :  { %8034 = vst [vmem:[#allocation261_spill] sm:$0xff] %v6135_v34  ;;  %v464_v28 = vsel %vm355_vm4, %v461_v30, %v8035_v8  ;;  %v6171_v19 = vadd.f32 %v462_v47, %v337_v38  ;;  %v211_v30 = vmul.f32 %v5568_v25, %v5936_v10  ;;  %v494_v14 = vrot.slane %v6148_v50, 6 }
 0x39a   :  { %v6154_v33 = vadd.f32 %v464_v28, %v338_v31  ;;  %v357_v34 = vrot.slane %v6120_v32, 4  ;;  %v221_v8 = vsel %vm218_vm3, %v8038_v3, %v8037_v44  ;;  %v2964_v31 = vrot.slane %v2952_v40, 2 }
 0x39b   :  { %2937 = vrot.lane.b32.xlu1 %v2929_v45, %s4292_s24  ;;  %2859 = vrot.lane.b32.xlu2 %v2842_v22, %s4292_s24  ;;  %v225_v45 = vrot.slane %v6128_v15, 2  ;;  %8040 = vst [vmem:[#allocation264_spill] sm:$0xff] %v6171_v19  ;;  %v396_v15 = vsel %vm355_vm4, %v8041_v57, %v395_v48  ;;  %v208_v38 = vmul.f32 %v5536_v59, %v5936_v10  ;;  %v8043_v40 = vrot.slane %v5991_v60, 4 }
 0x39c   :  { %8036 = vst [vmem:[#allocation262_spill] sm:$0xff] %v6154_v33  ;;  %v404_v47 = vadd.f32 %v396_v15, %v267_v21  ;;  %v233_v44 = vadd.f32 %v221_v8, %v5977_v24  ;;  %v193_v48 = vmul.f32 %v5590_v49, %v5841_v9  ;;  %v2925_v21 = vrot.slane %v2913_v7, 2  ;;  %v8130_v33 = vld [vmem:[#allocation165_spill] sm:$0xff] }
 0x39d   :  { %2892 = vrot.lane.b32.xlu0 %v2877_v26, %s4292_s24  ;;  %v6165_v22 = vpop.permute.xlu1 %2596  ;;  %v6167_v46 = vpop.permute.xlu2 %2631  ;;  %v8042_v26 = vrot.slane %v6001_v36, 6  ;;  %v358_v43 = vsel %vm355_vm4, %v8043_v40, %v357_v34  ;;  %v6197_v36 = vmul.f32 %v5565_v58, %v5959_v41  ;;  %v2876_v24 = vmul.f32 %v5590_v49, %v5954_v17 }
 0x39e   :  { %8039 = vst [vmem:[#allocation263_spill] sm:$0xff] %v6167_v46  ;;  %v227_v3 = vrot.slane %v211_v30, 2  ;;  %v2966_v60 = vsel %vm218_vm3, %v2964_v31, %v2965_v6  ;;  %v6209_v8 = vmul.f32 %v5510_v61, %v6114_v2  ;;  %v2957_v57 = vmul.f32 %v5502_v27, %v6114_v2  ;;  %v8093_v46 = vld [vmem:[#allocation69_spill] sm:$0xff] }
 0x39f   :  { %v6175_v35 = vpop.permute.xlu0 %2557  ;;  %v533_v28 = vsel %vm492_vm5, %v8042_v26, %v532_v20  ;;  %v8044_v20 = vrot.slane %v6030_v42, 2  ;;  %v222_v42 = vrot.slane %v208_v38, 2  ;;  %v2927_v7 = vsel %vm218_vm3, %v2925_v21, %v2926_v13 }
 0x3a0   :  { %v6220_v49 = vmul.f32 %v5565_v58, %v6062_v51  ;;  %v2918_v61 = vmul.f32 %v5568_v25, %v6062_v51  ;;  %v6224_v30 = vadd.f32 %v533_v28, %v404_v47  ;;  %v370_v31 = vadd.f32 %v358_v43, %v233_v44 }
 0x3a1   :  { %v226_v10 = vsel %vm218_vm3, %v8044_v20, %v225_v45  ;;  %v8045_v27 = vrot.slane %v5995_v63, 6  ;;  %v6233_v15 = vmul.f32 %v5565_v58, %v5962_v23  ;;  %v8046_v26 = vrot.slane %v5871_v52, 2 }
 0x3a2   :  { %v362_v28 = vrot.slane %v6197_v36, 4  ;;  %v348_v47 = vmul.f32 %v5568_v25, %v5959_v41  ;;  %v345_v63 = vmul.f32 %v5536_v59, %v5959_v41  ;;  %v235_v43 = vadd.f32 %v226_v10, %v6026_v62 }
 0x3a3   :  { %2974 = vrot.lane.b32.xlu1 %v2966_v60, %s4292_s24  ;;  %2890 = vrot.lane.b32.xlu2 %v2876_v24, %s4292_s24  ;;  %v495_v13 = vsel %vm492_vm5, %v8045_v27, %v494_v14  ;;  %v6240_v38 = vadd.f32 %v8046_v26, %v193_v48  ;;  %v485_v20 = vmul.f32 %v5568_v25, %v5962_v23  ;;  %v2970_v48 = vrot.slane %v6209_v8, 2  ;;  %v8060_v8 = vld [vmem:[#allocation17_spill] sm:$0xff] }
 0x3a4   :  { %v2972_v36 = vrot.slane %v2957_v57, 2  ;;  %v228_v21 = vsel %vm218_vm3, %v225_v45, %v227_v3  ;;  %v8050_v59 = vrot.slane %v6097_v55, 2  ;;  %v2931_v24 = vrot.slane %v6220_v49, 2  ;;  %v6271_v57 = vld [vmem:[#allocation2 + $0x8] sm:$0xff]  ;;  %v6279_v49 = vld [vmem:[#allocation3 + $0x28] sm:$0x3f] }
 0x3a5   :  { %2935 = vrot.lane.b32.xlu0 %v2927_v7, %s4292_s24  ;;  %8047 = vst [vmem:[#allocation265_spill] sm:$0xff] %v6240_v38  ;;  %v6247_v44 = vpop.permute.xlu1 %2635  ;;  %v6249_v40 = vpop.permute.xlu2 %2637  ;;  %v2933_v60 = vrot.slane %v2918_v61, 2  ;;  %v6264_v62 = vadd.f32 %v495_v13, %v370_v31  ;;  %v499_v25 = vrot.slane %v6233_v15, 6  ;;  %v161_v10 = vmul.f32 %v5565_v58, %v5949_v5 }
 0x3a6   :  { %8048 = vst [vmem:[#allocation266_spill] sm:$0xff] %v6247_v44  ;;  %v223_v41 = vsel %vm218_vm3, %v8050_v59, %v222_v42  ;;  %v159_v45 = vmul.f32 %v6271_v57, %v5949_v5  ;;  %v364_v55 = vrot.slane %v348_v47, 4  ;;  %v359_v3 = vrot.slane %v345_v63, 4  ;;  %v6275_v42 = vld [vmem:[#allocation2 + $0x10] sm:$0x3f]  ;;  %v6292_v47 = vld [vmem:[#allocation3 + $0x18] sm:$0xff] }
 0x3a7   :  { %8049 = vst [vmem:[#allocation267_spill] sm:$0xff] %v6249_v40  ;;  %v6254_v52 = vpop.permute.xlu0 %2594  ;;  %v482_v7 = vmul.f32 %v6275_v42, %v5962_v23  ;;  %v2879_v58 = vmul.f32 %v6279_v49, %v5954_v17  ;;  %v8051_v61 = vrot.slane %v6034_v56, 4  ;;  %v236_v27 = vadd.f32 %v228_v21, %v161_v10 }
 0x3a8   :  { %v234_v5 = vadd.f32 %v223_v41, %v159_v45  ;;  %v2973_v13 = vsel %vm218_vm3, %v2970_v48, %v2972_v36  ;;  %v501_v26 = vrot.slane %v485_v20, 6  ;;  %v2934_v23 = vsel %vm218_vm3, %v2931_v24, %v2933_v60 }
 0x3a9   :  { %v363_v31 = vsel %vm355_vm4, %v8051_v61, %v362_v28  ;;  %v2955_v17 = vmul.f32 %v6292_v47, %v6114_v2  ;;  %v498_v56 = vrot.slane %v6045_v18, 6  ;;  %v6298_v63 = vstv %s6213_s13 }
 0x3aa   :  { %v372_v15 = vadd.f32 %v363_v31, %v235_v43  ;;  %v6302_v36 = vstv %s6236_s14  ;;  %v6304_v43 = vld [vmem:[#allocation2 + $0x18] sm:$0xff]  ;;  %v365_v21 = vsel %vm355_vm4, %v362_v28, %v364_v55  ;;  %v496_v59 = vrot.slane %v482_v7, 6 }
 0x3ab   :  { %2980 = vrot.lane.b32.xlu1 %v2973_v13, %s4292_s24  ;;  %2896 = vrot.lane.b32.xlu2 %v2879_v58, %s4292_s24  ;;  %v2916_v20 = vmul.f32 %v6304_v43, %v6062_v51  ;;  %v360_v18 = vsel %vm355_vm4, %v357_v34, %v359_v3  ;;  %v6318_v10 = vmul.f32 %v6275_v42, %v6302_v36  ;;  %v6329_v3 = vstv %s6258_s15  ;;  %s4024_s15 = sshll.u32 %s7754_s2, 4  ;;  %s4025_s15 = int_to_ptr.hbm [resolvable:$true] %s4024_s15 }
 0x3ac   :  { %v500_v45 = vsel %vm492_vm5, %v498_v56, %v499_v25  ;;  %v373_v58 = vadd.f32 %v365_v21, %v236_v27  ;;  %v196_v51 = vmul.f32 %v6279_v49, %v5841_v9  ;;  %v371_v28 = vadd.f32 %v360_v18, %v234_v5  ;;  %v6338_v27 = vld [vmem:[#allocation2] sm:$0xff] }
 0x3ad   :  { %2941 = vrot.lane.b32.xlu0 %v2934_v23, %s4292_s24  ;;  %v6312_v41 = vpop.permute.xlu1 %2641  ;;  %v6314_v60 = vpop.permute.xlu2 %2678  ;;  %v509_v32 = vadd.f32 %v500_v45, %v372_v15  ;;  %v502_v34 = vsel %vm492_vm5, %v499_v25, %v501_v26  ;;  %v2969_v7 = vrot.slane %v2955_v17, 2  ;;  %v8055_v61 = vrot.slane %v6017_v11, 2  ;;  %v6357_v21 = vld [vmem:[#allocation3 + $0x10] sm:$0x3f] }
 0x3ae   :  { %8052 = vst [vmem:[#allocation268_spill] sm:$0xff] %v6312_v41  ;;  %v6336_v13 = vstv %s6269_s16  ;;  %v6342_v9 = vmul.f32 %v6338_v27, %v6298_v63  ;;  %v2930_v5 = vrot.slane %v2916_v20, 2  ;;  %v6346_v15 = vmul.f32 %v6271_v57, %v6329_v3  ;;  %v8062_v45 = vld [vmem:[#allocation33_spill] sm:$0xff]  ;;  %v8091_v41 = vld [vmem:[#allocation114_spill] sm:$0xff] }
 0x3af   :  { %8053 = vst [vmem:[#allocation269_spill] sm:$0xff] %v6314_v60  ;;  %v6323_v55 = vpop.permute.xlu0 %2633  ;;  %v6333_v31 = vadd.f32 %v8055_v61, %v196_v51  ;;  %v6350_v25 = vmul.f32 %v6271_v57, %v6336_v13  ;;  %v497_v11 = vsel %vm492_vm5, %v494_v14, %v496_v59  ;;  %v3008_v26 = vrot.slane %v6318_v10, 2  ;;  %v8061_v59 = vld [vmem:[#allocation18_spill] sm:$0xff]  ;;  %v8069_v61 = vld [vmem:[#allocation35_spill] sm:$0xff] }
 0x3b0   :  { %8054 = vst [vmem:[#allocation270_spill] sm:$0xff] %v6323_v55  ;;  %v510_v23 = vadd.f32 %v502_v34, %v373_v58  ;;  %v508_v17 = vadd.f32 %v497_v11, %v371_v28  ;;  %v2932_v56 = vsel %vm218_vm3, %v2930_v5, %v2931_v24  ;;  %v2954_v20 = vmul.f32 %v6357_v21, %v6114_v2  ;;  %v8068_v34 = vld [vmem:[#allocation26_spill] sm:$0xff]  ;;  %v8070_v11 = vld [vmem:[#allocation36_spill] sm:$0xff] }
 0x3b1   :  { %8056 = vst [vmem:[#allocation271_spill] sm:$0xff] %v6333_v31  ;;  %v590_v18 = vadd.f32 %v4522_v29, %v5956_v1  ;;  %v2971_v50 = vsel %vm218_vm3, %v2969_v7, %v2970_v48  ;;  %v6370_v14 = vmul.f32 %v6271_v57, %v6302_v36  ;;  %v591_v24 = vadd.f32 %v4498_v4, %v5968_v54  ;;  %v6388_v54 = vld [vmem:[#allocation2 + $0x28] sm:$0x3f]  ;;  %v8141_v31 = vld [vmem:[#allocation116_spill] sm:$0xff] }
 0x3b2   :  { %8057 = vst [vmem:[#allocation272_spill] sm:$0xff] %v6342_v9  ;;  %v592_v2 = vadd.f32 %v4490_v53, %v6152_v37  ;;  %v593_v29 = vadd.f32 %v4538_v0, %v6224_v30  ;;  %v565_v1 = vadd.f32 %v4535_v16, %v6264_v62  ;;  %v567_v48 = vadd.f32 %v8060_v8, %v509_v32  ;;  %v8065_v0 = vld [vmem:[#allocation25_spill] sm:$0xff]  ;;  %v8066_v16 = vld [vmem:[#allocation34_spill] sm:$0xff]  ;;  %v8073_v8 = vld [vmem:[#allocation48_spill] sm:$0xff] }
 0x3b3   :  { %8058 = vst [vmem:[#allocation273_spill] sm:$0xff] %v6350_v25  ;;  %3019 = vrot.lane.b32.xlu1 %v3008_v26, %s4292_s24  ;;  %2939 = vrot.lane.b32.xlu2 %v2932_v56, %s4292_s24  ;;  %v568_v10 = vadd.f32 %v8061_v59, %v510_v23  ;;  %v746_v58 = vadd.f32 %v8062_v45, %v590_v18  ;;  %v2967_v28 = vrot.slane %v2954_v20, 2  ;;  %v6397_v32 = vstv %s6325_s17  ;;  %v8071_v18 = vld [vmem:[#allocation38_spill] sm:$0xff]  ;;  %v6412_v59 = vld [vmem:[#allocation2 + $0x20] sm:$0xff] }
 0x3b4   :  { %8059 = vst [vmem:[#allocation274_spill] sm:$0xff] %v6357_v21  ;;  %v2998_v53 = vmul.f32 %v6388_v54, %v6302_v36  ;;  %v566_v37 = vadd.f32 %v8065_v0, %v508_v17  ;;  %v747_v30 = vadd.f32 %v8066_v16, %v591_v24  ;;  %v748_v7 = vadd.f32 %v8068_v34, %v592_v2  ;;  %v8074_v2 = vld [vmem:[#allocation43_spill] sm:$0xff]  ;;  %v8075_v0 = vld [vmem:[#allocation41_spill] sm:$0xff] }
 0x3b5   :  { %2978 = vrot.lane.b32.xlu0 %v2971_v50, %s4292_s24  ;;  %v6384_v51 = vpop.permute.xlu1 %2682  ;;  %v6386_v4 = vpop.permute.xlu2 %2684  ;;  %v6403_v5 = vadd.f32 %v8069_v61, %v746_v58  ;;  %v749_v23 = vadd.f32 %v8070_v11, %v593_v29  ;;  %v3006_v56 = vrot.slane %v6370_v14, 2  ;;  %v707_v17 = vadd.f32 %v8071_v18, %v565_v1  ;;  %v8072_v50 = vld [vmem:[#allocation39_spill] sm:$0xff]  ;;  %v8076_v1 = vld [vmem:[#allocation52_spill] sm:$0xff] }
 0x3b6   :  { %8063 = vst [vmem:[#allocation17_spill] sm:$0xff] %v6384_v51  ;;  %v6409_v24 = vadd.f32 %v8072_v50, %v747_v30  ;;  %v708_v20 = vadd.f32 %v8073_v8, %v566_v37  ;;  %v6416_v45 = vmul.f32 %v6412_v59, %v6302_v36  ;;  %v709_v58 = vadd.f32 %v8074_v2, %v567_v48  ;;  %v8077_v30 = vld [vmem:[#allocation50_spill] sm:$0xff]  ;;  %v6427_v11 = vld [vmem:[#allocation3 + $0x8] sm:$0xff]  ;;  %v8078_v48 = vld [vmem:[#allocation51_spill] sm:$0xff] }
 0x3b7   :  { %8064 = vst [vmem:[#allocation18_spill] sm:$0xff] %v6386_v4  ;;  %v6394_v62 = vpop.permute.xlu0 %2639  ;;  %v710_v16 = vadd.f32 %v8075_v0, %v568_v10  ;;  %v3013_v29 = vrot.slane %v2998_v53, 2  ;;  %v3042_v14 = vmul.f32 %v6357_v21, %v6397_v32  ;;  %v883_v34 = vadd.f32 %v8076_v1, %v707_v17  ;;  %v8079_v53 = vld [vmem:[#allocation53_spill] sm:$0xff]  ;;  %v8083_v0 = vld [vmem:[#allocation58_spill] sm:$0xff] }
 0x3b8   :  { %8067 = vst [vmem:[#allocation33_spill] sm:$0xff] %v6394_v62  ;;  %v884_v61 = vadd.f32 %v8077_v30, %v708_v20  ;;  %v2968_v37 = vsel %vm218_vm3, %v2965_v6, %v2967_v28  ;;  %v6431_v18 = vmul.f32 %v6427_v11, %v6397_v32  ;;  %v6434_v10 = vadd.f32 %v8078_v48, %v709_v58  ;;  %v8081_v28 = vld [vmem:[#allocation73_spill] sm:$0xff]  ;;  %v8086_v48 = vld [vmem:[#allocation75_spill] sm:$0xff] }
 0x3b9   :  { %v6437_v50 = vadd.f32 %v8079_v53, %v749_v23  ;;  %v3009_v17 = vsel %vm218_vm3, %v3006_v56, %v3008_v26  ;;  %v1059_v6 = vadd.f32 %v8080_v39, %v883_v34  ;;  %v3011_v20 = vrot.slane %v6416_v45, 2  ;;  %v8082_v23 = vld [vmem:[#allocation55_spill] sm:$0xff]  ;;  %v8085_v45 = vld [vmem:[#allocation74_spill] sm:$0xff] }
 0x3ba   :  { %v1060_v8 = vadd.f32 %v8081_v28, %v884_v61  ;;  %v2993_v2 = vmul.f32 %v6338_v27, %v6302_v36  ;;  %v886_v58 = vadd.f32 %v8082_v23, %v710_v16  ;;  %v6450_v26 = vadd.f32 %v8083_v0, %v748_v7  ;;  %v8089_v0 = vld [vmem:[#allocation95_spill] sm:$0xff] }
 0x3bb   :  { %3025 = vrot.lane.b32.xlu1 %v3013_v29, %s4292_s24  ;;  %2976 = vrot.lane.b32.xlu2 %v2968_v37, %s4292_s24  ;;  %v3055_v34 = vrot.slane %v3042_v14, 2  ;;  %v6458_v61 = vmul.f32 %v6279_v49, %v6397_v32  ;;  %v1125_v37 = vadd.f32 %v8085_v45, %v1059_v6  ;;  %v3053_v7 = vrot.slane %v6431_v18, 2  ;;  %v6472_v14 = vld [vmem:[#allocation3 + $0x20] sm:$0xff]  ;;  %v8090_v45 = vld [vmem:[#allocation100_spill] sm:$0xff] }
 0x3bc   :  { %v1126_v53 = vadd.f32 %v8086_v48, %v1060_v8  ;;  %v6468_v16 = vstv %s6399_s0  ;;  %v2996_v39 = vmul.f32 %v6304_v43, %v6302_v36  ;;  %v6476_v28 = vmul.f32 %v6472_v14, %v6397_v32  ;;  %v8088_v8 = vld [vmem:[#allocation261_spill] sm:$0xff] }
 0x3bd   :  { %3017 = vrot.lane.b32.xlu0 %v3009_v17, %s4292_s24  ;;  %v6452_v1 = vpop.permute.xlu1 %2688  ;;  %v6454_v30 = vpop.permute.xlu2 %2727  ;;  %v6480_v6 = vmul.f32 %v6412_v59, %v6468_v16  ;;  %v3040_v23 = vmul.f32 %v8088_v8, %v6397_v32  ;;  %v1267_v48 = vadd.f32 %v8090_v45, %v1125_v37  ;;  %v3005_v36 = vrot.slane %v2993_v2, 2 }
 0x3be   :  { %8084 = vst [vmem:[#allocation25_spill] sm:$0xff] %v6452_v1  ;;  %v1268_v18 = vadd.f32 %v8089_v0, %v1126_v53  ;;  %v3060_v62 = vrot.slane %v6458_v61, 2  ;;  %v3092_v51 = vmul.f32 %v6304_v43, %v6468_v16  ;;  %v6492_v55 = vmul.f32 %v6271_v57, %v6468_v16  ;;  %v8092_v53 = vld [vmem:[#allocation121_spill] sm:$0xff]  ;;  %v8098_v1 = vld [vmem:[#allocation78_spill] sm:$0xff] }
 0x3bf   :  { %v6464_v17 = vpop.permute.xlu0 %2680  ;;  %v3091_v60 = vmul.f32 %v6275_v42, %v6468_v16  ;;  %v1443_v40 = vadd.f32 %v8091_v41, %v1267_v48  ;;  %v3007_v37 = vsel %vm218_vm3, %v3005_v36, %v3006_v56  ;;  %v3010_v2 = vrot.slane %v2996_v39, 2  ;;  %v8094_v41 = vld [vmem:[#allocation76_spill] sm:$0xff]  ;;  %v8095_v48 = vld [vmem:[#allocation134_spill] sm:$0xff]  ;;  %v8096_v36 = vld [vmem:[#allocation135_spill] sm:$0xff] }
 0x3c0   :  { %8087 = vst [vmem:[#allocation34_spill] sm:$0xff] %v6464_v17  ;;  %v3014_v17 = vsel %vm218_vm3, %v3011_v20, %v3013_v29  ;;  %v1444_v0 = vadd.f32 %v8092_v53, %v1268_v18  ;;  %v3056_v29 = vsel %vm218_vm3, %v3053_v7, %v3055_v34  ;;  %v3052_v44 = vrot.slane %v3040_v23, 2 }
 0x3c1   :  { %v1062_v4 = vadd.f32 %v8093_v46, %v886_v58  ;;  %v1098_v18 = vadd.f32 %v8094_v41, %v6403_v5  ;;  %v1619_v56 = vadd.f32 %v8095_v48, %v1443_v40  ;;  %v3106_v39 = vrot.slane %v3092_v51, 4  ;;  %v8097_v46 = vld [vmem:[#allocation77_spill] sm:$0xff]  ;;  %v8099_v41 = vld [vmem:[#allocation143_spill] sm:$0xff]  ;;  %v8100_v48 = vld [vmem:[#allocation148_spill] sm:$0xff] }
 0x3c2   :  { %v1620_v53 = vadd.f32 %v8096_v36, %v1444_v0  ;;  %v3104_v45 = vrot.slane %v3091_v60, 4  ;;  %v6516_v23 = vstv %s6460_s1  ;;  %v8102_v19 = vrot.slane %v6476_v28, 2 }
 0x3c3   :  { %3066 = vrot.lane.b32.xlu1 %v3055_v34, %s4292_s24  ;;  %3015 = vrot.lane.b32.xlu2 %v3007_v37, %s4292_s24  ;;  %v1128_v58 = vadd.f32 %v8097_v46, %v1062_v4  ;;  %v1150_v5 = vadd.f32 %v8098_v1, %v1098_v18  ;;  %v1685_v0 = vadd.f32 %v8100_v48, %v1619_v56  ;;  %v8103_v60 = vrot.slane %v6480_v6, 4  ;;  %v8104_v1 = vld [vmem:[#allocation98_spill] sm:$0xff]  ;;  %v8107_v48 = vld [vmem:[#allocation169_spill] sm:$0xff] }
 0x3c4   :  { %v1686_v40 = vadd.f32 %v8099_v41, %v1620_v53  ;;  %v6528_v51 = vsel %vm218_vm3, %v8102_v19, %v3060_v62  ;;  %v3054_v4 = vsel %vm218_vm3, %v3052_v44, %v3053_v7  ;;  %v8105_v53 = vld [vmem:[#allocation103_spill] sm:$0xff]  ;;  %v8106_v56 = vld [vmem:[#allocation162_spill] sm:$0xff]  ;;  %v6545_v19 = vmul.f32 %v6427_v11, %v6516_v23 }
 0x3c5   :  { %3023 = vrot.lane.b32.xlu0 %v3014_v17, %s4292_s24  ;;  %v6510_v34 = vpop.permute.xlu1 %2731  ;;  %v6512_v37 = vpop.permute.xlu2 %2733  ;;  %v3012_v17 = vsel %vm218_vm3, %v3010_v2, %v3011_v20  ;;  %v3108_v61 = vsel %vm355_vm4, %v3106_v39, %v8103_v60  ;;  %v1306_v18 = vadd.f32 %v8104_v1, %v1150_v5  ;;  %v1270_v46 = vadd.f32 %v8105_v53, %v1128_v58  ;;  %v8109_v39 = vld [vmem:[#allocation117_spill] sm:$0xff]  ;;  %v8110_v5 = vld [vmem:[#allocation124_spill] sm:$0xff] }
 0x3c6   :  { %v1827_v41 = vadd.f32 %v8106_v56, %v1685_v0  ;;  %v8108_v20 = vrot.slane %v6492_v55, 4  ;;  %v6549_v44 = vmul.f32 %v6357_v21, %v6516_v23  ;;  %v6553_v7 = vmul.f32 %v6292_v47, %v6397_v32  ;;  %v8111_v0 = vld [vmem:[#allocation182_spill] sm:$0xff]  ;;  %v8113_v53 = vld [vmem:[#allocation72_spill] sm:$0xff] }
 0x3c7   :  { %v6522_v36 = vpop.permute.xlu0 %2686  ;;  %v1446_v58 = vadd.f32 %v8109_v39, %v1270_v46  ;;  %v1100_v56 = vadd.f32 %v8113_v53, %v6450_v26  ;;  %v6567_v32 = vmul.f32 %v8088_v8, %v6516_v23  ;;  %v8117_v39 = vld [vmem:[#allocation203_spill] sm:$0xff]  ;;  %v8118_v26 = vld [vmem:[#allocation208_spill] sm:$0xff]  ;;  %v8121_v53 = vld [vmem:[#allocation81_spill] sm:$0xff] }
 0x3c8   :  { %8101 = vst [vmem:[#allocation26_spill] sm:$0xff] %v6522_v36  ;;  %v1828_v36 = vadd.f32 %v8107_v48, %v1686_v40  ;;  %v6541_v2 = vsel %vm355_vm4, %v8108_v20, %v3104_v45  ;;  %v1482_v40 = vadd.f32 %v8110_v5, %v1306_v18  ;;  %v2003_v60 = vadd.f32 %v8111_v0, %v1827_v41  ;;  %v8112_v45 = vld [vmem:[#allocation183_spill] sm:$0xff]  ;;  %v8115_v18 = vld [vmem:[#allocation137_spill] sm:$0xff]  ;;  %v8116_v41 = vld [vmem:[#allocation138_spill] sm:$0xff] }
 0x3c9   :  { %v8114_v48 = vld [vmem:[#allocation79_spill] sm:$0xff]  ;;  %v1622_v46 = vadd.f32 %v8115_v18, %v1446_v58  ;;  %v8131_v58 = vld [vmem:[#allocation172_spill] sm:$0xff] }
 0x3ca   :  { %v2004_v1 = vadd.f32 %v8112_v45, %v1828_v36  ;;  %v1101_v20 = vadd.f32 %v8114_v48, %v6437_v50  ;;  %v1658_v36 = vadd.f32 %v8116_v41, %v1482_v40  ;;  %v2179_v0 = vadd.f32 %v8118_v26, %v2003_v60  ;;  %v8123_v40 = vld [vmem:[#allocation146_spill] sm:$0xff] }
 0x3cb   :  { %3072 = vrot.lane.b32.xlu1 %v3060_v62, %s4292_s24  ;;  %3021 = vrot.lane.b32.xlu2 %v3012_v17, %s4292_s24  ;;  %v8119_v62 = vld [vmem:[#allocation68_spill] sm:$0xff]  ;;  %v8125_v60 = vld [vmem:[#allocation210_spill] sm:$0xff] }
 0x3cc   :  { %v2180_v5 = vadd.f32 %v8117_v39, %v2004_v1  ;;  %v1061_v50 = vadd.f32 %v8119_v62, %v6434_v10  ;;  %v8120_v17 = vld [vmem:[#allocation80_spill] sm:$0xff]  ;;  %v1153_v48 = vadd.f32 %v8121_v53, %v1101_v20  ;;  %v1710_v18 = vadd.f32 %v8123_v40, %v1658_v36  ;;  %v8124_v1 = vld [vmem:[#allocation151_spill] sm:$0xff]  ;;  %v8127_v10 = vld [vmem:[#allocation82_spill] sm:$0xff] }
 0x3cd   :  { %3064 = vrot.lane.b32.xlu0 %v3056_v29, %s4292_s24  ;;  %v1152_v45 = vadd.f32 %v8120_v17, %v1100_v56  ;;  %v6580_v21 = vpop.permute.xlu1 %2768  ;;  %v6582_v9 = vpop.permute.xlu2 %2770  ;;  %v1688_v41 = vadd.f32 %v8124_v1, %v1622_v46  ;;  %v2245_v39 = vadd.f32 %v8125_v60, %v2179_v0  ;;  %v8126_v29 = vld [vmem:[#allocation217_spill] sm:$0xff]  ;;  %v8129_v20 = vld [vmem:[#allocation106_spill] sm:$0xff]  ;;  %v8133_v40 = vld [vmem:[#allocation231_spill] sm:$0xff] }
 0x3ce   :  { %8122 = vst [vmem:[#allocation35_spill] sm:$0xff] %v6580_v21  ;;  %v2246_v26 = vadd.f32 %v8126_v29, %v2180_v5  ;;  %v1127_v62 = vadd.f32 %v8127_v10, %v1061_v50  ;;  %v8128_v56 = vld [vmem:[#allocation101_spill] sm:$0xff]  ;;  %v3143_v21 = vrot.slane %v6549_v44, 4  ;;  %v1866_v12 = vadd.f32 %v8131_v58, %v1710_v18  ;;  %v8132_v36 = vld [vmem:[#allocation230_spill] sm:$0xff]  ;;  %v8134_v1 = vld [vmem:[#allocation96_spill] sm:$0xff] }
 0x3cf   :  { %v2730_v38 = vpop.permute.xlu0 %2729  ;;  %v1309_v17 = vadd.f32 %v8128_v56, %v1153_v48  ;;  %v1308_v53 = vadd.f32 %v8129_v20, %v1152_v45  ;;  %v1830_v25 = vadd.f32 %v8130_v33, %v1688_v41  ;;  %v2387_v46 = vadd.f32 %v8132_v36, %v2245_v39  ;;  %v8135_v60 = vld [vmem:[#allocation120_spill] sm:$0xff]  ;;  %v8136_v50 = vld [vmem:[#allocation127_spill] sm:$0xff]  ;;  %v8137_v45 = vld [vmem:[#allocation185_spill] sm:$0xff] }
 0x3d0   :  { %v2388_v0 = vadd.f32 %v8133_v40, %v2246_v26  ;;  %v1269_v5 = vadd.f32 %v8134_v1, %v1127_v62  ;;  %v3057_v48 = vrot.slane %v6553_v7, 2  ;;  %v8138_v44 = vld [vmem:[#allocation186_spill] sm:$0xff]  ;;  %v8140_v58 = vld [vmem:[#allocation260_spill] sm:$0xff]  ;;  %v8143_v40 = vld [vmem:[#allocation141_spill] sm:$0xff] }
 0x3d1   :  { %v1484_v29 = vadd.f32 %v8135_v60, %v1308_v53  ;;  %v1485_v10 = vadd.f32 %v8136_v50, %v1309_v17  ;;  %v2006_v56 = vadd.f32 %v8137_v45, %v1830_v25  ;;  %v2042_v20 = vadd.f32 %v8138_v44, %v1866_v12  ;;  %v8139_v33 = vld [vmem:[#allocation254_spill] sm:$0xff]  ;;  %v8142_v36 = vld [vmem:[#allocation140_spill] sm:$0xff]  ;;  %v8145_v53 = vld [vmem:[#allocation211_spill] sm:$0xff] }
 0x3d2   :  { %v2564_v41 = vadd.f32 %v8139_v33, %v2388_v0  ;;  %v2563_v18 = vadd.f32 %v8140_v58, %v2387_v46  ;;  %v1445_v39 = vadd.f32 %v8141_v31, %v1269_v5  ;;  %v6611_v17 = vstv %s6569_s20  ;;  %v8144_v7 = vld [vmem:[#allocation206_spill] sm:$0xff]  ;;  %v8146_v31 = vld [vmem:[#allocation71_spill] sm:$0xff]  ;;  %v8150_v44 = vld [vmem:[#allocation213_spill] sm:$0xff] }
 0x3d3   :  { %v1660_v26 = vadd.f32 %v8142_v36, %v1484_v29  ;;  %v1661_v62 = vadd.f32 %v8143_v40, %v1485_v10  ;;  %3115 = vrot.lane.b32.xlu1 %v3108_v61, %s4292_s24  ;;  %3062 = vrot.lane.b32.xlu2 %v3054_v4, %s4292_s24  ;;  %v2218_v25 = vadd.f32 %v8144_v7, %v2042_v20  ;;  %v8147_v5 = vld [vmem:[#allocation142_spill] sm:$0xff]  ;;  %v8148_v61 = vld [vmem:[#allocation149_spill] sm:$0xff]  ;;  %v8155_v40 = vld [vmem:[#allocation168_spill] sm:$0xff] }
 0x3d4   :  { %v2182_v12 = vadd.f32 %v8145_v53, %v2006_v56  ;;  %v2739_v0 = vadd.f32 %v6454_v30, %v2563_v18  ;;  %v2740_v1 = vadd.f32 %v2730_v38, %v2564_v41  ;;  %v1099_v46 = vadd.f32 %v8146_v31, %v6409_v24  ;;  %v8149_v4 = vld [vmem:[#allocation154_spill] sm:$0xff]  ;;  %v8151_v56 = vld [vmem:[#allocation220_spill] sm:$0xff]  ;;  %v8156_v7 = vld [vmem:[#allocation175_spill] sm:$0xff] }
 0x3d5   :  { %3070 = vrot.lane.b32.xlu0 %v6528_v51, %s4292_s24  ;;  %v1621_v60 = vadd.f32 %v8147_v5, %v1445_v39  ;;  %v1713_v29 = vadd.f32 %v8148_v61, %v1661_v62  ;;  %v1712_v50 = vadd.f32 %v8149_v4, %v1660_v26  ;;  %v2794_v10 = vpop.permute.xlu1 %2793  ;;  %v2796_v45 = vpop.permute.xlu2 %2795  ;;  %v2270_v33 = vadd.f32 %v8151_v56, %v2218_v25  ;;  %v8152_v51 = vld [vmem:[#allocation85_spill] sm:$0xff]  ;;  %v8153_v24 = vld [vmem:[#allocation144_spill] sm:$0xff]  ;;  %v8159_v31 = vld [vmem:[#allocation99_spill] sm:$0xff] }
 0x3d6   :  { %v2248_v20 = vadd.f32 %v8150_v44, %v2182_v12  ;;  %v6625_v38 = vadd.f32 %v2794_v10, %v2739_v0  ;;  %v6627_v41 = vadd.f32 %v2796_v45, %v2740_v1  ;;  %v1151_v58 = vadd.f32 %v8152_v51, %v1099_v46  ;;  %v8157_v53 = vld [vmem:[#allocation233_spill] sm:$0xff]  ;;  %v8158_v0 = vld [vmem:[#allocation234_spill] sm:$0xff]  ;;  %v8160_v46 = vld [vmem:[#allocation164_spill] sm:$0xff] }
 0x3d7   :  { %v2767_v30 = vpop.permute.xlu0 %2766  ;;  %v1687_v18 = vadd.f32 %v8153_v24, %v1621_v60  ;;  %v8154_v39 = vrot.slane %v6545_v19, 4  ;;  %v3089_v26 = vmul.f32 %v6338_v27, %v6468_v16  ;;  %v1868_v62 = vadd.f32 %v8155_v40, %v1712_v50  ;;  %v8162_v10 = vld [vmem:[#allocation188_spill] sm:$0xff]  ;;  %v8163_v45 = vld [vmem:[#allocation189_spill] sm:$0xff]  ;;  %v8164_v44 = vld [vmem:[#allocation258_spill] sm:$0xff] }
 0x3d8   :  { %v1869_v25 = vadd.f32 %v8156_v7, %v1713_v29  ;;  %v2390_v12 = vadd.f32 %v8157_v53, %v2248_v20  ;;  %v2426_v1 = vadd.f32 %v8158_v0, %v2270_v33  ;;  %v1307_v5 = vadd.f32 %v8159_v31, %v1151_v58  ;;  %v8165_v33 = vld [vmem:[#allocation119_spill] sm:$0xff]  ;;  %v8166_v58 = vld [vmem:[#allocation190_spill] sm:$0xff] }
 0x3d9   :  { %v3144_v36 = vsel %vm355_vm4, %v8154_v39, %v3143_v21  ;;  %v1829_v61 = vadd.f32 %v8160_v46, %v1687_v18  ;;  %v8161_v60 = vrot.slane %v6476_v28, 2  ;;  %v6647_v21 = vmul.f32 %v6271_v57, %v6611_v17  ;;  %v8167_v18 = vld [vmem:[#allocation209_spill] sm:$0xff]  ;;  %v8168_v40 = vld [vmem:[#allocation214_spill] sm:$0xff] }
 0x3da   :  { %v2044_v50 = vadd.f32 %v8162_v10, %v1868_v62  ;;  %v2045_v29 = vadd.f32 %v8163_v45, %v1869_v25  ;;  %v2602_v20 = vadd.f32 %v8164_v44, %v2426_v1  ;;  %v2566_v56 = vadd.f32 %v6175_v35, %v2390_v12  ;;  %v8169_v25 = vld [vmem:[#allocation145_spill] sm:$0xff] }
 0x3db   :  { %v3059_v4 = vsel %vm218_vm3, %v3057_v48, %v8161_v60  ;;  %v1483_v51 = vadd.f32 %v8165_v33, %v1307_v5  ;;  %v2005_v24 = vadd.f32 %v8166_v58, %v1829_v61  ;;  %3152 = vrot.lane.b32.xlu1 %v3144_v36, %s4292_s24  ;;  %v3140_v28 = vrot.slane %v6567_v32, 4  ;;  %v8170_v36 = vld [vmem:[#allocation204_spill] sm:$0xff]  ;;  %v8172_v61 = vld [vmem:[#allocation223_spill] sm:$0xff] }
 0x3dc   :  { %3068 = vrot.lane.b32.xlu2 %v3059_v4, %s4292_s24  ;;  %v3169_v48 = vmul.f32 %v6338_v27, %v6611_v17  ;;  %v2221_v39 = vadd.f32 %v8167_v18, %v2045_v29  ;;  %v2220_v62 = vadd.f32 %v8168_v40, %v2044_v50  ;;  %v2742_v7 = vadd.f32 %v6512_v37, %v2566_v56  ;;  %v8171_v5 = vld [vmem:[#allocation216_spill] sm:$0xff]  ;;  %v8173_v4 = vld [vmem:[#allocation147_spill] sm:$0xff] }
 0x3dd   :  { %v2778_v35 = vadd.f32 %v2767_v30, %v2602_v20  ;;  %3113 = vrot.lane.b32.xlu0 %v6541_v2, %s4292_s24  ;;  %v1659_v53 = vadd.f32 %v8169_v25, %v1483_v51  ;;  %v2181_v12 = vadd.f32 %v8170_v36, %v2005_v24  ;;  %v2800_v0 = vpop.permute.xlu1 %2799  ;;  %v2819_v1 = vpop.permute.xlu2 %2818  ;;  %v3182_v32 = vrot.slane %v6647_v21, 4  ;;  %v8174_v50 = vld [vmem:[#allocation212_spill] sm:$0xff]  ;;  %v8177_v51 = vld [vmem:[#allocation237_spill] sm:$0xff] }
 0x3de   :  { %v6670_v31 = vmul.f32 %v6472_v14, %v6516_v23  ;;  %v2272_v46 = vadd.f32 %v8171_v5, %v2220_v62  ;;  %v2273_v37 = vadd.f32 %v8172_v61, %v2221_v39  ;;  %v6674_v60 = vadd.f32 %v2800_v0, %v2742_v7  ;;  %v8176_v56 = vld [vmem:[#allocation236_spill] sm:$0xff]  ;;  %v8178_v39 = vld [vmem:[#allocation167_spill] sm:$0xff]  ;;  %v8179_v62 = vld [vmem:[#allocation238_spill] sm:$0xff] }
 0x3df   :  { %v2773_v30 = vpop.permute.xlu0 %2772  ;;  %v6676_v2 = vadd.f32 %v2819_v1, %v2778_v35  ;;  %v1711_v10 = vadd.f32 %v8173_v4, %v1659_v53  ;;  %v2247_v45 = vadd.f32 %v8174_v50, %v2181_v12  ;;  %v8175_v29 = vrot.slane %v6545_v19, 4  ;;  %v8181_v36 = vld [vmem:[#allocation193_spill] sm:$0xff] }
 0x3e0   :  { %v3101_v20 = vrot.slane %v3089_v26, 4  ;;  %v2428_v33 = vadd.f32 %v8176_v56, %v2272_v46  ;;  %v2429_v58 = vadd.f32 %v8177_v51, %v2273_v37  ;;  %v3181_v24 = vrot.slane %v3169_v48, 4  ;;  %v8183_v46 = vld [vmem:[#allocation207_spill] sm:$0xff] }
 0x3e1   :  { %v3142_v44 = vsel %vm355_vm4, %v3140_v28, %v8175_v29  ;;  %v3133_v18 = vmul.f32 %v6279_v49, %v6516_v23  ;;  %v1867_v40 = vadd.f32 %v8178_v39, %v1711_v10  ;;  %v2389_v7 = vadd.f32 %v8179_v62, %v2247_v45 }
 0x3e2   :  { %v8180_v35 = vrot.slane %v6492_v55, 4  ;;  %v6696_v26 = vmul.f32 %v6412_v59, %v6611_v17  ;;  %v2605_v28 = vadd.f32 %v6165_v22, %v2429_v58  ;;  %v2604_v25 = vadd.f32 %v6254_v52, %v2428_v33  ;;  %v8182_v55 = vld [vmem:[#allocation255_spill] sm:$0xff] }
 0x3e3   :  { %v3183_v48 = vsel %vm355_vm4, %v3181_v24, %v3182_v32  ;;  %v3094_v53 = vmul.f32 %v6388_v54, %v6468_v16  ;;  %v2043_v12 = vadd.f32 %v8181_v36, %v1867_v40  ;;  %v2565_v0 = vadd.f32 %v8182_v55, %v2389_v7  ;;  %v8184_v33 = vld [vmem:[#allocation215_spill] sm:$0xff]  ;;  %v8185_v7 = vld [vmem:[#allocation241_spill] sm:$0xff] }
 0x3e4   :  { %v3103_v19 = vsel %vm355_vm4, %v3101_v20, %v8180_v35  ;;  %3191 = vrot.lane.b32.xlu1 %v3183_v48, %s4292_s24  ;;  %v3172_v22 = vmul.f32 %v6304_v43, %v6611_v17  ;;  %v271_v52 = vmul.f32 %v6338_v27, %v6329_v3  ;;  %v6715_v1 = vmul.f32 %v6275_v42, %v6329_v3  ;;  %v8187_v36 = vld [vmem:[#allocation271_spill] sm:$0xff] }
 0x3e5   :  { %3111 = vrot.lane.b32.xlu2 %v3103_v19, %s4292_s24  ;;  %v2780_v16 = vadd.f32 %v6582_v9, %v2604_v25  ;;  %v2781_v5 = vadd.f32 %v2773_v30, %v2605_v28  ;;  %3150 = vrot.lane.b32.xlu0 %v3142_v44, %s4292_s24  ;;  %v2219_v61 = vadd.f32 %v8183_v46, %v2043_v12  ;;  %v2823_v4 = vpop.permute.xlu1 %2822  ;;  %v2825_v10 = vpop.permute.xlu2 %2824  ;;  %v3146_v50 = vrot.slane %v6670_v31, 4  ;;  %v8188_v12 = vld [vmem:[#allocation257_spill] sm:$0xff] }
 0x3e6   :  { %v2741_v37 = vadd.f32 %v6510_v34, %v2565_v0  ;;  %v7770_v45 = vrot.slane %v6696_v26, 4  ;;  %v3148_v9 = vrot.slane %v3133_v18, 4  ;;  %v3109_v30 = vrot.slane %v3094_v53, 4 }
 0x3e7   :  { %v2798_v29 = vpop.permute.xlu0 %2797  ;;  %v6723_v20 = vadd.f32 %v2823_v4, %v2780_v16  ;;  %v6725_v56 = vadd.f32 %v2825_v10, %v2781_v5  ;;  %v2271_v51 = vadd.f32 %v8184_v33, %v2219_v61  ;;  %v3186_v58 = vrot.slane %v3172_v22, 4  ;;  %v8190_v22 = vld [vmem:[#allocation273_spill] sm:$0xff]  ;;  %v8191_v16 = vld [vmem:[#allocation259_spill] sm:$0xff] }
 0x3e8   :  { %v6728_v44 = vadd.f32 %v2798_v29, %v2741_v37  ;;  %v6731_v24 = vstv %s6683_s21  ;;  %v284_v34 = vrot.slane %v6346_v15, 2  ;;  %v408_v31 = vmul.f32 %v6338_v27, %v6336_v13  ;;  %v8192_v37 = vld [vmem:[#allocation262_spill] sm:$0xff]  ;;  %v8193_v4 = vld [vmem:[#allocation15_spill] sm:$0xff] }
 0x3e9   :  { %v179_v39 = vmul.f32 %v6271_v57, %v6298_v63  ;;  %v7771_v40 = vrot.slane %v6715_v1, 2  ;;  %v283_v62 = vrot.slane %v271_v52, 2  ;;  %v6741_v18 = vmul.f32 %v6275_v42, %v6336_v13  ;;  %v8194_v29 = vld [vmem:[#allocation22_spill] sm:$0xff] }
 0x3ea   :  { %v2427_v35 = vadd.f32 %v8185_v7, %v2271_v51  ;;  %v3188_v19 = vsel %vm355_vm4, %v3186_v58, %v7770_v45  ;;  %v8186_v15 = vrot.slane %v6480_v6, 4  ;;  %v3216_v25 = vmul.f32 %v8088_v8, %v6731_v24 }
 0x3eb   :  { %v6754_v48 = vmul.f32 %v6427_v11, %v6731_v24  ;;  %v3131_v53 = vmul.f32 %v6292_v47, %v6516_v23  ;;  %v8189_v55 = vrot.slane %v8188_v12, 4  ;;  %v421_v52 = vrot.slane %v8190_v22, 4  ;;  %v8197_v12 = vld [vmem:[#allocation32_spill] sm:$0xff]  ;;  %v8198_v22 = vld [vmem:[#allocation265_spill] sm:$0xff] }
 0x3ec   :  { %v3110_v28 = vsel %vm355_vm4, %v8186_v15, %v3109_v30  ;;  %v2603_v6 = vadd.f32 %v8191_v16, %v2427_v35  ;;  %v3149_v5 = vsel %vm355_vm4, %v3146_v50, %v3148_v9  ;;  %3197 = vrot.lane.b32.xlu1 %v3188_v19, %s4292_s24  ;;  %v285_v8 = vsel %vm218_vm3, %v283_v62, %v284_v34  ;;  %v8195_v30 = vld [vmem:[#allocation35_spill] sm:$0xff] }
 0x3ed   :  { %v476_v0 = vadd.f32 %v8189_v55, %v8187_v36  ;;  %3117 = vrot.lane.b32.xlu2 %v3110_v28, %s4292_s24  ;;  %v420_v46 = vrot.slane %v408_v31, 4  ;;  %v287_v23 = vsel %vm218_vm3, %v284_v34, %v7771_v40  ;;  %v6772_v61 = vmul.f32 %v6412_v59, %v6329_v3  ;;  %3156 = vrot.lane.b32.xlu0 %v3149_v5, %s4292_s24  ;;  %v6779_v51 = vpop.permute.xlu1 %2851  ;;  %v6781_v58 = vpop.permute.xlu2 %2853  ;;  %v8196_v28 = vld [vmem:[#allocation30_spill] sm:$0xff]  ;;  %v8199_v16 = vld [vmem:[#allocation247_spill] sm:$0xff] }
 0x3ee   :  { %v668_v10 = vadd.f32 %v8193_v4, %v8192_v37  ;;  %v2779_v33 = vadd.f32 %v8195_v30, %v2603_v6  ;;  %v3171_v34 = vmul.f32 %v6275_v42, %v6611_v17  ;;  %v7773_v31 = vrot.slane %v6741_v18, 4  ;;  %v8201_v37 = vld [vmem:[#allocation272_spill] sm:$0xff]  ;;  %v8202_v30 = vld [vmem:[#allocation65_spill] sm:$0xff]  ;;  %v8203_v40 = vld [vmem:[#allocation70_spill] sm:$0xff] }
 0x3ef   :  { %v669_v9 = vadd.f32 %v8194_v29, %v476_v0  ;;  %v2821_v62 = vpop.permute.xlu0 %2820  ;;  %v3228_v7 = vrot.slane %v3216_v25, 4  ;;  %v7772_v35 = vrot.slane %v6754_v48, 4  ;;  %v3145_v19 = vrot.slane %v3131_v53, 4 }
 0x3f0   :  { %v274_v15 = vmul.f32 %v6304_v43, %v6329_v3  ;;  %v844_v55 = vadd.f32 %v8197_v12, %v668_v10  ;;  %v6791_v0 = vadd.f32 %v2821_v62, %v2779_v33  ;;  %v8200_v6 = vrot.slane %v8199_v16, 4  ;;  %v8204_v62 = vld [vmem:[#allocation92_spill] sm:$0xff]  ;;  %v8207_v16 = vld [vmem:[#allocation113_spill] sm:$0xff] }
 0x3f1   :  { %v845_v36 = vadd.f32 %v8196_v28, %v669_v9  ;;  %v299_v4 = vadd.f32 %v285_v8, %v8201_v37  ;;  %v422_v25 = vsel %vm355_vm4, %v420_v46, %v421_v52  ;;  %v300_v29 = vadd.f32 %v287_v23, %v179_v39  ;;  %v8208_v37 = vld [vmem:[#allocation118_spill] sm:$0xff] }
 0x3f2   :  { %v6796_v5 = vadd.f32 %v8200_v6, %v8198_v22  ;;  %v289_v53 = vrot.slane %v6772_v61, 2  ;;  %v1020_v9 = vadd.f32 %v8203_v40, %v844_v55  ;;  %v3184_v28 = vrot.slane %v3171_v34, 4 }
 0x3f3   :  { %v1021_v45 = vadd.f32 %v8202_v30, %v845_v36  ;;  %v3230_v10 = vsel %vm355_vm4, %v3228_v7, %v7772_v35  ;;  %v3147_v33 = vsel %vm355_vm4, %v3145_v19, %v3146_v50  ;;  %v3219_v8 = vmul.f32 %v6292_v47, %v6731_v24  ;;  %v8205_v19 = vld [vmem:[#allocation93_spill] sm:$0xff]  ;;  %v8209_v30 = vld [vmem:[#allocation264_spill] sm:$0xff] }
 0x3f4   :  { %v6813_v39 = vmul.f32 %v6472_v14, %v6731_v24  ;;  %v424_v40 = vsel %vm355_vm4, %v421_v52, %v7773_v31  ;;  %v288_v46 = vrot.slane %v274_v15, 2  ;;  %v411_v23 = vmul.f32 %v6304_v43, %v6336_v13  ;;  %3238 = vrot.lane.b32.xlu1 %v3230_v10, %s4292_s24 }
 0x3f5   :  { %v412_v61 = vmul.f32 %v6412_v59, %v6336_v13  ;;  %3154 = vrot.lane.b32.xlu2 %v3147_v33, %s4292_s24  ;;  %v6824_v50 = vadd.f32 %v422_v25, %v299_v4  ;;  %v276_v34 = vmul.f32 %v6388_v54, %v6329_v3  ;;  %v1228_v7 = vadd.f32 %v8204_v62, %v1020_v9  ;;  %v6836_v55 = vpop.permute.xlu1 %2857  ;;  %v6838_v22 = vpop.permute.xlu2 %2859  ;;  %v8210_v9 = vld [vmem:[#allocation16_spill] sm:$0xff] }
 0x3f6   :  { %v1229_v52 = vadd.f32 %v8205_v19, %v1021_v45  ;;  %3195 = vrot.lane.b32.xlu0 %v3184_v28, %s4292_s24  ;;  %v6831_v15 = vadd.f32 %v424_v40, %v300_v29  ;;  %v181_v36 = vmul.f32 %v6304_v43, %v6298_v63  ;;  %v290_v12 = vsel %vm218_vm3, %v288_v46, %v289_v53  ;;  %v8211_v19 = vld [vmem:[#allocation132_spill] sm:$0xff] }
 0x3f7   :  { %8206 = vst [vmem:[#allocation36_spill] sm:$0xff] %v6836_v55  ;;  %v3174_v3 = vmul.f32 %v6388_v54, %v6611_v17  ;;  %v1404_v45 = vadd.f32 %v8208_v37, %v1228_v7  ;;  %v6844_v4 = vpop.permute.xlu0 %2849  ;;  %v3233_v25 = vrot.slane %v3219_v8, 4  ;;  %v667_v10 = vadd.f32 %v8210_v9, %v8209_v30  ;;  %v8213_v7 = vld [vmem:[#allocation40_spill] sm:$0xff]  ;;  %v8215_v30 = vld [vmem:[#allocation166_spill] sm:$0xff] }
 0x3f8   :  { %v1405_v6 = vadd.f32 %v8207_v16, %v1229_v52  ;;  %v425_v33 = vrot.slane %v411_v23, 4  ;;  %v426_v40 = vrot.slane %v412_v61, 4  ;;  %v413_v46 = vmul.f32 %v6388_v54, %v6336_v13  ;;  %v8212_v16 = vld [vmem:[#allocation139_spill] sm:$0xff]  ;;  %v8214_v23 = vld [vmem:[#allocation161_spill] sm:$0xff] }
 0x3f9   :  { %v302_v62 = vadd.f32 %v290_v12, %v181_v36  ;;  %v291_v17 = vrot.slane %v276_v34, 2  ;;  %v1580_v52 = vadd.f32 %v8211_v19, %v1404_v45  ;;  %v843_v37 = vadd.f32 %v8213_v7, %v667_v10  ;;  %v8220_v19 = vld [vmem:[#allocation97_spill] sm:$0xff] }
 0x3fa   :  { %v1581_v35 = vadd.f32 %v8212_v16, %v1405_v6  ;;  %v3189_v31 = vrot.slane %v3174_v3, 4  ;;  %v3185_v8 = vsel %vm355_vm4, %v3182_v32, %v3184_v28  ;;  %v6858_v29 = vstv %s6803_s22  ;;  %v8217_v28 = vld [vmem:[#allocation63_spill] sm:$0xff]  ;;  %v8218_v6 = vld [vmem:[#allocation180_spill] sm:$0xff] }
 0x3fb   :  { %v1788_v9 = vadd.f32 %v8215_v30, %v1580_v52  ;;  %v8216_v13 = vrot.slane %v6813_v39, 4  ;;  %v6867_v36 = vmul.f32 %v6271_v57, %v6858_v29  ;;  %v427_v12 = vsel %vm355_vm4, %v425_v33, %v426_v40  ;;  %v8224_v30 = vld [vmem:[#allocation201_spill] sm:$0xff] }
 0x3fc   :  { %v1789_v61 = vadd.f32 %v8214_v23, %v1581_v35  ;;  %v182_v21 = vmul.f32 %v6412_v59, %v6298_v63  ;;  %v428_v32 = vrot.slane %v413_v46, 4  ;;  %v1019_v3 = vadd.f32 %v8217_v28, %v843_v37  ;;  %v8223_v23 = vld [vmem:[#allocation200_spill] sm:$0xff] }
 0x3fd   :  { %v3235_v34 = vsel %vm355_vm4, %v3233_v25, %v8216_v13  ;;  %3193 = vrot.lane.b32.xlu2 %v3185_v8, %s4292_s24  ;;  %v292_v35 = vsel %vm218_vm3, %v289_v53, %v291_v17  ;;  %v1964_v45 = vadd.f32 %v8218_v6, %v1788_v9  ;;  %v8219_v25 = vld [vmem:[#allocation187_spill] sm:$0xff]  ;;  %v3265_v57 = vmul.f32 %v6338_v27, %v6858_v29  ;;  %v6884_v16 = vpop.permute.xlu1 %2888  ;;  %v6886_v7 = vpop.permute.xlu2 %2890  ;;  %v8222_v53 = vld [vmem:[#allocation274_spill] sm:$0xff] }
 0x3fe   :  { %3244 = vrot.lane.b32.xlu1 %v3235_v34, %s4292_s24  ;;  %v1965_v10 = vadd.f32 %v8219_v25, %v1789_v61  ;;  %3201 = vrot.lane.b32.xlu0 %v3189_v31, %s4292_s24  ;;  %v439_v33 = vadd.f32 %v427_v12, %v302_v62  ;;  %v180_v46 = vmul.f32 %v6275_v42, %v6298_v63  ;;  %v3278_v9 = vrot.slane %v6867_v36, 6 }
 0x3ff   :  { %v1227_v52 = vadd.f32 %v8220_v19, %v1019_v3  ;;  %8221 = vst [vmem:[#allocation38_spill] sm:$0xff] %v6884_v16  ;;  %v3218_v37 = vmul.f32 %v8222_v53, %v6731_v24  ;;  %v183_v8 = vmul.f32 %v6388_v54, %v6298_v63  ;;  %v2140_v61 = vadd.f32 %v8223_v23, %v1964_v45  ;;  %v6894_v62 = vpop.permute.xlu0 %2855  ;;  %v8226_v3 = vld [vmem:[#allocation111_spill] sm:$0xff]  ;;  %v8227_v19 = vld [vmem:[#allocation228_spill] sm:$0xff] }
 0x400   :  { %v2141_v27 = vadd.f32 %v8224_v30, %v1965_v10  ;;  %v303_v13 = vadd.f32 %v292_v35, %v182_v21  ;;  %v429_v34 = vsel %vm355_vm4, %v426_v40, %v428_v32  ;;  %v8225_v12 = vrot.slane %v6715_v1, 2  ;;  %v8228_v63 = vld [vmem:[#allocation235_spill] sm:$0xff]  ;;  %v8231_v35 = vld [vmem:[#allocation249_spill] sm:$0xff] }
 0x401   :  { %v1403_v6 = vadd.f32 %v8226_v3, %v1227_v52  ;;  %v304_v25 = vadd.f32 %v291_v17, %v183_v8  ;;  %v2348_v16 = vadd.f32 %v8227_v19, %v2140_v61  ;;  %v3277_v45 = vrot.slane %v3265_v57, 6  ;;  %v8229_v10 = vld [vmem:[#allocation131_spill] sm:$0xff] }
 0x402   :  { %v301_v28 = vadd.f32 %v8225_v12, %v180_v46  ;;  %v2349_v55 = vadd.f32 %v8228_v63, %v2141_v27  ;;  %v3231_v30 = vrot.slane %v3218_v37, 4  ;;  %v8230_v21 = vrot.slane %v6696_v26, 4  ;;  %v8232_v46 = vld [vmem:[#allocation250_spill] sm:$0xff]  ;;  %v8233_v37 = vld [vmem:[#allocation20_spill] sm:$0xff]  ;;  %v8236_v12 = vld [vmem:[#allocation25_spill] sm:$0xff] }
 0x403   :  { %v1579_v23 = vadd.f32 %v8229_v10, %v1403_v6  ;;  %v6911_v1 = vmul.f32 %v6412_v59, %v6858_v29  ;;  %v2524_v17 = vadd.f32 %v8231_v35, %v2348_v16  ;;  %v3279_v57 = vsel %vm492_vm5, %v3277_v45, %v3278_v9  ;;  %v8237_v6 = vld [vmem:[#allocation26_spill] sm:$0xff]  ;;  %v8241_v45 = vld [vmem:[#allocation179_spill] sm:$0xff] }
 0x404   :  { %v3190_v40 = vsel %vm355_vm4, %v8230_v21, %v3189_v31  ;;  %v2525_v52 = vadd.f32 %v8232_v46, %v2349_v55  ;;  %v3270_v8 = vmul.f32 %v6388_v54, %v6858_v29  ;;  %v627_v26 = vadd.f32 %v8233_v37, %v6824_v50  ;;  %v8234_v31 = vld [vmem:[#allocation159_spill] sm:$0xff]  ;;  %v8238_v54 = vld [vmem:[#allocation252_spill] sm:$0xff]  ;;  %v8239_v63 = vld [vmem:[#allocation14_spill] sm:$0xff] }
 0x405   :  { %v440_v61 = vadd.f32 %v429_v34, %v303_v13  ;;  %v1787_v27 = vadd.f32 %v8234_v31, %v1579_v23  ;;  %3199 = vrot.lane.b32.xlu2 %v3190_v40, %s4292_s24  ;;  %v8235_v59 = vrot.slane %v6741_v18, 4  ;;  %v441_v16 = vadd.f32 %v428_v32, %v304_v25  ;;  %v8240_v13 = vld [vmem:[#allocation46_spill] sm:$0xff]  ;;  %v2895_v23 = vpop.permute.xlu1 %2894  ;;  %v2897_v21 = vpop.permute.xlu2 %2896  ;;  %v8243_v46 = vld [vmem:[#allocation13_spill] sm:$0xff] }
 0x406   :  { %3287 = vrot.lane.b32.xlu1 %v3279_v57, %s4292_s24  ;;  %v2701_v3 = vadd.f32 %v8236_v12, %v2525_v52  ;;  %v2700_v19 = vadd.f32 %v8237_v6, %v2524_v17  ;;  %3242 = vrot.lane.b32.xlu0 %v3231_v30, %s4292_s24  ;;  %v664_v50 = vadd.f32 %v8239_v63, %v8238_v54  ;;  %v3283_v40 = vrot.slane %v6911_v1, 6  ;;  %v8242_v17 = vld [vmem:[#allocation253_spill] sm:$0xff]  ;;  %v8244_v57 = vld [vmem:[#allocation19_spill] sm:$0xff]  ;;  %v8248_v12 = vld [vmem:[#allocation24_spill] sm:$0xff] }
 0x407   :  { %v438_v55 = vadd.f32 %v8235_v59, %v301_v28  ;;  %v793_v34 = vadd.f32 %v8240_v13, %v627_v26  ;;  %v1963_v10 = vadd.f32 %v8241_v45, %v1787_v27  ;;  %v3221_v18 = vmul.f32 %v6279_v49, %v6731_v24  ;;  %v6936_v32 = vpop.permute.xlu0 %2886  ;;  %v8245_v26 = vld [vmem:[#allocation21_spill] sm:$0xff]  ;;  %v8247_v24 = vld [vmem:[#allocation23_spill] sm:$0xff] }
 0x408   :  { %v6938_v28 = vadd.f32 %v2895_v23, %v2700_v19  ;;  %v6940_v25 = vadd.f32 %v2897_v21, %v2701_v3  ;;  %v3285_v35 = vrot.slane %v3270_v8, 6  ;;  %v665_v52 = vadd.f32 %v8243_v46, %v8242_v17  ;;  %v8246_v27 = vld [vmem:[#allocation205_spill] sm:$0xff]  ;;  %v8249_v3 = vld [vmem:[#allocation54_spill] sm:$0xff]  ;;  %v8250_v1 = vld [vmem:[#allocation27_spill] sm:$0xff] }
 0x409   :  { %v666_v37 = vadd.f32 %v8244_v57, %v6796_v5  ;;  %v628_v31 = vadd.f32 %v8245_v26, %v6831_v15  ;;  %v2139_v49 = vadd.f32 %v8246_v27, %v1963_v10  ;;  %v630_v59 = vadd.f32 %v8247_v24, %v439_v33  ;;  %v8251_v63 = vld [vmem:[#allocation227_spill] sm:$0xff]  ;;  %v8252_v15 = vld [vmem:[#allocation88_spill] sm:$0xff]  ;;  %v8255_v46 = vld [vmem:[#allocation29_spill] sm:$0xff] }
 0x40a   :  { %v631_v6 = vadd.f32 %v8248_v12, %v440_v61  ;;  %v969_v19 = vadd.f32 %v8249_v3, %v793_v34  ;;  %v6954_v54 = vstv %s6903_s23  ;;  %v3236_v45 = vrot.slane %v3221_v18, 4  ;;  %v8254_v21 = vld [vmem:[#allocation28_spill] sm:$0xff]  ;;  %v8261_v24 = vld [vmem:[#allocation49_spill] sm:$0xff]  ;;  %v8262_v3 = vld [vmem:[#allocation18_spill] sm:$0xff] }
 0x40b   :  { %v6957_v8 = vadd.f32 %v8250_v1, %v666_v37  ;;  %v2347_v13 = vadd.f32 %v8251_v63, %v2139_v49  ;;  %v3307_v5 = vmul.f32 %v6292_v47, %v6954_v54  ;;  %v3286_v10 = vsel %vm492_vm5, %v3283_v40, %v3285_v35  ;;  %v8256_v18 = vld [vmem:[#allocation256_spill] sm:$0xff]  ;;  %v8257_v47 = vld [vmem:[#allocation31_spill] sm:$0xff]  ;;  %v8260_v49 = vld [vmem:[#allocation42_spill] sm:$0xff] }
 0x40c   :  { %v1187_v23 = vadd.f32 %v8252_v15, %v969_v19  ;;  %v8253_v33 = vrot.slane %v6754_v48, 4  ;;  %v6969_v34 = vmul.f32 %v6472_v14, %v6954_v54  ;;  %v629_v17 = vadd.f32 %v8254_v21, %v438_v55  ;;  %v8258_v48 = vld [vmem:[#allocation37_spill] sm:$0xff]  ;;  %v8263_v15 = vld [vmem:[#allocation122_spill] sm:$0xff] }
 0x40d   :  { %v6973_v57 = vadd.f32 %v8255_v46, %v665_v52  ;;  %v2523_v37 = vadd.f32 %v8256_v18, %v2347_v13  ;;  %v632_v35 = vadd.f32 %v8257_v47, %v441_v16  ;;  %v840_v26 = vadd.f32 %v8258_v48, %v664_v50  ;;  %v2938_v1 = vpop.permute.xlu1 %2937  ;;  %v2940_v63 = vpop.permute.xlu2 %2939  ;;  %v8265_v21 = vld [vmem:[#allocation45_spill] sm:$0xff]  ;;  %v8268_v47 = vld [vmem:[#allocation56_spill] sm:$0xff]  ;;  %v8269_v48 = vld [vmem:[#allocation150_spill] sm:$0xff] }
 0x40e   :  { %v3232_v61 = vsel %vm355_vm4, %v8253_v33, %v3231_v30  ;;  %3293 = vrot.lane.b32.xlu1 %v3286_v10, %s4292_s24  ;;  %v8259_v30 = vld [vmem:[#allocation102_spill] sm:$0xff]  ;;  %3248 = vrot.lane.b32.xlu0 %v3236_v45, %s4292_s24  ;;  %v3268_v55 = vmul.f32 %v6304_v43, %v6858_v29  ;;  %v795_v52 = vadd.f32 %v8260_v49, %v629_v17  ;;  %v3321_v13 = vrot.slane %v3307_v5, 6  ;;  %v8264_v33 = vld [vmem:[#allocation44_spill] sm:$0xff]  ;;  %v8266_v17 = vld [vmem:[#allocation57_spill] sm:$0xff] }
 0x40f   :  { %3240 = vrot.lane.b32.xlu2 %v3232_v61, %s4292_s24  ;;  %v1353_v27 = vadd.f32 %v8259_v30, %v1187_v23  ;;  %v796_v12 = vadd.f32 %v8261_v24, %v630_v59  ;;  %v2699_v19 = vadd.f32 %v8262_v3, %v2523_v37  ;;  %v2893_v10 = vpop.permute.xlu0 %2892  ;;  %v6989_v50 = vadd.f32 %v2938_v1, %v6627_v41  ;;  %v8267_v5 = vld [vmem:[#allocation47_spill] sm:$0xff] }
 0x410   :  { %v6992_v23 = vadd.f32 %v2940_v63, %v6728_v44  ;;  %v3322_v43 = vrot.slane %v6969_v34, 6  ;;  %v794_v61 = vadd.f32 %v8264_v33, %v628_v31  ;;  %v798_v59 = vadd.f32 %v8265_v21, %v632_v35  ;;  %v8278_v21 = vld [vmem:[#allocation104_spill] sm:$0xff]  ;;  %v8339_v34 = vld [vmem:[#allocation115_spill] sm:$0xff] }
 0x411   :  { %v1529_v16 = vadd.f32 %v8263_v15, %v1353_v27  ;;  %v972_v46 = vadd.f32 %v8266_v17, %v796_v12  ;;  %v6998_v18 = vadd.f32 %v2893_v10, %v2699_v19  ;;  %v797_v37 = vadd.f32 %v8267_v5, %v631_v6  ;;  %v8270_v27 = vld [vmem:[#allocation91_spill] sm:$0xff]  ;;  %v8271_v12 = vld [vmem:[#allocation84_spill] sm:$0xff]  ;;  %v8272_v6 = vld [vmem:[#allocation170_spill] sm:$0xff] }
 0x412   :  { %v971_v41 = vadd.f32 %v8268_v47, %v795_v52  ;;  %v3282_v44 = vrot.slane %v3268_v55, 6  ;;  %v7008_v31 = vmul.f32 %v6427_v11, %v6954_v54  ;;  %v3306_v35 = vmul.f32 %v8222_v53, %v6954_v54  ;;  %v8274_v11 = vld [vmem:[#allocation59_spill] sm:$0xff]  ;;  %v8275_v15 = vld [vmem:[#allocation105_spill] sm:$0xff]  ;;  %v8277_v10 = vld [vmem:[#allocation60_spill] sm:$0xff] }
 0x413   :  { %v1747_v30 = vadd.f32 %v8269_v48, %v1529_v16  ;;  %v1190_v49 = vadd.f32 %v8270_v27, %v972_v46  ;;  %v3267_v24 = vmul.f32 %v6275_v42, %v6858_v29  ;;  %v3323_v55 = vsel %vm492_vm5, %v3321_v13, %v3322_v43  ;;  %v8276_v42 = vld [vmem:[#allocation61_spill] sm:$0xff]  ;;  %v8279_v17 = vld [vmem:[#allocation196_spill] sm:$0xff] }
 0x414   :  { %v1189_v3 = vadd.f32 %v8271_v12, %v971_v41  ;;  %v8273_v52 = vrot.slane %v6813_v39, 4  ;;  %v974_v63 = vadd.f32 %v8274_v11, %v798_v59  ;;  %v3284_v53 = vsel %vm492_vm5, %v3282_v44, %v3283_v40  ;;  %v8283_v12 = vld [vmem:[#allocation64_spill] sm:$0xff] }
 0x415   :  { %v1913_v19 = vadd.f32 %v8272_v6, %v1747_v30  ;;  %v1356_v16 = vadd.f32 %v8275_v15, %v1190_v49  ;;  %v970_v29 = vadd.f32 %v8276_v42, %v794_v61  ;;  %v1016_v33 = vadd.f32 %v8277_v10, %v840_v26  ;;  %v2975_v40 = vpop.permute.xlu1 %2974  ;;  %v2977_v46 = vpop.permute.xlu2 %2976  ;;  %v8281_v61 = vld [vmem:[#allocation130_spill] sm:$0xff]  ;;  %v8287_v11 = vld [vmem:[#allocation244_spill] sm:$0xff]  ;;  %v7063_v42 = vld [vmem:[#allocation3] sm:$0xff] }
 0x416   :  { %v3237_v1 = vsel %vm355_vm4, %v8273_v52, %v3236_v45  ;;  %3330 = vrot.lane.b32.xlu1 %v3323_v55, %s4292_s24  ;;  %v1355_v13 = vadd.f32 %v8278_v21, %v1189_v3  ;;  %3291 = vrot.lane.b32.xlu0 %v3284_v53, %s4292_s24  ;;  %v8280_v45 = vld [vmem:[#allocation125_spill] sm:$0xff]  ;;  %v3317_v5 = vrot.slane %v7008_v31, 6  ;;  %v3319_v47 = vrot.slane %v3306_v35, 6  ;;  %v8282_v26 = vld [vmem:[#allocation218_spill] sm:$0xff] }
 0x417   :  { %3246 = vrot.lane.b32.xlu2 %v3237_v1, %s4292_s24  ;;  %v2089_v39 = vadd.f32 %v8279_v17, %v1913_v19  ;;  %v1532_v59 = vadd.f32 %v8280_v45, %v1356_v16  ;;  %v3280_v41 = vrot.slane %v3267_v24, 6  ;;  %v2936_v44 = vpop.permute.xlu0 %2935  ;;  %v7039_v27 = vadd.f32 %v2975_v40, %v6676_v2  ;;  %v8284_v6 = vld [vmem:[#allocation62_spill] sm:$0xff]  ;;  %v8285_v24 = vld [vmem:[#allocation152_spill] sm:$0xff]  ;;  %v8286_v52 = vld [vmem:[#allocation153_spill] sm:$0xff] }
 0x418   :  { %v1531_v48 = vadd.f32 %v8281_v61, %v1355_v13  ;;  %v7042_v49 = vadd.f32 %v2977_v46, %v6791_v0  ;;  %v973_v3 = vadd.f32 %v8283_v12, %v797_v37  ;;  %v1018_v19 = vadd.f32 %v8284_v6, %v6957_v8  ;;  %v7056_v15 = vld [vmem:[#allocation2 + $0x8] sm:$0xff]  ;;  %v8288_v37 = vld [vmem:[#allocation87_spill] sm:$0xff]  ;;  %v8290_v21 = vld [vmem:[#allocation173_spill] sm:$0xff] }
 0x419   :  { %v2307_v30 = vadd.f32 %v8282_v26, %v2089_v39  ;;  %v7048_v31 = vadd.f32 %v2936_v44, %v6625_v38  ;;  %v7051_v35 = vstv %s7000_s25  ;;  %v1750_v1 = vadd.f32 %v8286_v52, %v1532_v59  ;;  %v8289_v53 = vld [vmem:[#allocation94_spill] sm:$0xff]  ;;  %v8292_v45 = vld [vmem:[#allocation263_spill] sm:$0xff]  ;;  %v8295_v61 = vld [vmem:[#allocation108_spill] sm:$0xff] }
 0x41a   :  { %v1749_v55 = vadd.f32 %v8285_v24, %v1531_v48  ;;  %v3346_v0 = vmul.f32 %v7056_v15, %v7051_v35  ;;  %v1192_v16 = vadd.f32 %v8288_v37, %v974_v63  ;;  %v1224_v8 = vadd.f32 %v8289_v53, %v1016_v33  ;;  %v8291_v17 = vld [vmem:[#allocation178_spill] sm:$0xff]  ;;  %v8293_v40 = vld [vmem:[#allocation83_spill] sm:$0xff]  ;;  %v8296_v26 = vld [vmem:[#allocation192_spill] sm:$0xff] }
 0x41b   :  { %v2473_v2 = vadd.f32 %v8287_v11, %v2307_v30  ;;  %v3320_v38 = vsel %vm492_vm5, %v3317_v5, %v3319_v47  ;;  %v3304_v10 = vmul.f32 %v7063_v42, %v6954_v54  ;;  %v1916_v13 = vadd.f32 %v8290_v21, %v1750_v1  ;;  %v8294_v46 = vld [vmem:[#allocation107_spill] sm:$0xff] }
 0x41c   :  { %v1915_v39 = vadd.f32 %v8291_v17, %v1749_v55  ;;  %v3281_v63 = vsel %vm492_vm5, %v3278_v9, %v3280_v41  ;;  %v1188_v33 = vadd.f32 %v8293_v40, %v970_v29  ;;  %v1358_v47 = vadd.f32 %v8294_v46, %v1192_v16  ;;  %v8297_v44 = vld [vmem:[#allocation199_spill] sm:$0xff]  ;;  %v8298_v9 = vld [vmem:[#allocation109_spill] sm:$0xff]  ;;  %v8299_v41 = vld [vmem:[#allocation128_spill] sm:$0xff] }
 0x41d   :  { %v2649_v59 = vadd.f32 %v8292_v45, %v2473_v2  ;;  %v1400_v48 = vadd.f32 %v8295_v61, %v1224_v8  ;;  %v2092_v12 = vadd.f32 %v8297_v44, %v1916_v13  ;;  %v7083_v36 = vstv %s7032_s26  ;;  %v8300_v55 = vld [vmem:[#allocation133_spill] sm:$0xff]  ;;  %v2981_v1 = vpop.permute.xlu1 %2980  ;;  %v3016_v11 = vpop.permute.xlu2 %3015  ;;  %v8302_v16 = vld [vmem:[#allocation226_spill] sm:$0xff]  ;;  %v8303_v21 = vld [vmem:[#allocation123_spill] sm:$0xff] }
 0x41e   :  { %3355 = vrot.lane.b32.xlu1 %v3346_v0, %s4293_s27  ;;  %v2091_v30 = vadd.f32 %v8296_v26, %v1915_v39  ;;  %3328 = vrot.lane.b32.xlu0 %v3320_v38, %s4292_s24  ;;  %v1354_v29 = vadd.f32 %v8298_v9, %v1188_v33  ;;  %v1534_v52 = vadd.f32 %v8300_v55, %v1358_v47  ;;  %v3316_v2 = vrot.slane %v3304_v10, 6  ;;  %v8301_v0 = vld [vmem:[#allocation221_spill] sm:$0xff]  ;;  %v8305_v40 = vld [vmem:[#allocation156_spill] sm:$0xff] }
 0x41f   :  { %3289 = vrot.lane.b32.xlu2 %v3281_v63, %s4292_s24  ;;  %v2867_v6 = vadd.f32 %v6844_v4, %v2649_v59  ;;  %v1576_v24 = vadd.f32 %v8299_v41, %v1400_v48  ;;  %v2310_v37 = vadd.f32 %v8301_v0, %v2092_v12  ;;  %v2942_v8 = vpop.permute.xlu0 %2941  ;;  %v7091_v4 = vadd.f32 %v2981_v1, %v6725_v56  ;;  %v7099_v39 = vld [vmem:[#allocation2] sm:$0xff]  ;;  %v8304_v59 = vld [vmem:[#allocation155_spill] sm:$0xff]  ;;  %v8306_v33 = vld [vmem:[#allocation240_spill] sm:$0xff] }
 0x420   :  { %v2309_v53 = vadd.f32 %v8302_v16, %v2091_v30  ;;  %v1530_v13 = vadd.f32 %v8303_v21, %v1354_v29  ;;  %v7097_v17 = vadd.f32 %v2942_v8, %v6674_v60  ;;  %v3345_v10 = vmul.f32 %v7099_v39, %v7051_v35  ;;  %v8307_v47 = vld [vmem:[#allocation248_spill] sm:$0xff]  ;;  %v8308_v48 = vld [vmem:[#allocation90_spill] sm:$0xff]  ;;  %v8309_v60 = vld [vmem:[#allocation157_spill] sm:$0xff] }
 0x421   :  { %v7093_v38 = vadd.f32 %v3016_v11, %v2867_v6  ;;  %v3370_v45 = vmul.f32 %v7063_v42, %v7083_v36  ;;  %v1752_v63 = vadd.f32 %v8304_v59, %v1534_v52  ;;  %v1784_v56 = vadd.f32 %v8305_v40, %v1576_v24  ;;  %v7112_v12 = vld [vmem:[#allocation3 + $0x28] sm:$0x3f]  ;;  %v8311_v41 = vld [vmem:[#allocation181_spill] sm:$0xff]  ;;  %v8312_v24 = vld [vmem:[#allocation266_spill] sm:$0xff] }
 0x422   :  { %v2475_v46 = vadd.f32 %v8306_v33, %v2309_v53  ;;  %v2476_v61 = vadd.f32 %v8307_v47, %v2310_v37  ;;  %v1226_v26 = vadd.f32 %v8308_v48, %v1018_v19  ;;  %v1748_v30 = vadd.f32 %v8309_v60, %v1530_v13  ;;  %v8310_v9 = vld [vmem:[#allocation176_spill] sm:$0xff]  ;;  %v8313_v1 = vld [vmem:[#allocation267_spill] sm:$0xff]  ;;  %v8314_v0 = vld [vmem:[#allocation86_spill] sm:$0xff] }
 0x423   :  { %v3318_v44 = vsel %vm492_vm5, %v3316_v2, %v3317_v5  ;;  %v3309_v6 = vmul.f32 %v7112_v12, %v6954_v54  ;;  %v1960_v29 = vadd.f32 %v8310_v9, %v1784_v56  ;;  %v1918_v55 = vadd.f32 %v8311_v41, %v1752_v63  ;;  %v8315_v19 = vld [vmem:[#allocation110_spill] sm:$0xff]  ;;  %v8316_v53 = vld [vmem:[#allocation171_spill] sm:$0xff]  ;;  %v8319_v63 = vld [vmem:[#allocation112_spill] sm:$0xff] }
 0x424   :  { %v2651_v52 = vadd.f32 %v8312_v24, %v2475_v46  ;;  %v2652_v11 = vadd.f32 %v8313_v1, %v2476_v61  ;;  %v1191_v37 = vadd.f32 %v8314_v0, %v973_v3  ;;  %v1402_v16 = vadd.f32 %v8315_v19, %v1226_v26  ;;  %v8317_v5 = vld [vmem:[#allocation195_spill] sm:$0xff]  ;;  %v8318_v2 = vld [vmem:[#allocation202_spill] sm:$0xff]  ;;  %v8320_v40 = vld [vmem:[#allocation136_spill] sm:$0xff] }
 0x425   :  { %v1914_v8 = vadd.f32 %v8316_v53, %v1748_v30  ;;  %v2094_v54 = vadd.f32 %v8317_v5, %v1918_v55  ;;  %v2136_v21 = vadd.f32 %v8318_v2, %v1960_v29  ;;  %v8321_v33 = vld [vmem:[#allocation191_spill] sm:$0xff]  ;;  %v3020_v47 = vpop.permute.xlu1 %3019  ;;  %v3324_v61 = vrot.slane %v3309_v6, 6  ;;  %v8322_v48 = vld [vmem:[#allocation224_spill] sm:$0xff]  ;;  %v8323_v60 = vld [vmem:[#allocation229_spill] sm:$0xff] }
 0x426   :  { %3378 = vrot.lane.b32.xlu1 %v3370_v45, %s4293_s27  ;;  %v2869_v13 = vadd.f32 %v6781_v58, %v2651_v52  ;;  %v2870_v59 = vadd.f32 %v6894_v62, %v2652_v11  ;;  %3353 = vrot.lane.b32.xlu0 %v3345_v10, %s4293_s27  ;;  %v1357_v3 = vadd.f32 %v8319_v63, %v1191_v37  ;;  %v3022_v45 = vpop.permute.xlu2 %3021  ;;  %v8324_v62 = vld [vmem:[#allocation126_spill] sm:$0xff]  ;;  %v8325_v29 = vld [vmem:[#allocation219_spill] sm:$0xff]  ;;  %v8332_v2 = vld [vmem:[#allocation184_spill] sm:$0xff] }
 0x427   :  { %3326 = vrot.lane.b32.xlu2 %v3318_v44, %s4292_s24  ;;  %v1578_v56 = vadd.f32 %v8320_v40, %v1402_v16  ;;  %v2090_v46 = vadd.f32 %v8321_v33, %v1914_v8  ;;  %v2344_v26 = vadd.f32 %v8322_v48, %v2136_v21  ;;  %v2312_v30 = vadd.f32 %v8323_v60, %v2094_v54  ;;  %v2979_v44 = vpop.permute.xlu0 %2978  ;;  %v8326_v24 = vld [vmem:[#allocation67_spill] sm:$0xff]  ;;  %v8327_v6 = vld [vmem:[#allocation158_spill] sm:$0xff]  ;;  %v8330_v16 = vld [vmem:[#allocation160_spill] sm:$0xff] }
 0x428   :  { %v7135_v9 = vadd.f32 %v3020_v47, %v2869_v13  ;;  %v7137_v58 = vadd.f32 %v3022_v45, %v2870_v59  ;;  %v1533_v10 = vadd.f32 %v8324_v62, %v1357_v3  ;;  %v7142_v55 = vadd.f32 %v2979_v44, %v6723_v20  ;;  %v8328_v11 = vld [vmem:[#allocation243_spill] sm:$0xff]  ;;  %v7153_v54 = vld [vmem:[#allocation2 + $0x20] sm:$0xff]  ;;  %v8333_v13 = vld [vmem:[#allocation268_spill] sm:$0xff] }
 0x429   :  { %v2308_v41 = vadd.f32 %v8325_v29, %v2090_v46  ;;  %v1017_v52 = vadd.f32 %v8326_v24, %v6973_v57  ;;  %v1786_v1 = vadd.f32 %v8327_v6, %v1578_v56  ;;  %v2478_v0 = vadd.f32 %v8328_v11, %v2312_v30  ;;  %v8329_v37 = vld [vmem:[#allocation251_spill] sm:$0xff]  ;;  %v8334_v63 = vld [vmem:[#allocation269_spill] sm:$0xff]  ;;  %v8336_v46 = vld [vmem:[#allocation174_spill] sm:$0xff] }
 0x42a   :  { %v2520_v19 = vadd.f32 %v8329_v37, %v2344_v26  ;;  %v1751_v53 = vadd.f32 %v8330_v16, %v1533_v10  ;;  %v8331_v8 = vld [vmem:[#allocation239_spill] sm:$0xff]  ;;  %v3348_v20 = vmul.f32 %v7153_v54, %v7051_v35  ;;  %v3373_v57 = vmul.f32 %v6472_v14, %v7083_v36  ;;  %v8335_v56 = vld [vmem:[#allocation89_spill] sm:$0xff]  ;;  %v8337_v45 = vld [vmem:[#allocation270_spill] sm:$0xff] }
 0x42b   :  { %v2474_v5 = vadd.f32 %v8331_v8, %v2308_v41  ;;  %v1962_v21 = vadd.f32 %v8332_v2, %v1786_v1  ;;  %v2654_v59 = vadd.f32 %v8333_v13, %v2478_v0  ;;  %v3325_v40 = vsel %vm492_vm5, %v3322_v43, %v3324_v61  ;;  %v8338_v14 = vld [vmem:[#allocation198_spill] sm:$0xff]  ;;  %v8341_v41 = vld [vmem:[#allocation232_spill] sm:$0xff]  ;;  %v8345_v8 = vld [vmem:[#allocation163_spill] sm:$0xff] }
 0x42c   :  { %v2696_v3 = vadd.f32 %v8334_v63, %v2520_v19  ;;  %v1225_v33 = vadd.f32 %v8335_v56, %v1017_v52  ;;  %v1917_v47 = vadd.f32 %v8336_v46, %v1751_v53  ;;  %v8340_v61 = vld [vmem:[#allocation194_spill] sm:$0xff]  ;;  %v3396_v53 = vstv %s7149_s28  ;;  %v8348_v56 = vld [vmem:[#allocation177_spill] sm:$0xff] }
 0x42d   :  { %v2650_v48 = vadd.f32 %v8337_v45, %v2474_v5  ;;  %v2138_v26 = vadd.f32 %v8338_v14, %v1962_v21  ;;  %v2872_v60 = vadd.f32 %v6838_v22, %v2654_v59  ;;  %v3026_v10 = vpop.permute.xlu1 %3025  ;;  %v8342_v22 = vld [vmem:[#allocation129_spill] sm:$0xff]  ;;  %v8344_v19 = vld [vmem:[#allocation246_spill] sm:$0xff]  ;;  %v7193_v21 = vld [vmem:[#allocation2 + $0x18] sm:$0xff] }
 0x42e   :  { %3384 = vrot.lane.b32.xlu1 %v3373_v57, %s4293_s27  ;;  %v2904_v30 = vadd.f32 %v6936_v32, %v2696_v3  ;;  %3359 = vrot.lane.b32.xlu0 %v3348_v20, %s4293_s27  ;;  %v1401_v43 = vadd.f32 %v8339_v34, %v1225_v33  ;;  %v2093_v44 = vadd.f32 %v8340_v61, %v1917_v47  ;;  %v3063_v29 = vpop.permute.xlu2 %3062  ;;  %v8343_v32 = vld [vmem:[#allocation222_spill] sm:$0xff]  ;;  %v7190_v57 = vld [vmem:[#allocation2 + $0x10] sm:$0x3f]  ;;  %v8347_v59 = vld [vmem:[#allocation17_spill] sm:$0xff] }
 0x42f   :  { %3332 = vrot.lane.b32.xlu2 %v3325_v40, %s4292_s24  ;;  %v2868_v62 = vadd.f32 %v6779_v51, %v2650_v48  ;;  %v2346_v24 = vadd.f32 %v8341_v41, %v2138_v26  ;;  %v3018_v52 = vpop.permute.xlu0 %3017  ;;  %v7178_v6 = vadd.f32 %v3026_v10, %v2872_v60  ;;  %v8346_v5 = vld [vmem:[#allocation242_spill] sm:$0xff]  ;;  %v3399_v2 = vmul.f32 %v7190_v57, %v3396_v53  ;;  %v8349_v46 = vld [vmem:[#allocation33_spill] sm:$0xff]  ;;  %v8351_v14 = vld [vmem:[#allocation36_spill] sm:$0xff]  ;;  %s4124_s24 = sld [smem:[#allocation4 + $0x3e]] }
 0x430   :  { %v7180_v1 = vadd.f32 %v3063_v29, %v2904_v30  ;;  %v1577_v11 = vadd.f32 %v8342_v22, %v1401_v43  ;;  %v2311_v0 = vadd.f32 %v8343_v32, %v2093_v44  ;;  %v3347_v13 = vmul.f32 %v7193_v21, %v7051_v35  ;;  %v7198_v3 = vld [vmem:[#allocation3 + $0x18] sm:$0xff]  ;;  %v8350_v35 = vld [vmem:[#allocation197_spill] sm:$0xff] }
 0x431   :  { %v7184_v37 = vadd.f32 %v3018_v52, %v2868_v62  ;;  %v2522_v16 = vadd.f32 %v8344_v19, %v2346_v24  ;;  %v3372_v40 = vmul.f32 %v7198_v3, %v7083_v36  ;;  %v8352_v44 = vld [vmem:[#allocation225_spill] sm:$0xff]  ;;  %v7219_v41 = vld [vmem:[#allocation2 + $0x28] sm:$0x3f]  ;;  %v7222_v52 = vld [vmem:[#allocation3 + $0x8] sm:$0xff] }
 0x432   :  { %v1785_v51 = vadd.f32 %v8345_v8, %v1577_v11  ;;  %v2477_v20 = vadd.f32 %v8346_v5, %v2311_v0  ;;  %v3402_v24 = vmul.f32 %v7219_v41, %v3396_v53  ;;  %v3371_v22 = vmul.f32 %v7222_v52, %v7083_v36  ;;  %v8355_v0 = vld [vmem:[#allocation38_spill] sm:$0xff] }
 0x433   :  { %v2698_v63 = vadd.f32 %v8347_v59, %v2522_v16  ;;  %v3398_v11 = vmul.f32 %v7056_v15, %v3396_v53 }
 0x434   :  { %v1961_v33 = vadd.f32 %v8348_v56, %v1785_v51  ;;  %v2653_v47 = vadd.f32 %v8349_v46, %v2477_v20 }
 0x435   :  { %v2906_v45 = vadd.f32 %v6886_v7, %v2698_v63  ;;  %v3067_v60 = vpop.permute.xlu1 %3066  ;;  %v8353_v7 = vld [vmem:[#allocation245_spill] sm:$0xff]  ;;  %v3397_v63 = vmul.f32 %v7099_v39, %v3396_v53 }
 0x436   :  { %3413 = vrot.lane.b32.xlu1 %v3399_v2, %s4293_s27  ;;  %3382 = vrot.lane.b32.xlu0 %v3372_v40, %s4293_s27  ;;  %v2137_v48 = vadd.f32 %v8350_v35, %v1961_v33  ;;  %v2871_v26 = vadd.f32 %v8351_v14, %v2653_v47  ;;  %v3069_v30 = vpop.permute.xlu2 %3068  ;;  %v3433_v2 = vstv %s4124_s24  ;;  %v3401_v40 = vmul.f32 %v7153_v54, %v3396_v53 }
 0x437   :  { %3357 = vrot.lane.b32.xlu2 %v3347_v13, %s4293_s27  ;;  %v3024_v34 = vpop.permute.xlu0 %3023  ;;  %v7210_v43 = vadd.f32 %v3067_v60, %v2906_v45  ;;  %v7213_v61 = vadd.f32 %v3069_v30, %v6998_v18  ;;  %v8354_v18 = vld [vmem:[#allocation34_spill] sm:$0xff]  ;;  %v7240_v13 = vld [vmem:[#allocation3 + $0x10] sm:$0x3f]  ;;  %v3439_v45 = vmul.f32 %v7112_v12, %v3433_v2  ;;  %v3400_v35 = vmul.f32 %v7193_v21, %v3396_v53 }
 0x438   :  { %v2345_v62 = vadd.f32 %v8352_v44, %v2137_v48  ;;  %v7216_v10 = vadd.f32 %v3024_v34, %v2871_v26  ;;  %v3436_v59 = vmul.f32 %v7240_v13, %v3433_v2  ;;  %v7259_v48 = vstv %s4125_s29 }
 0x439   :  { %v3435_v14 = vmul.f32 %v7222_v52, %v3433_v2  ;;  %v7264_v26 = vmul.f32 %v7153_v54, %v7259_v48 }
 0x43a   :  { %v2521_v29 = vadd.f32 %v8353_v7, %v2345_v62  ;;  %v7281_v62 = vstv %s4126_s30 }
 0x43b   :  { %v3491_v34 = vrot.slane %v7264_v26, 2 }
 0x43c   :  { %v2697_v32 = vadd.f32 %v8354_v18, %v2521_v29  ;;  %v3434_v29 = vmul.f32 %v7063_v42, %v3433_v2  ;;  %v3475_v18 = vmul.f32 %v7190_v57, %v7259_v48 }
 0x43d   :  { %v3073_v16 = vpop.permute.xlu1 %3072 }
 0x43e   :  { %3419 = vrot.lane.b32.xlu1 %v3402_v24, %s4293_s27  ;;  %3411 = vrot.lane.b32.xlu0 %v3398_v11, %s4293_s27  ;;  %v2905_v19 = vadd.f32 %v8355_v0, %v2697_v32  ;;  %v7233_v5 = vadd.f32 %v3073_v16, %v6940_v25  ;;  %v7284_v24 = vld [vmem:[#allocation3 + $0x20] sm:$0xff]  ;;  %v3474_v11 = vmul.f32 %v7056_v15, %v7259_v48 }
 0x43f   :  { %3380 = vrot.lane.b32.xlu2 %v3371_v22, %s4293_s27  ;;  %v3112_v8 = vpop.permute.xlu2 %3111  ;;  %v3065_v51 = vpop.permute.xlu0 %3064  ;;  %v3438_v22 = vmul.f32 %v7284_v24, %v3433_v2 }
 0x440   :  { %v7236_v36 = vadd.f32 %v3112_v8, %v7048_v31  ;;  %v7238_v20 = vadd.f32 %v3065_v51, %v2905_v19 }
 0x445   :  { %v3116_v25 = vpop.permute.xlu1 %3115 }
 0x446   :  { %3450 = vrot.lane.b32.xlu1 %v3436_v59, %s4293_s27  ;;  %3417 = vrot.lane.b32.xlu0 %v3401_v40, %s4293_s27  ;;  %v7249_v33 = vadd.f32 %v3116_v25, %v6992_v23  ;;  %v3486_v40 = vrot.slane %v3474_v11, 2  ;;  %v3488_v25 = vrot.slane %v3475_v18, 2 }
 0x447   :  { %3409 = vrot.lane.b32.xlu2 %v3397_v63, %s4293_s27  ;;  %v3118_v31 = vpop.permute.xlu2 %3117  ;;  %v3071_v56 = vpop.permute.xlu0 %3070 }
 0x448   :  { %v7252_v46 = vadd.f32 %v3118_v31, %v7097_v17  ;;  %v7255_v47 = vadd.f32 %v3071_v56, %v6938_v28  ;;  %v3476_v28 = vmul.f32 %v7193_v21, %v7259_v48  ;;  %v3437_v31 = vmul.f32 %v7198_v3, %v3433_v2 }
 0x449   :  { %v7311_v56 = vstv %s4127_s3 }
 0x44a   :  { %v3490_v7 = vrot.slane %v3476_v28, 2  ;;  %v3553_v2 = vmul.f32 %v7099_v39, %v7311_v56  ;;  %v3555_v26 = vmul.f32 %v7190_v57, %v7311_v56 }
 0x44d   :  { %v3153_v23 = vpop.permute.xlu1 %3152 }
 0x44e   :  { %3456 = vrot.lane.b32.xlu1 %v3439_v45, %s4293_s27  ;;  %3448 = vrot.lane.b32.xlu0 %v3435_v14, %s4293_s27  ;;  %v7272_v60 = vadd.f32 %v3153_v23, %v7042_v49  ;;  %v3492_v49 = vsel %vm218_vm3, %v3490_v7, %v3491_v34 }
 0x44f   :  { %3415 = vrot.lane.b32.xlu2 %v3400_v35, %s4293_s27  ;;  %v3155_v17 = vpop.permute.xlu2 %3154  ;;  %v3114_v53 = vpop.permute.xlu0 %3113  ;;  %v3473_v35 = vmul.f32 %v7099_v39, %v7259_v48 }
 0x450   :  { %v7275_v30 = vadd.f32 %v3155_v17, %v7142_v55  ;;  %v7279_v44 = vadd.f32 %v3114_v53, %v6989_v50  ;;  %v3513_v55 = vmul.f32 %v7222_v52, %v7281_v62  ;;  %v3514_v50 = vmul.f32 %v7240_v13, %v7281_v62 }
 0x452   :  { %v3525_v51 = vrot.slane %v3513_v55, 2  ;;  %v3527_v59 = vrot.slane %v3514_v50, 2  ;;  %v3485_v55 = vrot.slane %v3473_v35, 2 }
 0x454   :  { %v3528_v45 = vsel %vm218_vm3, %v3525_v51, %v3527_v59  ;;  %v3487_v11 = vsel %vm218_vm3, %v3485_v55, %v3486_v40 }
 0x456   :  { %3499 = vrot.lane.b32.xlu1 %v3492_v49, %s4293_s27  ;;  %3454 = vrot.lane.b32.xlu0 %v3438_v22, %s4293_s27  ;;  %v3192_v32 = vpop.permute.xlu1 %3191  ;;  %v3565_v49 = vrot.slane %v3553_v2, 2 }
 0x457   :  { %3446 = vrot.lane.b32.xlu2 %v3434_v29, %s4293_s27  ;;  %v3194_v0 = vpop.permute.xlu2 %3193  ;;  %v3151_v19 = vpop.permute.xlu0 %3150  ;;  %v7302_v16 = vadd.f32 %v3192_v32, %v7093_v38  ;;  %v7316_v38 = vmul.f32 %v7056_v15, %v7311_v56  ;;  %v3517_v32 = vmul.f32 %v7112_v12, %v7281_v62 }
 0x458   :  { %v7305_v8 = vadd.f32 %v3194_v0, %v7184_v37  ;;  %v7308_v63 = vadd.f32 %v3151_v19, %v7039_v27  ;;  %v3489_v37 = vsel %vm218_vm3, %v3486_v40, %v3488_v25  ;;  %v3512_v27 = vmul.f32 %v7063_v42, %v7281_v62 }
 0x459   :  { %v3566_v7 = vrot.slane %v7316_v38, 2  ;;  %v3556_v0 = vmul.f32 %v7193_v21, %v7311_v56  ;;  %v3532_v2 = vrot.slane %v3517_v32, 2 }
 0x45a   :  { %v3524_v22 = vrot.slane %v3512_v27, 2 }
 0x45b   :  { %v3567_v50 = vsel %vm218_vm3, %v3565_v49, %v3566_v7  ;;  %v3570_v35 = vrot.slane %v3556_v0, 2 }
 0x45c   :  { %v3526_v18 = vsel %vm218_vm3, %v3524_v22, %v3525_v51 }
 0x45e   :  { %3536 = vrot.lane.b32.xlu1 %v3528_v45, %s4293_s27  ;;  %3497 = vrot.lane.b32.xlu0 %v3489_v37, %s4293_s27  ;;  %v3198_v14 = vpop.permute.xlu1 %3197 }
 0x45f   :  { %3452 = vrot.lane.b32.xlu2 %v3437_v31, %s4293_s27  ;;  %v3200_v28 = vpop.permute.xlu2 %3199  ;;  %v3157_v23 = vpop.permute.xlu0 %3156  ;;  %v7329_v17 = vadd.f32 %v3198_v14, %v7137_v58  ;;  %v7344_v58 = vmul.f32 %v7153_v54, %v7311_v56 }
 0x460   :  { %v7332_v53 = vadd.f32 %v3200_v28, %v7216_v10  ;;  %v7336_v29 = vadd.f32 %v3157_v23, %v7091_v4  ;;  %v3478_v10 = vmul.f32 %v7219_v41, %v7259_v48  ;;  %v3516_v4 = vmul.f32 %v7284_v24, %v7281_v62 }
 0x461   :  { %v7358_v48 = vstv %s4128_s4  ;;  %v3571_v31 = vrot.slane %v7344_v58, 2 }
 0x462   :  { %v3493_v45 = vrot.slane %v3478_v10, 2  ;;  %v3530_v27 = vrot.slane %v3516_v4, 2  ;;  %v3600_v14 = vmul.f32 %v7063_v42, %v7358_v48  ;;  %v7380_v28 = vmul.f32 %v7222_v52, %v7358_v48 }
 0x463   :  { %v3568_v4 = vrot.slane %v3555_v26, 2 }
 0x464   :  { %v3533_v23 = vsel %vm218_vm3, %v3530_v27, %v3532_v2 }
 0x466   :  { %3575 = vrot.lane.b32.xlu1 %v3567_v50, %s4293_s27  ;;  %3534 = vrot.lane.b32.xlu0 %v3526_v18, %s4293_s27  ;;  %v3239_v19 = vpop.permute.xlu1 %3238 }
 0x467   :  { %3495 = vrot.lane.b32.xlu2 %v3487_v11, %s4293_s27  ;;  %v7361_v40 = vadd.f32 %v3239_v19, %v7180_v1  ;;  %v3572_v1 = vsel %vm218_vm3, %v3570_v35, %v3571_v31  ;;  %v3613_v11 = vrot.slane %v7380_v28, 2  ;;  %v3603_v19 = vmul.f32 %v7198_v3, %v7358_v48 }
 0x468   :  { %v3196_v51 = vpop.permute.xlu0 %3195 }
 0x469   :  { %v3241_v59 = vpop.permute.xlu2 %3240  ;;  %v7368_v37 = vadd.f32 %v3196_v51, %v7135_v9  ;;  %v3515_v9 = vmul.f32 %v7198_v3, %v7281_v62  ;;  %v3617_v2 = vrot.slane %v3603_v19, 2 }
 0x46a   :  { %v7364_v25 = vadd.f32 %v3241_v59, %v7238_v20  ;;  %v3494_v20 = vsel %vm218_vm3, %v3491_v34, %v3493_v45  ;;  %v3612_v34 = vrot.slane %v3600_v14, 2  ;;  %v3558_v59 = vmul.f32 %v7219_v41, %v7311_v56 }
 0x46b   :  { %v3529_v10 = vrot.slane %v3515_v9, 2 }
 0x46c   :  { %v3614_v32 = vsel %vm218_vm3, %v3612_v34, %v3613_v11 }
 0x46d   :  { %v3531_v0 = vsel %vm218_vm3, %v3529_v10, %v3530_v27 }
 0x46e   :  { %3581 = vrot.lane.b32.xlu1 %v3572_v1, %s4293_s27  ;;  %3540 = vrot.lane.b32.xlu0 %v3533_v23, %s4293_s27  ;;  %v7421_v1 = vstv %s4129_s5 }
 0x46f   :  { %3501 = vrot.lane.b32.xlu2 %v3494_v20, %s4293_s27  ;;  %v3573_v20 = vrot.slane %v3558_v59, 2 }
 0x470   :  { %v3245_v22 = vpop.permute.xlu1 %3244  ;;  %v3202_v55 = vpop.permute.xlu0 %3201 }
 0x471   :  { %v3247_v49 = vpop.permute.xlu2 %3246  ;;  %v7391_v50 = vadd.f32 %v3245_v22, %v7213_v61  ;;  %v7398_v18 = vadd.f32 %v3202_v55, %v7178_v6  ;;  %v7406_v61 = vmul.f32 %v7284_v24, %v7358_v48  ;;  %v3602_v22 = vmul.f32 %v7240_v13, %v7358_v48 }
 0x472   :  { %v7394_v62 = vadd.f32 %v3247_v49, %v7255_v47  ;;  %v7448_v55 = vstv %s4131_s6 }
 0x473   :  { %v3618_v35 = vrot.slane %v7406_v61, 2  ;;  %v3615_v10 = vrot.slane %v3602_v22, 2  ;;  %v7497_v22 = vstv %s4132_s7  ;;  %v3731_v61 = vmul.f32 %v7190_v57, %v7448_v55 }
 0x475   :  { %v3619_v56 = vsel %vm218_vm3, %v3617_v2, %v3618_v35 }
 0x476   :  { %3622 = vrot.lane.b32.xlu1 %v3614_v32, %s4293_s27  ;;  %3579 = vrot.lane.b32.xlu0 %v3568_v4, %s4293_s27 }
 0x477   :  { %3538 = vrot.lane.b32.xlu2 %v3531_v0, %s4293_s27 }
 0x478   :  { %v3288_v6 = vpop.permute.xlu1 %3287  ;;  %v3243_v51 = vpop.permute.xlu0 %3242 }
 0x479   :  { %v3290_v47 = vpop.permute.xlu2 %3289  ;;  %v7414_v45 = vadd.f32 %v3288_v6, %v7236_v36  ;;  %v7419_v14 = vadd.f32 %v3243_v51, %v7210_v43  ;;  %v3569_v36 = vsel %vm218_vm3, %v3566_v7, %v3568_v4  ;;  %v3649_v43 = vmul.f32 %v7099_v39, %v7421_v1 }
 0x47a   :  { %v3300_v27 = vadd.f32 %v3290_v47, %v7279_v44  ;;  %v7431_v44 = vmul.f32 %v7056_v15, %v7421_v1  ;;  %v3605_v6 = vmul.f32 %v7112_v12, %v7358_v48 }
 0x47b   :  { %v3661_v34 = vrot.slane %v3649_v43, 4 }
 0x47c   :  { %v3662_v49 = vrot.slane %v7431_v44, 4  ;;  %v3620_v2 = vrot.slane %v3605_v6, 2  ;;  %v3734_v44 = vmul.f32 %v7219_v41, %v7448_v55 }
 0x47e   :  { %3628 = vrot.lane.b32.xlu1 %v3619_v56, %s4293_s27  ;;  %3585 = vrot.lane.b32.xlu0 %v3573_v20, %s4293_s27  ;;  %v3663_v4 = vsel %vm355_vm4, %v3661_v34, %v3662_v49  ;;  %v3616_v56 = vsel %vm218_vm3, %v3613_v11, %v3615_v10  ;;  %v3652_v11 = vmul.f32 %v7193_v21, %v7421_v1 }
 0x47f   :  { %3577 = vrot.lane.b32.xlu2 %v3569_v36, %s4293_s27 }
 0x480   :  { %v3294_v28 = vpop.permute.xlu1 %3293  ;;  %v3249_v23 = vpop.permute.xlu0 %3248 }
 0x481   :  { %v3327_v9 = vpop.permute.xlu2 %3326  ;;  %v7439_v38 = vadd.f32 %v3294_v28, %v7252_v46  ;;  %v7446_v26 = vadd.f32 %v3249_v23, %v7233_v5  ;;  %v3574_v46 = vsel %vm218_vm3, %v3571_v31, %v3573_v20  ;;  %v3729_v5 = vmul.f32 %v7099_v39, %v7448_v55 }
 0x482   :  { %v3338_v7 = vadd.f32 %v3327_v9, %v7308_v63  ;;  %v7458_v63 = vmul.f32 %v7056_v15, %v7448_v55 }
 0x483   :  { %v3741_v51 = vrot.slane %v3729_v5, 4  ;;  %v3776_v5 = vmul.f32 %v7063_v42, %v7497_v22 }
 0x484   :  { %v3742_v47 = vrot.slane %v7458_v63, 4 }
 0x486   :  { %3671 = vrot.lane.b32.xlu1 %v3663_v4, %s4293_s27  ;;  %3626 = vrot.lane.b32.xlu0 %v3615_v10, %s4293_s27  ;;  %v3743_v20 = vsel %vm355_vm4, %v3741_v51, %v3742_v47 }
 0x487   :  { %3583 = vrot.lane.b32.xlu2 %v3574_v46, %s4293_s27  ;;  %v3666_v46 = vrot.slane %v3652_v11, 4 }
 0x488   :  { %v3331_v32 = vpop.permute.xlu1 %3330  ;;  %v3292_v19 = vpop.permute.xlu0 %3291 }
 0x489   :  { %v3333_v0 = vpop.permute.xlu2 %3332  ;;  %v7466_v58 = vadd.f32 %v3331_v32, %v7275_v30  ;;  %v3301_v59 = vadd.f32 %v3292_v19, %v7249_v33  ;;  %v7479_v30 = vmul.f32 %v7153_v54, %v7448_v55  ;;  %v3732_v33 = vmul.f32 %v7193_v21, %v7448_v55 }
 0x48a   :  { %v3341_v31 = vadd.f32 %v3333_v0, %v7336_v29  ;;  %v7485_v29 = vmul.f32 %v7153_v54, %v7421_v1  ;;  %v3621_v32 = vsel %vm218_vm3, %v3618_v35, %v3620_v2  ;;  %v7511_v0 = vmul.f32 %v7222_v52, %v7497_v22 }
 0x48b   :  { %v3747_v23 = vrot.slane %v7479_v30, 4  ;;  %v3746_v4 = vrot.slane %v3732_v33, 4  ;;  %v3788_v35 = vrot.slane %v3776_v5, 4  ;;  %v3781_v30 = vmul.f32 %v7112_v12, %v7497_v22 }
 0x48c   :  { %v3667_v10 = vrot.slane %v7485_v29, 4 }
 0x48e   :  { %3751 = vrot.lane.b32.xlu1 %v3743_v20, %s4293_s27  ;;  %3632 = vrot.lane.b32.xlu0 %v3620_v2, %s4293_s27  ;;  %v3668_v19 = vsel %vm355_vm4, %v3666_v46, %v3667_v10 }
 0x48f   :  { %3624 = vrot.lane.b32.xlu2 %v3616_v56, %s4293_s27  ;;  %v3789_v56 = vrot.slane %v7511_v0, 4  ;;  %v3749_v0 = vrot.slane %v3734_v44, 4  ;;  %v7602_v44 = vstv %s4133_s9 }
 0x490   :  { %v3356_v48 = vpop.permute.xlu1 %3355  ;;  %v3329_v43 = vpop.permute.xlu0 %3328 }
 0x491   :  { %v3358_v36 = vpop.permute.xlu2 %3357  ;;  %v7492_v28 = vadd.f32 %v3356_v48, %v3300_v27  ;;  %v3339_v34 = vadd.f32 %v3329_v43, %v7272_v60  ;;  %v3748_v27 = vsel %vm355_vm4, %v3746_v4, %v3747_v23  ;;  %v3651_v60 = vmul.f32 %v7190_v57, %v7421_v1 }
 0x492   :  { %v7494_v9 = vadd.f32 %v3358_v36, %v3301_v59  ;;  %v3744_v48 = vrot.slane %v3731_v61, 4  ;;  %v3790_v36 = vsel %vm355_vm4, %v3788_v35, %v3789_v56  ;;  %v3779_v43 = vmul.f32 %v7198_v3, %v7497_v22 }
 0x493   :  { %v3664_v29 = vrot.slane %v3651_v60, 4  ;;  %v7575_v35 = vstv %s4130_s8 }
 0x494   :  { %v3793_v5 = vrot.slane %v3779_v43, 4  ;;  %v3745_v55 = vsel %vm355_vm4, %v3742_v47, %v3744_v48 }
 0x495   :  { %v3665_v11 = vsel %vm355_vm4, %v3662_v49, %v3664_v29  ;;  %v3750_v29 = vsel %vm355_vm4, %v3747_v23, %v3749_v0 }
 0x496   :  { %3757 = vrot.lane.b32.xlu1 %v3748_v27, %s4293_s27  ;;  %3675 = vrot.lane.b32.xlu0 %v3668_v19, %s4293_s27  ;;  %v3778_v19 = vmul.f32 %v7240_v13, %v7497_v22 }
 0x497   :  { %3630 = vrot.lane.b32.xlu2 %v3621_v32, %s4293_s27 }
 0x498   :  { %v3379_v6 = vpop.permute.xlu1 %3378  ;;  %v3354_v51 = vpop.permute.xlu0 %3353  ;;  %v3791_v61 = vrot.slane %v3778_v19, 4 }
 0x499   :  { %v3381_v59 = vpop.permute.xlu2 %3380  ;;  %v7521_v2 = vadd.f32 %v3379_v6, %v3338_v7  ;;  %v7527_v33 = vadd.f32 %v3354_v51, %v7414_v45  ;;  %v7537_v7 = vmul.f32 %v7284_v24, %v7497_v22 }
 0x49a   :  { %v7523_v20 = vadd.f32 %v3381_v59, %v3339_v34 }
 0x49b   :  { %v3794_v27 = vrot.slane %v7537_v7, 4  ;;  %v3825_v7 = vmul.f32 %v7099_v39, %v7602_v44 }
 0x49d   :  { %v3795_v60 = vsel %vm355_vm4, %v3793_v5, %v3794_v27  ;;  %v3690_v5 = vmul.f32 %v7240_v13, %v7575_v35 }
 0x49e   :  { %3798 = vrot.lane.b32.xlu1 %v3790_v36, %s4293_s27  ;;  %3755 = vrot.lane.b32.xlu0 %v3744_v48, %s4293_s27 }
 0x49f   :  { %3673 = vrot.lane.b32.xlu2 %v3665_v11, %s4293_s27 }
 0x4a0   :  { %v3385_v45 = vpop.permute.xlu1 %3384  ;;  %v3360_v4 = vpop.permute.xlu0 %3359 }
 0x4a1   :  { %v3410_v34 = vpop.permute.xlu2 %3409  ;;  %v7544_v49 = vadd.f32 %v3385_v45, %v3341_v31  ;;  %v7551_v32 = vadd.f32 %v3360_v4, %v7439_v38  ;;  %v3792_v4 = vsel %vm355_vm4, %v3789_v56, %v3791_v61 }
 0x4a2   :  { %v7547_v46 = vadd.f32 %v3410_v34, %v7302_v16  ;;  %v3654_v16 = vmul.f32 %v7219_v41, %v7421_v1  ;;  %v3796_v34 = vrot.slane %v3781_v30, 4 }
 0x4a4   :  { %v3669_v47 = vrot.slane %v3654_v16, 4 }
 0x4a6   :  { %3804 = vrot.lane.b32.xlu1 %v3795_v60, %s4293_s27  ;;  %3761 = vrot.lane.b32.xlu0 %v3749_v0, %s4293_s27  ;;  %v3670_v51 = vsel %vm355_vm4, %v3667_v10, %v3669_v47  ;;  %v7619_v60 = vstv %s4134_s10 }
 0x4a7   :  { %3753 = vrot.lane.b32.xlu2 %v3745_v55, %s4293_s27  ;;  %v3864_v47 = vmul.f32 %v7063_v42, %v7619_v60 }
 0x4a8   :  { %v3414_v38 = vpop.permute.xlu1 %3413  ;;  %v3383_v6 = vpop.permute.xlu0 %3382 }
 0x4a9   :  { %v3416_v31 = vpop.permute.xlu2 %3415  ;;  %v7567_v59 = vadd.f32 %v3414_v38, %v7368_v37  ;;  %v7573_v1 = vadd.f32 %v3383_v6, %v7466_v58  ;;  %v3691_v37 = vmul.f32 %v7198_v3, %v7575_v35  ;;  %v3703_v6 = vrot.slane %v3690_v5, 4 }
 0x4aa   :  { %v7570_v63 = vadd.f32 %v3416_v31, %v7329_v17  ;;  %v7585_v17 = vmul.f32 %v7284_v24, %v7575_v35 }
 0x4ab   :  { %v3705_v11 = vrot.slane %v3691_v37, 4 }
 0x4ac   :  { %v3706_v43 = vrot.slane %v7585_v17, 4 }
 0x4ae   :  { %3677 = vrot.lane.b32.xlu1 %v3670_v51, %s4293_s27  ;;  %3802 = vrot.lane.b32.xlu0 %v3791_v61, %s4293_s27  ;;  %v3707_v22 = vsel %vm355_vm4, %v3705_v11, %v3706_v43  ;;  %v3688_v51 = vmul.f32 %v7063_v42, %v7575_v35  ;;  %v3837_v11 = vrot.slane %v3825_v7, 6 }
 0x4af   :  { %3759 = vrot.lane.b32.xlu2 %v3750_v29, %s4293_s27 }
 0x4b0   :  { %v3420_v58 = vpop.permute.xlu1 %3419  ;;  %v3412_v23 = vpop.permute.xlu0 %3411  ;;  %v3700_v30 = vrot.slane %v3688_v51, 4  ;;  %v3866_v51 = vmul.f32 %v7240_v13, %v7619_v60 }
 0x4b1   :  { %v3447_v48 = vpop.permute.xlu2 %3446  ;;  %v7593_v10 = vadd.f32 %v3420_v58, %v7398_v18  ;;  %v7600_v45 = vadd.f32 %v3412_v23, %v7305_v8  ;;  %v3826_v18 = vmul.f32 %v7056_v15, %v7602_v44  ;;  %v3689_v8 = vmul.f32 %v7222_v52, %v7575_v35 }
 0x4b2   :  { %v7596_v36 = vadd.f32 %v3447_v48, %v7361_v40  ;;  %v3827_v40 = vmul.f32 %v7190_v57, %v7602_v44 }
 0x4b3   :  { %v3838_v16 = vrot.slane %v3826_v18, 6  ;;  %v3701_v19 = vrot.slane %v3689_v8, 4 }
 0x4b4   :  { %v3840_v38 = vrot.slane %v3827_v40, 6 }
 0x4b6   :  { %3714 = vrot.lane.b32.xlu1 %v3707_v22, %s4293_s27  ;;  %3808 = vrot.lane.b32.xlu0 %v3796_v34, %s4293_s27  ;;  %v3841_v61 = vsel %vm492_vm5, %v3838_v16, %v3840_v38  ;;  %v3702_v22 = vsel %vm355_vm4, %v3700_v30, %v3701_v19 }
 0x4b7   :  { %3800 = vrot.lane.b32.xlu2 %v3792_v4, %s4293_s27  ;;  %v3839_v4 = vsel %vm492_vm5, %v3837_v11, %v3838_v16 }
 0x4b8   :  { %v3451_v0 = vpop.permute.xlu1 %3450  ;;  %v3418_v15 = vpop.permute.xlu0 %3417 }
 0x4b9   :  { %v3453_v56 = vpop.permute.xlu2 %3452  ;;  %v7622_v55 = vadd.f32 %v3451_v0, %v7419_v14  ;;  %v7628_v31 = vadd.f32 %v3418_v15, %v7332_v53  ;;  %v3797_v14 = vsel %vm355_vm4, %v3794_v27, %v3796_v34  ;;  %v3704_v53 = vsel %vm355_vm4, %v3701_v19, %v3703_v6 }
 0x4ba   :  { %v7625_v57 = vadd.f32 %v3453_v56, %v7391_v50  ;;  %v7638_v50 = vmul.f32 %v7222_v52, %v7619_v60  ;;  %v3876_v27 = vrot.slane %v3864_v47, 6  ;;  %v3868_v34 = vmul.f32 %v7284_v24, %v7619_v60 }
 0x4bb   :  { %v3830_v24 = vmul.f32 %v7219_v41, %v7602_v44 }
 0x4bc   :  { %v3877_v48 = vrot.slane %v7638_v50, 6  ;;  %v3882_v8 = vrot.slane %v3868_v34, 6 }
 0x4bd   :  { %v3845_v16 = vrot.slane %v3830_v24, 6 }
 0x4be   :  { %3849 = vrot.lane.b32.xlu1 %v3841_v61, %s4293_s27  ;;  %3712 = vrot.lane.b32.xlu0 %v3704_v53, %s4293_s27  ;;  %v3878_v39 = vsel %vm492_vm5, %v3876_v27, %v3877_v48 }
 0x4bf   :  { %3806 = vrot.lane.b32.xlu2 %v3797_v14, %s4293_s27 }
 0x4c0   :  { %v3457_v29 = vpop.permute.xlu1 %3456  ;;  %v3449_v58 = vpop.permute.xlu0 %3448 }
 0x4c1   :  { %v3496_v37 = vpop.permute.xlu2 %3495  ;;  %v7649_v52 = vadd.f32 %v3457_v29, %v7446_v26  ;;  %v7656_v23 = vadd.f32 %v3449_v58, %v7364_v25  ;;  %v3869_v26 = vmul.f32 %v7112_v12, %v7619_v60  ;;  %v3829_v25 = vmul.f32 %v7153_v54, %v7602_v44 }
 0x4c2   :  { %v7652_v42 = vadd.f32 %v3496_v37, %v7527_v33  ;;  %v3693_v33 = vmul.f32 %v7112_v12, %v7575_v35  ;;  %v3879_v29 = vrot.slane %v3866_v51, 6 }
 0x4c3   :  { %v3884_v0 = vrot.slane %v3869_v26, 6  ;;  %v3843_v54 = vrot.slane %v3829_v25, 6 }
 0x4c4   :  { %v3708_v56 = vrot.slane %v3693_v33, 4  ;;  %v3880_v7 = vsel %vm492_vm5, %v3877_v48, %v3879_v29 }
 0x4c5   :  { %v3885_v41 = vsel %vm492_vm5, %v3882_v8, %v3884_v0  ;;  %v3846_v19 = vsel %vm492_vm5, %v3843_v54, %v3845_v16 }
 0x4c6   :  { %3886 = vrot.lane.b32.xlu1 %v3878_v39, %s4293_s27  ;;  %3847 = vrot.lane.b32.xlu0 %v3839_v4, %s4293_s27  ;;  %v3709_v38 = vsel %vm355_vm4, %v3706_v43, %v3708_v56 }
 0x4c7   :  { %3710 = vrot.lane.b32.xlu2 %v3702_v22, %s4293_s27 }
 0x4c8   :  { %v3500_v18 = vpop.permute.xlu1 %3499  ;;  %v3455_v5 = vpop.permute.xlu0 %3454 }
 0x4c9   :  { %v3502_v40 = vpop.permute.xlu2 %3501  ;;  %v7675_v12 = vadd.f32 %v3500_v18, %v7494_v9  ;;  %v3468_v15 = vadd.f32 %v3455_v5, %v7394_v62  ;;  %v3867_v9 = vmul.f32 %v7198_v3, %v7619_v60  ;;  %v3828_v62 = vmul.f32 %v7193_v21, %v7602_v44 }
 0x4ca   :  { %v7678_v35 = vadd.f32 %v3502_v40, %v7551_v32 }
 0x4cb   :  { %v3881_v14 = vrot.slane %v3867_v9, 6  ;;  %v3842_v50 = vrot.slane %v3828_v62, 6 }
 0x4cd   :  { %v3844_v3 = vsel %vm492_vm5, %v3842_v50, %v3843_v54  ;;  %v3883_v21 = vsel %vm492_vm5, %v3881_v14, %v3882_v8 }
 0x4ce   :  { %3892 = vrot.lane.b32.xlu1 %v3885_v41, %s4293_s27  ;;  %3853 = vrot.lane.b32.xlu0 %v3846_v19, %s4293_s27 }
 0x4cf   :  { %3716 = vrot.lane.b32.xlu2 %v3709_v38, %s4293_s27 }
 0x4d0   :  { %v3537_v32 = vpop.permute.xlu1 %3536  ;;  %v3498_v47 = vpop.permute.xlu0 %3497 }
 0x4d1   :  { %v3539_v6 = vpop.permute.xlu2 %3538  ;;  %v7694_v17 = vadd.f32 %v3537_v32, %v7523_v20  ;;  %v7700_v61 = vadd.f32 %v3498_v47, %v7492_v28 }
 0x4d2   :  { %v7697_v43 = vadd.f32 %v3539_v6, %v7573_v1 }
 0x4d6   :  { %3890 = vrot.lane.b32.xlu0 %v3883_v21, %s4293_s27 }
 0x4d7   :  { %3851 = vrot.lane.b32.xlu2 %v3844_v3, %s4293_s27 }
 0x4d8   :  { %v3576_v20 = vpop.permute.xlu1 %3575  ;;  %v3535_v1 = vpop.permute.xlu0 %3534 }
 0x4d9   :  { %v3578_v44 = vpop.permute.xlu2 %3577  ;;  %v3593_v53 = vadd.f32 %v3576_v20, %v7547_v46  ;;  %v7711_v37 = vadd.f32 %v3535_v1, %v7521_v2 }
 0x4da   :  { %v3594_v28 = vadd.f32 %v3578_v44, %v7600_v45 }
 0x4df   :  { %3888 = vrot.lane.b32.xlu2 %v3880_v7, %s4293_s27 }
 0x4e0   :  { %v3582_v13 = vpop.permute.xlu1 %3581  ;;  %v3541_v27 = vpop.permute.xlu0 %3540 }
 0x4e1   :  { %v3584_v60 = vpop.permute.xlu2 %3583  ;;  %v3596_v58 = vadd.f32 %v3582_v13, %v7570_v63  ;;  %v7718_v11 = vadd.f32 %v3541_v27, %v7544_v49 }
 0x4e2   :  { %v3597_v30 = vadd.f32 %v3584_v60, %v7628_v31 }
 0x4e8   :  { %v3623_v46 = vpop.permute.xlu1 %3622  ;;  %v3580_v34 = vpop.permute.xlu0 %3579 }
 0x4e9   :  { %v3625_v45 = vpop.permute.xlu2 %3624  ;;  %v3640_v2 = vadd.f32 %v3623_v46, %v7596_v36  ;;  %v3595_v48 = vadd.f32 %v3580_v34, %v7567_v59 }
 0x4ea   :  { %v3641_v39 = vadd.f32 %v3625_v45, %v7656_v23 }
 0x4f0   :  { %v3629_v22 = vpop.permute.xlu1 %3628  ;;  %v3586_v33 = vpop.permute.xlu0 %3585 }
 0x4f1   :  { %v3631_v26 = vpop.permute.xlu2 %3630  ;;  %v3643_v4 = vadd.f32 %v3629_v22, %v7625_v57  ;;  %v3598_v31 = vadd.f32 %v3586_v33, %v7593_v10 }
 0x4f2   :  { %v3644_v63 = vadd.f32 %v3631_v26, %v3468_v15 }
 0x4f8   :  { %v3672_v25 = vpop.permute.xlu1 %3671  ;;  %v3627_v24 = vpop.permute.xlu0 %3626 }
 0x4f9   :  { %v3674_v49 = vpop.permute.xlu2 %3673  ;;  %v3642_v20 = vadd.f32 %v3627_v24, %v7622_v55 }
 0x500   :  { %v3752_v18 = vpop.permute.xlu1 %3751  ;;  %v3633_v8 = vpop.permute.xlu0 %3632 }
 0x501   :  { %v3754_v40 = vpop.permute.xlu2 %3753  ;;  %v3769_v56 = vadd.f32 %v3752_v18, %v3593_v53  ;;  %v3645_v13 = vadd.f32 %v3633_v8, %v7649_v52 }
 0x502   :  { %v3770_v54 = vadd.f32 %v3754_v40, %v3594_v28 }
 0x508   :  { %v3758_v5 = vpop.permute.xlu1 %3757  ;;  %v7725_v0 = vpop.permute.xlu0 %3675 }
 0x509   :  { %v3760_v36 = vpop.permute.xlu2 %3759  ;;  %v3772_v32 = vadd.f32 %v3758_v5, %v3596_v58 }
 0x50a   :  { %v3773_v6 = vadd.f32 %v3760_v36, %v3597_v30 }
 0x510   :  { %v3799_v23 = vpop.permute.xlu1 %3798  ;;  %v3756_v16 = vpop.permute.xlu0 %3755 }
 0x511   :  { %v3801_v59 = vpop.permute.xlu2 %3800  ;;  %v3816_v41 = vadd.f32 %v3799_v23, %v3640_v2  ;;  %v3771_v28 = vadd.f32 %v3756_v16, %v3595_v48 }
 0x512   :  { %v3817_v57 = vadd.f32 %v3801_v59, %v3641_v39 }
 0x513   :  { %v3906_v15 = vadd.f32 %v3816_v41, %v3769_v56 }
 0x514   :  { %v3907_v38 = vadd.f32 %v3817_v57, %v3770_v54 }
 0x515   :  { %v3919_v10 = vrot.slane %v3906_v15, 1 }
 0x516   :  { %v3920_v19 = vrot.slane %v3907_v38, 1 }
 0x518   :  { %v3805_v9 = vpop.permute.xlu1 %3804  ;;  %v3762_v47 = vpop.permute.xlu0 %3761  ;;  %v3921_v21 = vsel %vm3918_vm6, %v3919_v10, %v3920_v19 }
 0x519   :  { %v3807_v62 = vpop.permute.xlu2 %3806  ;;  %v3819_v14 = vadd.f32 %v3805_v9, %v3643_v4  ;;  %v3774_v30 = vadd.f32 %v3762_v47, %v3598_v31  ;;  %v3684_v4 = vadd.f32 %v3674_v49, %v7700_v61  ;;  %v3683_v31 = vadd.f32 %v3672_v25, %v7652_v42 }
 0x51a   :  { %v3820_v50 = vadd.f32 %v3807_v62, %v3644_v63 }
 0x51b   :  { %v3909_v3 = vadd.f32 %v3819_v14, %v3772_v32  ;;  %v3685_v32 = vadd.f32 %v7725_v0, %v7675_v12 }
 0x51c   :  { %v3910_v51 = vadd.f32 %v3820_v50, %v3773_v6 }
 0x51d   :  { %v3924_v24 = vrot.slane %v3909_v3, 1 }
 0x51e   :  { %v3925_v39 = vrot.slane %v3910_v51, 1 }
 0x520   :  { %v3678_v44 = vpop.permute.xlu1 %3677  ;;  %v3803_v53 = vpop.permute.xlu0 %3802  ;;  %v3926_v16 = vsel %vm3918_vm6, %v3924_v24, %v3925_v39 }
 0x521   :  { %v3711_v1 = vpop.permute.xlu2 %3710  ;;  %v3818_v29 = vadd.f32 %v3803_v53, %v3642_v20 }
 0x522   :  { %v3722_v52 = vadd.f32 %v3711_v1, %v7711_v37 }
 0x523   :  { %v3908_v7 = vadd.f32 %v3818_v29, %v3771_v28 }
 0x525   :  { %v3922_v34 = vrot.slane %v3908_v7, 1 }
 0x527   :  { %v3923_v33 = vsel %vm3918_vm6, %v3920_v19, %v3922_v34 }
 0x528   :  { %v3715_v60 = vpop.permute.xlu1 %3714  ;;  %v3809_v58 = vpop.permute.xlu0 %3808 }
 0x529   :  { %v3717_v27 = vpop.permute.xlu2 %3716  ;;  %v3821_v46 = vadd.f32 %v3809_v58, %v3645_v13  ;;  %v3724_v6 = vadd.f32 %v3715_v60, %v7697_v43 }
 0x52a   :  { %v3725_v37 = vadd.f32 %v3717_v27, %v7718_v11 }
 0x52b   :  { %v3911_v45 = vadd.f32 %v3821_v46, %v3774_v30 }
 0x52d   :  { %v3927_v2 = vrot.slane %v3911_v45, 1 }
 0x52f   :  { %v3928_v48 = vsel %vm3918_vm6, %v3925_v39, %v3927_v2 }
 0x530   :  { %v3850_v22 = vpop.permute.xlu1 %3849  ;;  %v3713_v55 = vpop.permute.xlu0 %3712 }
 0x531   :  { %v3852_v26 = vpop.permute.xlu2 %3851  ;;  %v3723_v63 = vadd.f32 %v3713_v55, %v7694_v17  ;;  %v3860_v8 = vadd.f32 %v3850_v22, %v3684_v4  ;;  %v3686_v17 = vadd.f32 %v3678_v44, %v7678_v35 }
 0x532   :  { %v3861_v50 = vadd.f32 %v3852_v26, %v3685_v32 }
 0x538   :  { %v3887_v18 = vpop.permute.xlu1 %3886  ;;  %v3848_v5 = vpop.permute.xlu0 %3847 }
 0x539   :  { %v3889_v40 = vpop.permute.xlu2 %3888  ;;  %v3898_v36 = vadd.f32 %v3887_v18, %v3722_v52  ;;  %v3859_v59 = vadd.f32 %v3848_v5, %v3683_v31 }
 0x53a   :  { %v3899_v23 = vadd.f32 %v3889_v40, %v3723_v63 }
 0x53b   :  { %v3902_v54 = vadd.f32 %v3898_v36, %v3859_v59 }
 0x53c   :  { %v3903_v56 = vadd.f32 %v3899_v23, %v3860_v8 }
 0x53d   :  { %v3933_v61 = vadd.f32 %v3921_v21, %v3902_v54 }
 0x53e   :  { %v3934_v41 = vadd.f32 %v3923_v33, %v3903_v56 }
 0x53f   :  { %v4135_v42 = vmul.f32 -1.442695, %v3933_v61 }
 0x540   :  { %v4136_v49 = vmul.f32 -1.442695, %v3934_v41  ;;  %v3893_v25 = vpop.permute.xlu1 %3892  ;;  %v3854_v57 = vpop.permute.xlu0 %3853 }
 0x541   :  { %v3901_v15 = vadd.f32 %v3893_v25, %v3725_v37  ;;  %v3862_v38 = vadd.f32 %v3854_v57, %v3686_v17 }
 0x542   :  { %4152 = vpow2.f32 %v4136_v49 }
 0x543   :  { %4154 = vpow2.f32 %v4135_v42  ;;  %v3905_v10 = vadd.f32 %v3901_v15, %v3862_v38 }
 0x545   :  { %v3936_v19 = vadd.f32 %v3928_v48, %v3905_v10 }
 0x547   :  { %v4138_v47 = vmul.f32 -1.442695, %v3936_v19 }
 0x548   :  { %v4153_v9 = vpop.eup %4152  ;;  %v3891_v35 = vpop.permute.xlu0 %3890 }
 0x549   :  { %v4155_v62 = vpop.eup %4154  ;;  %v3950_v11 = vadd.f32 1.0, %v4153_v9  ;;  %v3900_v3 = vadd.f32 %v3891_v35, %v3724_v6 }
 0x54a   :  { %v3949_v14 = vadd.f32 1.0, %v4155_v62 }
 0x54b   :  { %4156 = vrcp.f32 %v3950_v11  ;;  %v3904_v51 = vadd.f32 %v3900_v3, %v3861_v50  ;;  %v3977_v7 = vand.u32 2147483647, %v3950_v11  ;;  %v3979_v13 = vand.u32 2147483648, %v3950_v11 }
 0x54c   :  { %4158 = vrcp.f32 %v3949_v14  ;;  %v3964_v60 = vand.u32 2147483648, %v3949_v14  ;;  %v3962_v30 = vand.u32 2147483647, %v3949_v14  ;;  %vm3973_vm9 = vweird.f32 %v3950_v11 }
 0x54d   :  { %4160 = vpow2.f32 %v4138_v47  ;;  %v3935_v21 = vadd.f32 %v3926_v16, %v3904_v51  ;;  %vm3958_vm10 = vweird.f32 %v3949_v14  ;;  %v3980_v2 = vor.u32 1.1754944e-38, %v3979_v13 }
 0x54e   :  { %v3965_v22 = vor.u32 1.1754944e-38, %v3964_v60  ;;  %vm3978_vm14 = vcmp.eq.f32.partialorder %v3977_v7, 8.507059e+37  ;;  %vm3963_vm15 = vcmp.eq.f32.partialorder %v3962_v30, 8.507059e+37 }
 0x54f   :  { %v4137_v44 = vmul.f32 -1.442695, %v3935_v21 }
 0x551   :  { %v4157_v20 = vpop.eup %4156  ;;  %4162 = vpow2.f32 %v4137_v44 }
 0x552   :  { %v4159_v1 = vpop.eup %4158  ;;  %v3969_v53 = vmul.f32 %v4157_v20, %v3950_v11  ;;  %vm3974_vm7 = vweird.f32 %v4157_v20 }
 0x553   :  { %v4161_v28 = vpop.eup %4160  ;;  %v3954_v29 = vmul.f32 %v4159_v1, %v3949_v14  ;;  %vm3959_vm8 = vweird.f32 %v4159_v1  ;;  %vm3975_vm11 = vmor %vm3973_vm9, %vm3974_vm7 }
 0x554   :  { %v3952_v12 = vadd.f32 1.0, %v4161_v28  ;;  %v3970_v43 = vsub.f32 1.0, %v3969_v53  ;;  %vm3960_vm13 = vmor %vm3958_vm10, %vm3959_vm8 }
 0x555   :  { %v3955_v0 = vsub.f32 1.0, %v3954_v29 }
 0x556   :  { %4164 = vrcp.f32 %v3952_v12  ;;  %v3971_v27 = vmul.f32 %v4157_v20, %v3970_v43  ;;  %v4009_v31 = vand.u32 2147483648, %v3952_v12  ;;  %v4007_v18 = vand.u32 2147483647, %v3952_v12 }
 0x557   :  { %v3956_v58 = vmul.f32 %v4159_v1, %v3955_v0  ;;  %v4163_v45 = vpop.eup %4162  ;;  %vm4003_vm1 = vweird.f32 %v3952_v12 }
 0x558   :  { %v3972_v46 = vadd.f32 %v4157_v20, %v3971_v27  ;;  %v3951_v39 = vadd.f32 1.0, %v4163_v45  ;;  %v4010_v36 = vor.u32 1.1754944e-38, %v4009_v31  ;;  %vm4008_vm3 = vcmp.eq.f32.partialorder %v4007_v18, 8.507059e+37 }
 0x559   :  { %v3957_v34 = vadd.f32 %v4159_v1, %v3956_v58 }
 0x55a   :  { %v3976_v26 = vsel %vm3975_vm11, %v4157_v20, %v3972_v46  ;;  %4166 = vrcp.f32 %v3951_v39  ;;  %v3994_v56 = vand.u32 2147483648, %v3951_v39  ;;  %v3992_v41 = vand.u32 2147483647, %v3951_v39 }
 0x55b   :  { %v3961_v55 = vsel %vm3960_vm13, %v4159_v1, %v3957_v34  ;;  %v3981_v33 = vsel %vm3978_vm14, %v3980_v2, %v3976_v26  ;;  %vm3988_vm5 = vweird.f32 %v3951_v39 }
 0x55c   :  { %v4165_v48 = vpop.eup %4164  ;;  %v3966_v4 = vsel %vm3963_vm15, %v3965_v22, %v3961_v55  ;;  %4015 = vst.msk [vmem:[#allocation9 + $0x8] sm:$0xff] %vm4013_vm12, %v3981_v33  ;;  %v3995_v37 = vor.u32 1.1754944e-38, %v3994_v56  ;;  %vm3993_vm7 = vcmp.eq.f32.partialorder %v3992_v41, 8.507059e+37 }
 0x55d   :  { %v3999_v52 = vmul.f32 %v4165_v48, %v3952_v12  ;;  %4014 = vst.msk [vmem:[#allocation9] sm:$0xff] %vm4013_vm12, %v3966_v4  ;;  %vm4004_vm0 = vweird.f32 %v4165_v48 }
 0x55e   :  { %vm4005_vm2 = vmor %vm4003_vm1, %vm4004_vm0 }
 0x55f   :  { %v4000_v63 = vsub.f32 1.0, %v3999_v52 }
 0x560   :  { %v4167_v40 = vpop.eup %4166 }
 0x561   :  { %v4001_v24 = vmul.f32 %v4165_v48, %v4000_v63  ;;  %v3984_v8 = vmul.f32 %v4167_v40, %v3951_v39  ;;  %vm3989_vm4 = vweird.f32 %v4167_v40 }
 0x562   :  { %vm3990_vm6 = vmor %vm3988_vm5, %vm3989_vm4 }
 0x563   :  { %v4002_v5 = vadd.f32 %v4165_v48, %v4001_v24  ;;  %v3985_v23 = vsub.f32 1.0, %v3984_v8 }
 0x565   :  { %v4006_v59 = vsel %vm4005_vm2, %v4165_v48, %v4002_v5  ;;  %v3986_v16 = vmul.f32 %v4167_v40, %v3985_v23 }
 0x566   :  { %v4011_v54 = vsel %vm4008_vm3, %v4010_v36, %v4006_v59 }
 0x567   :  { %4017 = vst.msk [vmem:[#allocation9 + $0x18] sm:$0xff] %vm4013_vm12, %v4011_v54  ;;  %v3987_v61 = vadd.f32 %v4167_v40, %v3986_v16 }
 0x569   :  { %v3991_v49 = vsel %vm3990_vm6, %v4167_v40, %v3987_v61 }
 0x56a   :  { %v3996_v17 = vsel %vm3993_vm7, %v3995_v37, %v3991_v49 }
 0x56b   :  { %4016 = vst.msk [vmem:[#allocation9 + $0x10] sm:$0xff] %vm4013_vm12, %v3996_v17 }
 0x56c   :  { %4030 = dma.vmem_to_hbm [thread:$0]  %s4023_s12, 512, %s4025_s15, [#allocation6], %s4284_s18, %s4284_s18, %s4285_s19  }
 0x56d   :  { %4280 = dma.done.wait [#allocation6], 512  }
 0x56e   :  { %4281 = vsyncadd [#allocation6], 4294966784 }
 0x56f   :  { %4035 = vsyncpa [#allocation5], 1 }
 0x570   :  { %4036 = vsyncpa [#allocation6], 1 }
 0x571   :  { %4037 = vsyncpa [#allocation7], 1 }

</bundles_post_ra>
